<compile_context>
chip_gen: v7x
topology: tpu7x:2x2x1
jax: 0.10.0
libtpu: 0.0.40
codegen_flags: <defaults>
</compile_context>

<pallas_src>
import functools

import jax
import jax.numpy as jnp
from jax.experimental import pallas as pl
from jax.experimental.pallas import tpu as pltpu

NEG_SLOPE = 0.01   # nn.LeakyReLU default negative_slope
BN_EPS = 1e-5      # nn.BatchNorm2d default eps


# ---------------------------------------------------------------------------
# Fused kernel: 1x1 conv+BN+LeakyReLU -> (pad) 3x3 conv+BN+LeakyReLU ->
#               1x1 conv+BN + residual + ReLU, all in VMEM per image.
# ---------------------------------------------------------------------------
def _res_block_kernel(x_ref, w1_ref, s1_ref, t1_ref,
                      w2_ref, s2_ref, t2_ref,
                      w3_ref, s3_ref, t3_ref,
                      o_ref, hp_ref, *, circular):
    H = o_ref.shape[1]
    W = o_ref.shape[2]
    Cin = x_ref.shape[3]
    mid = w1_ref.shape[1]
    Cout = w3_ref.shape[1]

    # ---- stage 1: Conv2d(in, mid, 1) + folded BN + LeakyReLU ---------------
    x2d = x_ref[0].reshape(H * W, Cin)
    h1 = jnp.dot(x2d, w1_ref[...], preferred_element_type=jnp.float32)
    h1 = h1 * s1_ref[...] + t1_ref[...]
    h1 = jnp.where(h1 >= 0.0, h1, NEG_SLOPE * h1)
    h1 = h1.reshape(H, W, mid)

    # ---- stage 2: pad h1 into VMEM scratch (zero height pad; zero or
    #      circular width pad), then 3x3 conv as ONE im2col matmul -----------
    if circular:   # polar_CBR: circular width pad of the unpadded tensor
        left = h1[:, W - 1:W, :]
        right = h1[:, 0:1, :]
    else:          # CBR: zero width pad
        left = jnp.zeros((H, 1, mid), jnp.float32)
        right = jnp.zeros((H, 1, mid), jnp.float32)
    body = jnp.concatenate([left, h1, right], axis=1)        # (H, W+2, mid)
    zrow = jnp.zeros((1, W + 2, mid), jnp.float32)
    hp_ref[...] = jnp.concatenate([zrow, body, zrow], axis=0)  # (H+2, W+2, mid)

    cols = [hp_ref[dy:dy + H, dx:dx + W, :].reshape(H * W, mid)
            for dy in range(3) for dx in range(3)]
    patch = jnp.concatenate(cols, axis=1)                     # (H*W, 9*mid)
    h2 = jnp.dot(patch, w2_ref[...], preferred_element_type=jnp.float32)
    h2 = h2 * s2_ref[...] + t2_ref[...]
    h2 = jnp.where(h2 >= 0.0, h2, NEG_SLOPE * h2)

    # ---- stage 3: Conv2d(mid, out, 1) + folded BN + residual + ReLU --------
    y = jnp.dot(h2, w3_ref[...], preferred_element_type=jnp.float32)
    y = y * s3_ref[...] + t3_ref[...] + x2d     # iden = Identity (Cin == Cout)
    y = jnp.maximum(y, 0.0)
    o_ref[...] = y.reshape(1, H, W, Cout).astype(o_ref.dtype)


def _res_block_forward_impl(x_nchw, p, circular_padding=False):
    N, Cin, H, W = x_nchw.shape
    mid = p["w1"].shape[1]
    Cout = p["w3"].shape[1]
    assert Cin == Cout, "only the identity-residual branch (in_ch == out_ch) is implemented"

    # TODO(synk): keep the surrounding model NHWC to drop these two transposes.
    x = jnp.transpose(x_nchw, (0, 2, 3, 1))                   # NHWC

    # Rough per-grid-step VMEM working set: double-buffered in/out blocks +
    # padded-h1 scratch + im2col/intermediates + weights. Only raise the
    # scoped limit when the default (16/32 MiB) would be too small.
    f32 = 4
    est = (2 * H * W * (Cin + Cout)
           + (H + 2) * (W + 2) * mid
           + H * W * (9 * mid + 2 * mid)
           + 9 * mid * mid + Cin * mid + mid * Cout
           + 4 * (mid + Cout)) * f32
    cp_kwargs = dict(dimension_semantics=("parallel",))
    if est > 12 * 1024 * 1024:
        cp_kwargs["vmem_limit_bytes"] = int(min(1.5 * est, 100 * 1024 * 1024))

    kernel = functools.partial(_res_block_kernel, circular=circular_padding)
    y = pl.pallas_call(
        kernel,
        out_shape=jax.ShapeDtypeStruct((N, H, W, Cout), jnp.float32),
        grid_spec=pltpu.PrefetchScalarGridSpec(
            num_scalar_prefetch=0,
            grid=(N,),
            in_specs=[
                pl.BlockSpec((1, H, W, Cin), lambda b: (b, 0, 0, 0)),
                pl.BlockSpec((Cin, mid), lambda b: (0, 0)),
                pl.BlockSpec((1, mid), lambda b: (0, 0)),
                pl.BlockSpec((1, mid), lambda b: (0, 0)),
                pl.BlockSpec((9 * mid, mid), lambda b: (0, 0)),
                pl.BlockSpec((1, mid), lambda b: (0, 0)),
                pl.BlockSpec((1, mid), lambda b: (0, 0)),
                pl.BlockSpec((mid, Cout), lambda b: (0, 0)),
                pl.BlockSpec((1, Cout), lambda b: (0, 0)),
                pl.BlockSpec((1, Cout), lambda b: (0, 0)),
            ],
            out_specs=pl.BlockSpec((1, H, W, Cout), lambda b: (b, 0, 0, 0)),
            scratch_shapes=[pltpu.VMEM((H + 2, W + 2, mid), jnp.float32)],
        ),
        compiler_params=pltpu.CompilerParams(**cp_kwargs),
    )(x, p["w1"], p["s1"], p["t1"], p["w2"], p["s2"], p["t2"],
      p["w3"], p["s3"], p["t3"])

    return jnp.transpose(y, (0, 3, 1, 2))                     # back to NCHW


res_block_forward = jax.jit(_res_block_forward_impl,
                            static_argnames=("circular_padding",))


# ---------------------------------------------------------------------------
# Parameter construction (deterministic) + BN folding
# ---------------------------------------------------------------------------
def _fold_bn(bias, gamma, beta, mean, var):
    s = gamma / jnp.sqrt(var + BN_EPS)
    t = beta + (bias - mean) * s
    return s[None, :], t[None, :]                             # (1, C)


def make_params(key, in_ch, mid_ch, out_ch):
    ks = jax.random.split(key, 16)
    p = {}
    # 1x1 conv in_ch -> mid_ch  (weight stored as (Cin, Cout))
    p["w1"] = 0.1 * jax.random.normal(ks[0], (in_ch, mid_ch), jnp.float32)
    b1 = 0.1 * jax.random.normal(ks[1], (mid_ch,), jnp.float32)
    p["s1"], p["t1"] = _fold_bn(
        b1,
        0.5 + jax.random.uniform(ks[2], (mid_ch,)),
        0.1 * jax.random.normal(ks[3], (mid_ch,)),
        0.1 * jax.random.normal(ks[4], (mid_ch,)),
        0.5 + jax.random.uniform(ks[5], (mid_ch,)),
    )
    # 3x3 conv mid_ch -> mid_ch, weight stored im2col-major (ky, kx, cin) x cout
    p["w2"] = 0.1 * jax.random.normal(ks[6], (9 * mid_ch, mid_ch), jnp.float32)
    b2 = 0.1 * jax.random.normal(ks[7], (mid_ch,), jnp.float32)
    p["s2"], p["t2"] = _fold_bn(
        b2,
        0.5 + jax.random.uniform(ks[8], (mid_ch,)),
        0.1 * jax.random.normal(ks[9], (mid_ch,)),
        0.1 * jax.random.normal(ks[10], (mid_ch,)),
        0.5 + jax.random.uniform(ks[11], (mid_ch,)),
    )
    # 1x1 conv mid_ch -> out_ch
    p["w3"] = 0.1 * jax.random.normal(ks[12], (mid_ch, out_ch), jnp.float32)
    b3 = 0.1 * jax.random.normal(ks[13], (out_ch,), jnp.float32)
    p["s3"], p["t3"] = _fold_bn(
        b3,
        0.5 + jax.random.uniform(ks[14], (out_ch,)),
        0.1 * jax.random.normal(ks[15], (out_ch,)),
        jnp.zeros((out_ch,), jnp.float32),
        jnp.ones((out_ch,), jnp.float32),
    )
    return p


# ---------------------------------------------------------------------------
# Pure-JAX reference (for verification)
# ---------------------------------------------------------------------------
def ref_forward(x_nchw, p, circular_padding):
    leaky = lambda v: jnp.where(v >= 0.0, v, NEG_SLOPE * v)
    x = jnp.transpose(x_nchw, (0, 2, 3, 1))
    h1 = leaky(jnp.einsum("nhwc,cd->nhwd", x, p["w1"]) * p["s1"][0] + p["t1"][0])
    if circular_padding:
        hp = jnp.pad(h1, ((0, 0), (0, 0), (1, 1), (0, 0)), mode="wrap")
        hp = jnp.pad(hp, ((0, 0), (1, 1), (0, 0), (0, 0)))
    else:
        hp = jnp.pad(h1, ((0, 0), (1, 1), (1, 1), (0, 0)))
    mid = p["w1"].shape[1]
    w2_hwio = p["w2"].reshape(3, 3, mid, mid)
    h2 = jax.lax.conv_general_dilated(
        hp, w2_hwio, window_strides=(1, 1), padding="VALID",
        dimension_numbers=("NHWC", "HWIO", "NHWC"))
    h2 = leaky(h2 * p["s2"][0] + p["t2"][0])
    y = jnp.einsum("nhwc,cd->nhwd", h2, p["w3"]) * p["s3"][0] + p["t3"][0]
    out = jnp.maximum(y + x, 0.0)
    return jnp.transpose(out, (0, 3, 1, 2))


if __name__ == "__main__":
    N, in_ch, mid_ch, out_ch, H, W = 2, 4, 8, 4, 16, 16   # in_ch == out_ch config
    key = jax.random.PRNGKey(0)
    kx, kp = jax.random.split(key)
    x = jax.random.normal(kx, (N, in_ch, H, W), jnp.float32)
    params = make_params(kp, in_ch, mid_ch, out_ch)

    ok = True
    for circ in (False, True):
        out = jax.block_until_ready(res_block_forward(x, params, circular_padding=circ))
        ref = jax.block_until_ready(ref_forward(x, params, circ))
        ok = ok and bool(jnp.allclose(out, ref, atol=1e-4, rtol=1e-4))

    if ok:
        print("KERNEL_OK")
    else:
        print("MISMATCH")
</pallas_src>

<mosaic_0001>
module attributes {stable_mosaic.version = 11 : i64} {
  func.func @_res_block_kernel(%arg0: i32, %arg1: memref<1x16x16x4xf32, #tpu.memory_space<vmem>>, %arg2: memref<4x8xf32, #tpu.memory_space<vmem>>, %arg3: memref<1x8xf32, #tpu.memory_space<vmem>>, %arg4: memref<1x8xf32, #tpu.memory_space<vmem>>, %arg5: memref<72x8xf32, #tpu.memory_space<vmem>>, %arg6: memref<1x8xf32, #tpu.memory_space<vmem>>, %arg7: memref<1x8xf32, #tpu.memory_space<vmem>>, %arg8: memref<8x4xf32, #tpu.memory_space<vmem>>, %arg9: memref<1x4xf32, #tpu.memory_space<vmem>>, %arg10: memref<1x4xf32, #tpu.memory_space<vmem>>, %arg11: memref<1x16x16x4xf32, #tpu.memory_space<vmem>>, %arg12: memref<18x18x8xf32, #tpu.memory_space<vmem>>) attributes {dimension_semantics = [#tpu.dimension_semantics<parallel>], iteration_bounds = array<i64: 2>, scalar_prefetch = 0 : i64, scratch_operands = 1 : i64, tpu.core_type = #tpu.core_type<tc>, window_params = [{transform_indices = @transform_0, window_bounds = array<i64: 1, 16, 16, 4>}, {pipeline_mode = #tpu.pipeline_mode<synchronous>, transform_indices = @transform_1, window_bounds = array<i64: 4, 8>}, {pipeline_mode = #tpu.pipeline_mode<synchronous>, transform_indices = @transform_2, window_bounds = array<i64: 1, 8>}, {pipeline_mode = #tpu.pipeline_mode<synchronous>, transform_indices = @transform_3, window_bounds = array<i64: 1, 8>}, {pipeline_mode = #tpu.pipeline_mode<synchronous>, transform_indices = @transform_4, window_bounds = array<i64: 72, 8>}, {pipeline_mode = #tpu.pipeline_mode<synchronous>, transform_indices = @transform_5, window_bounds = array<i64: 1, 8>}, {pipeline_mode = #tpu.pipeline_mode<synchronous>, transform_indices = @transform_6, window_bounds = array<i64: 1, 8>}, {pipeline_mode = #tpu.pipeline_mode<synchronous>, transform_indices = @transform_7, window_bounds = array<i64: 8, 4>}, {pipeline_mode = #tpu.pipeline_mode<synchronous>, transform_indices = @transform_8, window_bounds = array<i64: 1, 4>}, {pipeline_mode = #tpu.pipeline_mode<synchronous>, transform_indices = @transform_9, window_bounds = array<i64: 1, 4>}, {transform_indices = @transform_10, window_bounds = array<i64: 1, 16, 16, 4>}]} {
    %c0 = arith.constant 0 : index
    %c0_0 = arith.constant 0 : index
    %c0_1 = arith.constant 0 : index
    %c0_2 = arith.constant 0 : index
    %0 = vector.load %arg1[%c0, %c0_0, %c0_1, %c0_2] : memref<1x16x16x4xf32, #tpu.memory_space<vmem>>, vector<1x16x16x4xf32>
    %1 = vector.shape_cast %0 : vector<1x16x16x4xf32> to vector<16x16x4xf32>
    %2 = vector.shape_cast %1 : vector<16x16x4xf32> to vector<256x4xf32>
    %c0_3 = arith.constant 0 : index
    %c0_4 = arith.constant 0 : index
    %3 = vector.load %arg2[%c0_3, %c0_4] : memref<4x8xf32, #tpu.memory_space<vmem>>, vector<4x8xf32>
    %cst = arith.constant dense<0.000000e+00> : vector<256x8xf32>
    %4 = tpu.matmul %2, %3, %cst {dimension_numbers = #tpu.dot_dimension_numbers<[1], [0], [0], [1], [0, 0, 1, 1], [], []>} : vector<256x4xf32>, vector<4x8xf32>, vector<256x8xf32> -> vector<256x8xf32>
    %c0_5 = arith.constant 0 : index
    %c0_6 = arith.constant 0 : index
    %5 = vector.load %arg3[%c0_5, %c0_6] : memref<1x8xf32, #tpu.memory_space<vmem>>, vector<1x8xf32>
    %6 = vector.broadcast %5 : vector<1x8xf32> to vector<256x8xf32>
    %7 = arith.mulf %4, %6 : vector<256x8xf32>
    %c0_7 = arith.constant 0 : index
    %c0_8 = arith.constant 0 : index
    %8 = vector.load %arg4[%c0_7, %c0_8] : memref<1x8xf32, #tpu.memory_space<vmem>>, vector<1x8xf32>
    %9 = vector.broadcast %8 : vector<1x8xf32> to vector<256x8xf32>
    %10 = arith.addf %7, %9 : vector<256x8xf32>
    %cst_9 = arith.constant 0.000000e+00 : f32
    %11 = vector.broadcast %cst_9 : f32 to vector<256x8xf32>
    %12 = arith.cmpf oge, %10, %11 : vector<256x8xf32>
    %cst_10 = arith.constant 0.00999999977 : f32
    %13 = vector.broadcast %cst_10 : f32 to vector<256x8xf32>
    %14 = arith.mulf %13, %10 : vector<256x8xf32>
    %15 = arith.select %12, %10, %14 : vector<256x8xi1>, vector<256x8xf32>
    %16 = vector.shape_cast %15 : vector<256x8xf32> to vector<16x16x8xf32>
    %cst_11 = arith.constant 0.000000e+00 : f32
    %17 = vector.broadcast %cst_11 : f32 to vector<16x1x8xf32>
    %cst_12 = arith.constant 0.000000e+00 : f32
    %18 = vector.broadcast %cst_12 : f32 to vector<16x1x8xf32>
    %19 = tpu.concatenate %17, %16, %18 in 1 : vector<16x1x8xf32>, vector<16x16x8xf32>, vector<16x1x8xf32> -> vector<16x18x8xf32>
    %cst_13 = arith.constant 0.000000e+00 : f32
    %20 = vector.broadcast %cst_13 : f32 to vector<1x18x8xf32>
    %21 = tpu.concatenate %20, %19, %20 in 0 : vector<1x18x8xf32>, vector<16x18x8xf32>, vector<1x18x8xf32> -> vector<18x18x8xf32>
    %c0_14 = arith.constant 0 : index
    %c0_15 = arith.constant 0 : index
    %c0_16 = arith.constant 0 : index
    %22 = vector.load %arg12[%c0_14, %c0_15, %c0_16] : memref<18x18x8xf32, #tpu.memory_space<vmem>>, vector<18x18x8xf32>
    tpu.vector_store %arg12[%c0_14, %c0_15, %c0_16], %21 {strides = array<i32>} : memref<18x18x8xf32, #tpu.memory_space<vmem>>, vector<18x18x8xf32>,
    %c0_17 = arith.constant 0 : index
    %c0_18 = arith.constant 0 : index
    %c0_19 = arith.constant 0 : index
    %23 = vector.load %arg12[%c0_17, %c0_18, %c0_19] : memref<18x18x8xf32, #tpu.memory_space<vmem>>, vector<16x16x8xf32>
    %24 = vector.shape_cast %23 : vector<16x16x8xf32> to vector<256x8xf32>
    %c0_20 = arith.constant 0 : index
    %c1 = arith.constant 1 : index
    %c0_21 = arith.constant 0 : index
    %25 = vector.load %arg12[%c0_20, %c1, %c0_21] : memref<18x18x8xf32, #tpu.memory_space<vmem>>, vector<16x16x8xf32>
    %26 = vector.shape_cast %25 : vector<16x16x8xf32> to vector<256x8xf32>
    %c0_22 = arith.constant 0 : index
    %c2 = arith.constant 2 : index
    %c0_23 = arith.constant 0 : index
    %27 = vector.load %arg12[%c0_22, %c2, %c0_23] : memref<18x18x8xf32, #tpu.memory_space<vmem>>, vector<16x16x8xf32>
    %28 = vector.shape_cast %27 : vector<16x16x8xf32> to vector<256x8xf32>
    %c1_24 = arith.constant 1 : index
    %c0_25 = arith.constant 0 : index
    %c0_26 = arith.constant 0 : index
    %29 = vector.load %arg12[%c1_24, %c0_25, %c0_26] : memref<18x18x8xf32, #tpu.memory_space<vmem>>, vector<16x16x8xf32>
    %30 = vector.shape_cast %29 : vector<16x16x8xf32> to vector<256x8xf32>
    %c1_27 = arith.constant 1 : index
    %c1_28 = arith.constant 1 : index
    %c0_29 = arith.constant 0 : index
    %31 = vector.load %arg12[%c1_27, %c1_28, %c0_29] : memref<18x18x8xf32, #tpu.memory_space<vmem>>, vector<16x16x8xf32>
    %32 = vector.shape_cast %31 : vector<16x16x8xf32> to vector<256x8xf32>
    %c1_30 = arith.constant 1 : index
    %c2_31 = arith.constant 2 : index
    %c0_32 = arith.constant 0 : index
    %33 = vector.load %arg12[%c1_30, %c2_31, %c0_32] : memref<18x18x8xf32, #tpu.memory_space<vmem>>, vector<16x16x8xf32>
    %34 = vector.shape_cast %33 : vector<16x16x8xf32> to vector<256x8xf32>
    %c2_33 = arith.constant 2 : index
    %c0_34 = arith.constant 0 : index
    %c0_35 = arith.constant 0 : index
    %35 = vector.load %arg12[%c2_33, %c0_34, %c0_35] : memref<18x18x8xf32, #tpu.memory_space<vmem>>, vector<16x16x8xf32>
    %36 = vector.shape_cast %35 : vector<16x16x8xf32> to vector<256x8xf32>
    %c2_36 = arith.constant 2 : index
    %c1_37 = arith.constant 1 : index
    %c0_38 = arith.constant 0 : index
    %37 = vector.load %arg12[%c2_36, %c1_37, %c0_38] : memref<18x18x8xf32, #tpu.memory_space<vmem>>, vector<16x16x8xf32>
    %38 = vector.shape_cast %37 : vector<16x16x8xf32> to vector<256x8xf32>
    %c2_39 = arith.constant 2 : index
    %c2_40 = arith.constant 2 : index
    %c0_41 = arith.constant 0 : index
    %39 = vector.load %arg12[%c2_39, %c2_40, %c0_41] : memref<18x18x8xf32, #tpu.memory_space<vmem>>, vector<16x16x8xf32>
    %40 = vector.shape_cast %39 : vector<16x16x8xf32> to vector<256x8xf32>
    %41 = tpu.concatenate %24, %26, %28, %30, %32, %34, %36, %38, %40 in 1 : vector<256x8xf32>, vector<256x8xf32>, vector<256x8xf32>, vector<256x8xf32>, vector<256x8xf32>, vector<256x8xf32>, vector<256x8xf32>, vector<256x8xf32>, vector<256x8xf32> -> vector<256x72xf32>
    %c0_42 = arith.constant 0 : index
    %c0_43 = arith.constant 0 : index
    %42 = vector.load %arg5[%c0_42, %c0_43] : memref<72x8xf32, #tpu.memory_space<vmem>>, vector<72x8xf32>
    %cst_44 = arith.constant dense<0.000000e+00> : vector<256x8xf32>
    %43 = tpu.matmul %41, %42, %cst_44 {dimension_numbers = #tpu.dot_dimension_numbers<[1], [0], [0], [1], [0, 0, 1, 1], [], []>} : vector<256x72xf32>, vector<72x8xf32>, vector<256x8xf32> -> vector<256x8xf32>
    %c0_45 = arith.constant 0 : index
    %c0_46 = arith.constant 0 : index
    %44 = vector.load %arg6[%c0_45, %c0_46] : memref<1x8xf32, #tpu.memory_space<vmem>>, vector<1x8xf32>
    %45 = vector.broadcast %44 : vector<1x8xf32> to vector<256x8xf32>
    %46 = arith.mulf %43, %45 : vector<256x8xf32>
    %c0_47 = arith.constant 0 : index
    %c0_48 = arith.constant 0 : index
    %47 = vector.load %arg7[%c0_47, %c0_48] : memref<1x8xf32, #tpu.memory_space<vmem>>, vector<1x8xf32>
    %48 = vector.broadcast %47 : vector<1x8xf32> to vector<256x8xf32>
    %49 = arith.addf %46, %48 : vector<256x8xf32>
    %cst_49 = arith.constant 0.000000e+00 : f32
    %50 = vector.broadcast %cst_49 : f32 to vector<256x8xf32>
    %51 = arith.cmpf oge, %49, %50 : vector<256x8xf32>
    %cst_50 = arith.constant 0.00999999977 : f32
    %52 = vector.broadcast %cst_50 : f32 to vector<256x8xf32>
    %53 = arith.mulf %52, %49 : vector<256x8xf32>
    %54 = arith.select %51, %49, %53 : vector<256x8xi1>, vector<256x8xf32>
    %c0_51 = arith.constant 0 : index
    %c0_52 = arith.constant 0 : index
    %55 = vector.load %arg8[%c0_51, %c0_52] : memref<8x4xf32, #tpu.memory_space<vmem>>, vector<8x4xf32>
    %cst_53 = arith.constant dense<0.000000e+00> : vector<256x4xf32>
    %56 = tpu.matmul %54, %55, %cst_53 {dimension_numbers = #tpu.dot_dimension_numbers<[1], [0], [0], [1], [0, 0, 1, 1], [], []>} : vector<256x8xf32>, vector<8x4xf32>, vector<256x4xf32> -> vector<256x4xf32>
    %c0_54 = arith.constant 0 : index
    %c0_55 = arith.constant 0 : index
    %57 = vector.load %arg9[%c0_54, %c0_55] : memref<1x4xf32, #tpu.memory_space<vmem>>, vector<1x4xf32>
    %58 = vector.broadcast %57 : vector<1x4xf32> to vector<256x4xf32>
    %59 = arith.mulf %56, %58 : vector<256x4xf32>
    %c0_56 = arith.constant 0 : index
    %c0_57 = arith.constant 0 : index
    %60 = vector.load %arg10[%c0_56, %c0_57] : memref<1x4xf32, #tpu.memory_space<vmem>>, vector<1x4xf32>
    %61 = vector.broadcast %60 : vector<1x4xf32> to vector<256x4xf32>
    %62 = arith.addf %59, %61 : vector<256x4xf32>
    %63 = arith.addf %62, %2 : vector<256x4xf32>
    %cst_58 = arith.constant 0.000000e+00 : f32
    %64 = vector.broadcast %cst_58 : f32 to vector<256x4xf32>
    %65 = arith.maximumf %63, %64 : vector<256x4xf32>
    %66 = vector.shape_cast %65 : vector<256x4xf32> to vector<1x16x16x4xf32>
    %c0_59 = arith.constant 0 : index
    %c0_60 = arith.constant 0 : index
    %c0_61 = arith.constant 0 : index
    %c0_62 = arith.constant 0 : index
    %67 = vector.load %arg11[%c0_59, %c0_60, %c0_61, %c0_62] : memref<1x16x16x4xf32, #tpu.memory_space<vmem>>, vector<1x16x16x4xf32>
    tpu.vector_store %arg11[%c0_59, %c0_60, %c0_61, %c0_62], %66 {strides = array<i32>} : memref<1x16x16x4xf32, #tpu.memory_space<vmem>>, vector<1x16x16x4xf32>,
    return
  }
  func.func @transform_0(%arg0: i32) -> (i32, i32, i32, i32) {
    %c0_i32 = arith.constant 0 : i32
    %c0_i32_0 = arith.constant 0 : i32
    %c0_i32_1 = arith.constant 0 : i32
    %c0_i32_2 = arith.constant 0 : i32
    return %arg0, %c0_i32, %c0_i32_0, %c0_i32_1 : i32, i32, i32, i32
  }
  func.func @transform_1(%arg0: i32) -> (i32, i32) {
    %c0_i32 = arith.constant 0 : i32
    %c0_i32_0 = arith.constant 0 : i32
    %c0_i32_1 = arith.constant 0 : i32
    return %c0_i32, %c0_i32_0 : i32, i32
  }
  func.func @transform_2(%arg0: i32) -> (i32, i32) {
    %c0_i32 = arith.constant 0 : i32
    %c0_i32_0 = arith.constant 0 : i32
    %c0_i32_1 = arith.constant 0 : i32
    return %c0_i32, %c0_i32_0 : i32, i32
  }
  func.func @transform_3(%arg0: i32) -> (i32, i32) {
    %c0_i32 = arith.constant 0 : i32
    %c0_i32_0 = arith.constant 0 : i32
    %c0_i32_1 = arith.constant 0 : i32
    return %c0_i32, %c0_i32_0 : i32, i32
  }
  func.func @transform_4(%arg0: i32) -> (i32, i32) {
    %c0_i32 = arith.constant 0 : i32
    %c0_i32_0 = arith.constant 0 : i32
    %c0_i32_1 = arith.constant 0 : i32
    return %c0_i32, %c0_i32_0 : i32, i32
  }
  func.func @transform_5(%arg0: i32) -> (i32, i32) {
    %c0_i32 = arith.constant 0 : i32
    %c0_i32_0 = arith.constant 0 : i32
    %c0_i32_1 = arith.constant 0 : i32
    return %c0_i32, %c0_i32_0 : i32, i32
  }
  func.func @transform_6(%arg0: i32) -> (i32, i32) {
    %c0_i32 = arith.constant 0 : i32
    %c0_i32_0 = arith.constant 0 : i32
    %c0_i32_1 = arith.constant 0 : i32
    return %c0_i32, %c0_i32_0 : i32, i32
  }
  func.func @transform_7(%arg0: i32) -> (i32, i32) {
    %c0_i32 = arith.constant 0 : i32
    %c0_i32_0 = arith.constant 0 : i32
    %c0_i32_1 = arith.constant 0 : i32
    return %c0_i32, %c0_i32_0 : i32, i32
  }
  func.func @transform_8(%arg0: i32) -> (i32, i32) {
    %c0_i32 = arith.constant 0 : i32
    %c0_i32_0 = arith.constant 0 : i32
    %c0_i32_1 = arith.constant 0 : i32
    return %c0_i32, %c0_i32_0 : i32, i32
  }
  func.func @transform_9(%arg0: i32) -> (i32, i32) {
    %c0_i32 = arith.constant 0 : i32
    %c0_i32_0 = arith.constant 0 : i32
    %c0_i32_1 = arith.constant 0 : i32
    return %c0_i32, %c0_i32_0 : i32, i32
  }
  func.func @transform_10(%arg0: i32) -> (i32, i32, i32, i32) {
    %c0_i32 = arith.constant 0 : i32
    %c0_i32_0 = arith.constant 0 : i32
    %c0_i32_1 = arith.constant 0 : i32
    %c0_i32_2 = arith.constant 0 : i32
    return %arg0, %c0_i32, %c0_i32_0, %c0_i32_1 : i32, i32, i32, i32
  }
}

</mosaic_0001>

<bundles_post_ra>
// kernel: _res_block_forward_impl.1
= control target key start
LH: loop header
LB: loop body
LE: loop exit
PB: predicated region body
PF: predicated region fallthrough
CT: control target
= control target key end

     0   :  { %s4275_s13 = smov 0   ;;  %s5928_s0 = inlined_call_operand.vmem [shape: f32[2,16,16,4], index: 0, kind: input, shape index: {}]   ;;  %s5929_s1 = inlined_call_operand.vmem [shape: f32[4,8], index: 1, kind: input, shape index: {}]   ;;  %s5930_s2 = inlined_call_operand.vmem [shape: f32[1,8], index: 2, kind: input, shape index: {}]   ;;  %s5931_s3 = inlined_call_operand.vmem [shape: f32[1,8], index: 3, kind: input, shape index: {}]   ;;  %s5932_s4 = inlined_call_operand.vmem [shape: f32[72,8], index: 4, kind: input, shape index: {}]   ;;  %s5933_s5 = inlined_call_operand.vmem [shape: f32[1,8], index: 5, kind: input, shape index: {}]   ;;  %s5934_s6 = inlined_call_operand.vmem [shape: f32[1,8], index: 6, kind: input, shape index: {}]   ;;  %s5935_s7 = inlined_call_operand.vmem [shape: f32[8,4], index: 7, kind: input, shape index: {}]   ;;  %s5936_s8 = inlined_call_operand.vmem [shape: f32[1,4], index: 8, kind: input, shape index: {}]   ;;  %s5937_s9 = inlined_call_operand.vmem [shape: f32[1,4], index: 9, kind: input, shape index: {}]   ;;  %s5938_s10 = inlined_call_operand.vmem [shape: f32[2,16,16,4], index: 10, kind: output, shape index: {}]  }
   0x1 LB: > { %s3743_s14 = sadd.s32 4294967295, %s4209_s13   ;;  %p3747_p0 = scmp.ge.s32.totalorder %s4209_s13, 1  ;;  %s4209_s13 = sphi %s4275_s13, %s20_s13  }
   0x2   : > { %p312_p1 = scmp.lt.s32.totalorder %s4209_s13, 3 }
   0x4   : > { %p313_p2 = pnand %p3747_p0, %p312_p1 }
   0x5   : > { %v392_v0 = vld [vmem:[%s5929_s1] sm:$0xf] (!%p313_p2)  ;;  %vm490_vm0 = vcmask (!%p313_p2), 1043456   ;;  %p350_p3 = scmp.lt.s32.totalorder (!%p313_p2), %s3743_s14, 1  ;;  %vm393_vm1 = vcmask (!%p313_p2), 31744   ;;  %vm1054_vm2 = vcmask (!%p313_p2), 64512  }
   0x6   : > { %316 = sbr.rel (%p313_p2) target bundleno = 1311 (0x51f), region = 60  ;;  %3966 = vmatprep.subr.msk.mxu0 (!%p313_p2), %vm490_vm0, %v392_v0  ;;  %4148 = vmatprep.subr.msk.mxu1 (!%p313_p2), %vm490_vm0, %v392_v0  ;;  %v4211_v17 = vmov (!%p313_p2), 0.0   ;;  %vm1057_vm3 = vcmask (!%p313_p2), 58368   ;;  %s4212_s21 = smov (!%p313_p2), 16   ;;  %v4357_v30 = vld [vmem:[%s5930_s2] ss:$0 sm:$0xff] (!%p313_p2) }
   0x7   : > { %3967 = vmatpush3.msk.msra.mxu0 (!%p313_p2), %vm490_vm0, %v392_v0  ;;  %4149 = vmatpush3.msk.msra.mxu1 (!%p313_p2), %vm490_vm0, %v392_v0  ;;  %1055 = vst.msk [vmem:[#allocation2] sm:$0xff] (!%p313_p2), %vm1054_vm2, %v4211_v17  ;;  %1056 = vst.msk [vmem:[#allocation2 + $0x8] sm:$0xff] (!%p313_p2), %vm1054_vm2, %v4211_v17  ;;  %s4213_s22 = smov (!%p313_p2), 8   ;;  %v4362_v32 = vld [vmem:[%s5931_s3] ss:$0 sm:$0xff] (!%p313_p2)  ;;  %vm925_vm8 = vcmask (!%p313_p2), 1040384  }
   0x8   : > { %1107 = vst.msk [vmem:[#allocation2 + $0x198] sm:$0xff] (!%p313_p2), %vm1054_vm2, %v4211_v17  ;;  %1108 = vst.msk [vmem:[#allocation2 + $0x1a0] sm:$0xff] (!%p313_p2), %vm1054_vm2, %v4211_v17  ;;  %s4214_s27 = smov (!%p313_p2), 24   ;;  %s4215_s28 = smov (!%p313_p2), 32  }
   0x9   : > { %1058 = vst.msk [vmem:[#allocation2 + $0x10] sm:$0x3] (!%p313_p2), %vm1057_vm3, %v4211_v17  ;;  %1109 = vst.msk [vmem:[#allocation2 + $0x1a8] sm:$0x3] (!%p313_p2), %vm1057_vm3, %v4211_v17  ;;  %s4216_s29 = smov (!%p313_p2), 40   ;;  %s4217_s30 = smov (!%p313_p2), 48  }
   0xa   : > { %s4218_s11 = smov (!%p313_p2), 56   ;;  %s4219_s19 = smov (!%p313_p2), 64  }
   0xd   : > { %s5940_s14 = smov (!%p350_p3, %s3743_s14), 1 }
   0xe   : > { %s3857_s17 = sshll.u32 %s5940_s14, 8  ;;  %v1174_v18 = vld [vmem:[#allocation2 + $0x2] sm:$0xff] }
   0xf   : > { %s4294_s20 = scalar_lea.vmem %s5928_s0, %s3857_s17  ;;  %v1142_v19 = vld [vmem:[#allocation2 + $0x1] sm:$0xff]  ;;  %1560 = vrot.lane.b32.xlu1 %v1174_v18, %s4212_s21 }
  0x10   : > { %v360_v1 = vld [vmem:[%s4294_s20] sm:$0xff]  ;;  %v361_v2 = vld [vmem:[%s4294_s20 + $0x8] sm:$0xff]  ;;  %v362_v5 = vld [vmem:[%s4294_s20 + $0x10] sm:$0xff]  ;;  %1432 = vrot.lane.b32.xlu0 %v1142_v19, %s4213_s22 }
  0x11   : > { %v376_v3 = vld [vmem:[%s4294_s20 + $0x80] sm:$0xff]  ;;  %3968 = vmatprep.mubr.msk.f32.mxu0 %vm393_vm1, %v360_v1  ;;  %v377_v4 = vld [vmem:[%s4294_s20 + $0x88] sm:$0xff]  ;;  %v363_v6 = vld [vmem:[%s4294_s20 + $0x18] sm:$0xff] }
  0x12   : > { %3992 = vmatprep.mubr.msk.f32.mxu1 %vm393_vm1, %v376_v3  ;;  %3969 = vmatmul.mubr.msk.f32.vlgmr.msra.gmra.mrb[0].mxu0 %vm393_vm1, %v361_v2  ;;  %v364_v7 = vld [vmem:[%s4294_s20 + $0x20] sm:$0xff]  ;;  %v365_v8 = vld [vmem:[%s4294_s20 + $0x28] sm:$0xff]  ;;  %v366_v9 = vld [vmem:[%s4294_s20 + $0x30] sm:$0xff] }
  0x13   : > { %3993 = vmatmul.mubr.msk.f32.vlgmr.msra.gmra.mrb[0].mxu1 %vm393_vm1, %v377_v4  ;;  %3971 = vmatprep.mubr.msk.f32.mxu0 %vm393_vm1, %v362_v5  ;;  %v367_v10 = vld [vmem:[%s4294_s20 + $0x38] sm:$0xff]  ;;  %v368_v11 = vld [vmem:[%s4294_s20 + $0x40] sm:$0xff]  ;;  %v369_v12 = vld [vmem:[%s4294_s20 + $0x48] sm:$0xff] }
  0x14   : > { %v370_v13 = vld [vmem:[%s4294_s20 + $0x50] sm:$0xff]  ;;  %v371_v14 = vld [vmem:[%s4294_s20 + $0x58] sm:$0xff]  ;;  %v372_v15 = vld [vmem:[%s4294_s20 + $0x60] sm:$0xff] }
  0x15   : > { %v373_v16 = vld [vmem:[%s4294_s20 + $0x68] sm:$0xff]  ;;  %v374_v20 = vld [vmem:[%s4294_s20 + $0x70] sm:$0xff]  ;;  %v375_v21 = vld [vmem:[%s4294_s20 + $0x78] sm:$0xff] }
  0x16   : > { %3972 = vmatmul.mubr.msk.f32.gmra.mrb[2].mxu0 %vm393_vm1, %v363_v6  ;;  %v1175_v22 = vld [vmem:[#allocation2 + $0xa] sm:$0xff]  ;;  %v379_v25 = vld [vmem:[%s4294_s20 + $0x98] sm:$0xff]  ;;  %v380_v26 = vld [vmem:[%s4294_s20 + $0xa0] sm:$0xff] }
  0x17   : > { %3974 = vmatprep.mubr.msk.f32.mxu0 %vm393_vm1, %v364_v7  ;;  %v1143_v23 = vld [vmem:[#allocation2 + $0x9] sm:$0xff]  ;;  %1562 = vrot.lane.b32.xlu1 %v1175_v22, %s4212_s21  ;;  %v383_v29 = vld [vmem:[%s4294_s20 + $0xb8] sm:$0xff] }
  0x18   : > { %1434 = vrot.lane.b32.xlu0 %v1143_v23, %s4213_s22  ;;  %v378_v24 = vld [vmem:[%s4294_s20 + $0x90] sm:$0xff]  ;;  %v381_v27 = vld [vmem:[%s4294_s20 + $0xa8] sm:$0xff] }
  0x19   : > { %3995 = vmatprep.mubr.msk.f32.mxu1 %vm393_vm1, %v378_v24  ;;  %v382_v28 = vld [vmem:[%s4294_s20 + $0xb0] sm:$0xff] }
  0x1a   : > { %3975 = vmatmul.mubr.msk.f32.gmra.mrb[4].mxu0 %vm393_vm1, %v365_v8  ;;  %3996 = vmatmul.mubr.msk.f32.gmra.mrb[2].mxu1 %vm393_vm1, %v379_v25 }
  0x1b   : > { %3977 = vmatprep.mubr.msk.f32.mxu0 %vm393_vm1, %v366_v9  ;;  %3998 = vmatprep.mubr.msk.f32.mxu1 %vm393_vm1, %v380_v26 }
  0x1e   : > { %3978 = vmatmul.mubr.msk.f32.gmra.mrb[6].mxu0 %vm393_vm1, %v367_v10  ;;  %3999 = vmatmul.mubr.msk.f32.gmra.mrb[4].mxu1 %vm393_vm1, %v381_v27 }
  0x1f   : > { %3980 = vmatprep.mubr.msk.f32.mxu0 %vm393_vm1, %v368_v11  ;;  %4001 = vmatprep.mubr.msk.f32.mxu1 %vm393_vm1, %v382_v28 }
  0x22   : > { %3981 = vmatmul.mubr.msk.f32.gmra.mrb[8].mxu0 %vm393_vm1, %v369_v12  ;;  %4002 = vmatmul.mubr.msk.f32.gmra.mrb[6].mxu1 %vm393_vm1, %v383_v29 }
  0x23   : > { %3983 = vmatprep.mubr.msk.f32.mxu0 %vm393_vm1, %v370_v13 }
  0x26   : > { %3984 = vmatmul.mubr.msk.f32.gmra.mrb[10].mxu0 %vm393_vm1, %v371_v14 }
  0x27   : > { %3986 = vmatprep.mubr.msk.f32.mxu0 %vm393_vm1, %v372_v15 }
  0x2a   : > { %3987 = vmatmul.mubr.msk.f32.gmra.mrb[12].mxu0 %vm393_vm1, %v373_v16 }
  0x2b   : > { %3989 = vmatprep.mubr.msk.f32.mxu0 %vm393_vm1, %v374_v20 }
  0x2e   : > { %3990 = vmatmul.mubr.msk.f32.gmra.mrb[14].mxu0 %vm393_vm1, %v375_v21 }
  0xe5   : > { %v3970_v31 = vpop.f32.mrb[0].mxu0 }
  0xe6   : > { %v3994_v33 = vpop.f32.mrb[0].mxu1  ;;  %v727_v34 = vmul.f32 %v3970_v31, %v4357_v30  ;;  %v560_v35 = vpop.f32.mrb[1].mxu0 }
  0xe7   : > { %v743_v36 = vmul.f32 %v3994_v33, %v4357_v30  ;;  %v640_v37 = vpop.f32.mrb[1].mxu1  ;;  %v726_v38 = vmul.f32 %v4357_v30, %v560_v35 }
  0xe8   : > { %v742_v39 = vmul.f32 %v4357_v30, %v640_v37  ;;  %v766_v40 = vadd.f32 %v4362_v32, %v727_v34 }
  0xe9   : > { %v782_v41 = vadd.f32 %v4362_v32, %v743_v36  ;;  %v765_v42 = vadd.f32 %v4362_v32, %v726_v38  ;;  %v3973_v44 = vpop.f32.mrb[2].mxu0 }
  0xea   : > { %v781_v43 = vadd.f32 %v4362_v32, %v742_v39  ;;  %vm798_vm4 = vcmp.ge.f32.partialorder %v766_v40, 0.0  ;;  %v830_v45 = vmul.f32 0.01, %v766_v40  ;;  %v729_v51 = vmul.f32 %v3973_v44, %v4357_v30  ;;  %v570_v52 = vpop.f32.mrb[3].mxu0 }
  0xeb   : > { %vm814_vm5 = vcmp.ge.f32.partialorder %v782_v41, 0.0  ;;  %v846_v46 = vmul.f32 0.01, %v782_v41  ;;  %vm797_vm6 = vcmp.ge.f32.partialorder %v765_v42, 0.0  ;;  %v829_v47 = vmul.f32 0.01, %v765_v42 }
  0xec   : > { %vm813_vm7 = vcmp.ge.f32.partialorder %v781_v43, 0.0  ;;  %v845_v48 = vmul.f32 0.01, %v781_v43  ;;  %v862_v49 = vsel %vm798_vm4, %v766_v40, %v830_v45  ;;  %v768_v60 = vadd.f32 %v4362_v32, %v729_v51 }
  0xed   : > { %v878_v50 = vsel %vm814_vm5, %v782_v41, %v846_v46  ;;  %v927_v53 = vrot.slane %v862_v49, 7  ;;  %v861_v54 = vsel %vm797_vm6, %v765_v42, %v829_v47  ;;  %v3976_v57 = vpop.f32.mrb[4].mxu0  ;;  %v728_v61 = vmul.f32 %v4357_v30, %v570_v52  ;;  %v384_v52 = vld [vmem:[%s4294_s20 + $0xc0] sm:$0xff] }
  0xee   : > { %v951_v55 = vrot.slane %v878_v50, 7  ;;  %v877_v56 = vsel %vm813_vm7, %v781_v43, %v845_v48  ;;  %v926_v58 = vrot.slane %v861_v54, 7  ;;  %v580_v62 = vpop.f32.mrb[5].mxu0  ;;  %v731_v1 = vmul.f32 %v3976_v57, %v4357_v30  ;;  %4004 = vmatprep.mubr.msk.f32.mxu1 %vm393_vm1, %v384_v52 }
  0xef   : > { %v950_v59 = vrot.slane %v877_v56, 7  ;;  %v1038_v63 = vsel %vm925_vm8, %v927_v53, 0.0  ;;  %v730_v2 = vmul.f32 %v4357_v30, %v580_v62  ;;  %vm800_vm9 = vcmp.ge.f32.partialorder %v768_v60, 0.0 }
  0xf0   : > { %v1046_v0 = vsel %vm925_vm8, %v951_v55, 0.0  ;;  %1061 = vst.msk [vmem:[#allocation2 + $0x28] sm:$0x3] %vm1057_vm3, %v1038_v63  ;;  %v928_v3 = vsel %vm925_vm8, %v926_v58, %v927_v53  ;;  %v1022_v4 = vsel %vm925_vm8, 0.0, %v926_v58  ;;  %v832_v7 = vmul.f32 0.01, %v768_v60 }
  0xf1   : > { %1085 = vst.msk [vmem:[#allocation2 + $0xe8] sm:$0x3] %vm1057_vm3, %v1046_v0  ;;  %v952_v5 = vsel %vm925_vm8, %v950_v59, %v951_v55  ;;  %v1030_v6 = vsel %vm925_vm8, 0.0, %v950_v59  ;;  %v767_v8 = vadd.f32 %v4362_v32, %v728_v61  ;;  %v770_v9 = vadd.f32 %v4362_v32, %v731_v1  ;;  %v3979_v10 = vpop.f32.mrb[6].mxu0 }
  0xf2   : > { %1059 = vst.msk [vmem:[#allocation2 + $0x18] sm:$0xff] %vm1054_vm2, %v1022_v4  ;;  %1060 = vst.msk [vmem:[#allocation2 + $0x20] sm:$0xff] %vm1054_vm2, %v928_v3  ;;  %v769_v11 = vadd.f32 %v4362_v32, %v730_v2  ;;  %v733_v12 = vmul.f32 %v3979_v10, %v4357_v30  ;;  %v590_v13 = vpop.f32.mrb[7].mxu0  ;;  %v864_v14 = vsel %vm800_vm9, %v768_v60, %v832_v7  ;;  %v385_v2 = vld [vmem:[%s4294_s20 + $0xc8] sm:$0xff] }
  0xf3   : > { %1083 = vst.msk [vmem:[#allocation2 + $0xd8] sm:$0xff] %vm1054_vm2, %v1030_v6  ;;  %1084 = vst.msk [vmem:[#allocation2 + $0xe0] sm:$0xff] %vm1054_vm2, %v952_v5  ;;  %vm799_vm10 = vcmp.ge.f32.partialorder %v767_v8, 0.0  ;;  %v831_v15 = vmul.f32 0.01, %v767_v8  ;;  %vm802_vm11 = vcmp.ge.f32.partialorder %v770_v9, 0.0  ;;  %v732_v21 = vmul.f32 %v4357_v30, %v590_v13  ;;  %4005 = vmatmul.mubr.msk.f32.gmra.mrb[8].mxu1 %vm393_vm1, %v385_v2 }
  0xf4   : > { %v930_v16 = vrot.slane %v864_v14, 7  ;;  %v834_v17 = vmul.f32 0.01, %v770_v9  ;;  %vm801_vm12 = vcmp.ge.f32.partialorder %v769_v11, 0.0  ;;  %v833_v18 = vmul.f32 0.01, %v769_v11 }
  0xf5   : > { %v863_v19 = vsel %vm799_vm10, %v767_v8, %v831_v15  ;;  %v772_v20 = vadd.f32 %v4362_v32, %v733_v12  ;;  %v3982_v22 = vpop.f32.mrb[8].mxu0  ;;  %v771_v37 = vadd.f32 %v4362_v32, %v732_v21 }
  0xf6   : > { %v1039_v23 = vsel %vm925_vm8, %v930_v16, 0.0  ;;  %v929_v24 = vrot.slane %v863_v19, 7  ;;  %v866_v25 = vsel %vm802_vm11, %v770_v9, %v834_v17  ;;  %v865_v26 = vsel %vm801_vm12, %v769_v11, %v833_v18  ;;  %v600_v27 = vpop.f32.mrb[9].mxu0 }
  0xf7   : > { %1064 = vst.msk [vmem:[#allocation2 + $0x40] sm:$0x3] %vm1057_vm3, %v1039_v23  ;;  %v933_v28 = vrot.slane %v866_v25, 7  ;;  %v932_v29 = vrot.slane %v865_v26, 7  ;;  %vm804_vm13 = vcmp.ge.f32.partialorder %v772_v20, 0.0  ;;  %v735_v38 = vmul.f32 %v3982_v22, %v4357_v30  ;;  %v386_v22 = vld [vmem:[%s4294_s20 + $0xd0] sm:$0xff] }
  0xf8   : > { %v836_v31 = vmul.f32 0.01, %v772_v20  ;;  %v931_v35 = vsel %vm925_vm8, %v929_v24, %v930_v16  ;;  %v1023_v36 = vsel %vm925_vm8, 0.0, %v929_v24  ;;  %vm803_vm14 = vcmp.ge.f32.partialorder %v771_v37, 0.0  ;;  %v2687_v23 = vld [vmem:[%s5932_s4] sm:$0xff]  ;;  %4007 = vmatprep.mubr.msk.f32.mxu1 %vm393_vm1, %v386_v22  ;;  %v2688_v24 = vld [vmem:[%s5932_s4 + $0x8] sm:$0xff] }
  0xf9   : > { %v4397_v33 = vld [vmem:[#allocation2 + $0x18] sm:$0xff]  ;;  %v4399_v34 = vld [vmem:[#allocation2 + $0x20] sm:$0xff]  ;;  %1062 = vst.msk [vmem:[#allocation2 + $0x30] sm:$0xff] %vm1054_vm2, %v1023_v36  ;;  %1063 = vst.msk [vmem:[#allocation2 + $0x38] sm:$0xff] %vm1054_vm2, %v931_v35  ;;  %v1040_v39 = vsel %vm925_vm8, %v933_v28, 0.0  ;;  %v934_v40 = vsel %vm925_vm8, %v932_v29, %v933_v28  ;;  %v1024_v41 = vsel %vm925_vm8, 0.0, %v932_v29  ;;  %v774_v44 = vadd.f32 %v4362_v32, %v735_v38 }
  0xfa   : > { %1688 = vrot.lane.b32.xlu0 %v4397_v33, %s4214_s27  ;;  %1690 = vrot.lane.b32.xlu1 %v4399_v34, %s4214_s27  ;;  %v868_v42 = vsel %vm804_vm13, %v772_v20, %v836_v31  ;;  %1067 = vst.msk [vmem:[#allocation2 + $0x58] sm:$0x3] %vm1057_vm3, %v1040_v39  ;;  %v734_v45 = vmul.f32 %v4357_v30, %v600_v27  ;;  %v835_v46 = vmul.f32 0.01, %v771_v37  ;;  %v1239_v47 = vld [vmem:[#allocation2 + $0x19] sm:$0xff]  ;;  %v1240_v57 = vld [vmem:[#allocation2 + $0x21] sm:$0xff] }
  0xfb   : > { %1065 = vst.msk [vmem:[#allocation2 + $0x48] sm:$0xff] %vm1054_vm2, %v1024_v41  ;;  %1066 = vst.msk [vmem:[#allocation2 + $0x50] sm:$0xff] %vm1054_vm2, %v934_v40  ;;  %v936_v43 = vrot.slane %v868_v42, 7  ;;  %vm806_vm15 = vcmp.ge.f32.partialorder %v774_v44, 0.0  ;;  %v838_v49 = vmul.f32 0.01, %v774_v44  ;;  %v4132_v25 = vpack.c.bf16 %v2688_v24, %v2687_v23 }
  0xfc   : > { %v773_v50 = vadd.f32 %v4362_v32, %v734_v45  ;;  %v867_v51 = vsel %vm803_vm14, %v771_v37, %v835_v46  ;;  %v1271_v58 = vld [vmem:[#allocation2 + $0x1a] sm:$0xff]  ;;  %v3985_v3 = vpop.f32.mrb[10].mxu0  ;;  %v1272_v6 = vld [vmem:[#allocation2 + $0x22] sm:$0xff]  ;;  %v2689_v31 = vld [vmem:[%s5932_s4 + $0x10] sm:$0xff]  ;;  %vm2456_vm13 = vcmask 130048  }
  0xfd   : > { %v1041_v48 = vsel %vm925_vm8, %v936_v43, 0.0  ;;  %v935_v53 = vrot.slane %v867_v51, 7  ;;  %v870_v54 = vsel %vm806_vm15, %v774_v44, %v838_v49  ;;  %v737_v4 = vmul.f32 %v3985_v3, %v4357_v30  ;;  %v610_v5 = vpop.f32.mrb[11].mxu0  ;;  %v1318_v7 = vld [vmem:[#allocation2 + $0xd8] sm:$0xff]  ;;  %v1319_v18 = vld [vmem:[#allocation2 + $0xe0] sm:$0xff]  ;;  %4133 = vmatprep.subr.bf16.mxu1 %v4132_v25  ;;  %v389_v39 = vld [vmem:[%s4294_s20 + $0xe8] sm:$0xff] }
  0xfe   : > { %1816 = vrot.lane.b32.xlu0 %v1239_v47, %s4215_s28  ;;  %1436 = vrot.lane.b32.xlu1 %v1239_v47, %s4213_s22  ;;  %1070 = vst.msk [vmem:[#allocation2 + $0x70] sm:$0x3] %vm1057_vm3, %v1041_v48  ;;  %vm805_vm0 = vcmp.ge.f32.partialorder %v773_v50, 0.0  ;;  %v837_v55 = vmul.f32 0.01, %v773_v50  ;;  %v939_v56 = vrot.slane %v870_v54, 7  ;;  %v736_v9 = vmul.f32 %v4357_v30, %v610_v5 }
  0xff   : > { %v937_v59 = vsel %vm925_vm8, %v935_v53, %v936_v43  ;;  %v1025_v60 = vsel %vm925_vm8, 0.0, %v935_v53  ;;  %v776_v8 = vadd.f32 %v4362_v32, %v737_v4  ;;  %v1350_v19 = vld [vmem:[#allocation2 + $0xd9] sm:$0xff]  ;;  %v1351_v26 = vld [vmem:[#allocation2 + $0xe1] sm:$0xff]  ;;  %4135 = vmatpush3.bf16.msra.mxu1 %v4132_v25  ;;  %v390_v40 = vld [vmem:[%s4294_s20 + $0xf0] sm:$0xff]  ;;  %vm2489_vm15 = vcmask 195584  }
 0x100   : > { %v869_v61 = vsel %vm805_vm0, %v773_v50, %v837_v55  ;;  %1068 = vst.msk [vmem:[#allocation2 + $0x60] sm:$0xff] %vm1054_vm2, %v1025_v60  ;;  %1069 = vst.msk [vmem:[#allocation2 + $0x68] sm:$0xff] %vm1054_vm2, %v937_v59  ;;  %v1042_v62 = vsel %vm925_vm8, %v939_v56, 0.0  ;;  %v775_v11 = vadd.f32 %v4362_v32, %v736_v9  ;;  %v1382_v27 = vld [vmem:[#allocation2 + $0xda] sm:$0xff]  ;;  %v4481_v37 = vld [vmem:[#allocation2 + $0x30] sm:$0xff]  ;;  %v3988_v50 = vpop.f32.mrb[12].mxu0 }
 0x101   : > { %v938_v63 = vrot.slane %v869_v61, 7  ;;  %1073 = vst.msk [vmem:[#allocation2 + $0x88] sm:$0x3] %vm1057_vm3, %v1042_v62  ;;  %vm808_vm4 = vcmp.ge.f32.partialorder %v776_v8, 0.0  ;;  %v840_v10 = vmul.f32 0.01, %v776_v8  ;;  %v739_v52 = vmul.f32 %v3988_v50, %v4357_v30 }
 0x102   : > { %1818 = vrot.lane.b32.xlu0 %v1240_v57, %s4215_s28  ;;  %1944 = vrot.lane.b32.xlu1 %v1271_v58, %s4216_s29  ;;  %vm807_vm5 = vcmp.ge.f32.partialorder %v775_v11, 0.0  ;;  %v839_v13 = vmul.f32 0.01, %v775_v11  ;;  %v387_v28 = vld [vmem:[%s4294_s20 + $0xd8] sm:$0xff]  ;;  %v388_v29 = vld [vmem:[%s4294_s20 + $0xe0] sm:$0xff]  ;;  %v620_v53 = vpop.f32.mrb[13].mxu0 }
 0x103   : > { %v940_v0 = vsel %vm925_vm8, %v938_v63, %v939_v56  ;;  %v1026_v1 = vsel %vm925_vm8, 0.0, %v938_v63  ;;  %v872_v12 = vsel %vm808_vm4, %v776_v8, %v840_v10  ;;  %4008 = vmatmul.mubr.msk.f32.gmra.mrb[10].mxu1 %vm393_vm1, %v387_v28  ;;  %v2690_v35 = vld [vmem:[%s5932_s4 + $0x18] sm:$0xff]  ;;  %v2691_v41 = vld [vmem:[%s5932_s4 + $0x20] sm:$0xff]  ;;  %v2692_v42 = vld [vmem:[%s5932_s4 + $0x28] sm:$0xff]  ;;  %v778_v54 = vadd.f32 %v4362_v32, %v739_v52  ;;  %v3991_v8 = vpop.f32.mrb[14].mxu0  ;;  %v4580_v28 = vpop.permute.xlu0 %1432 }
 0x104   : > { %1071 = vst.msk [vmem:[#allocation2 + $0x78] sm:$0xff] %vm1054_vm2, %v1026_v1  ;;  %1072 = vst.msk [vmem:[#allocation2 + $0x80] sm:$0xff] %vm1054_vm2, %v940_v0  ;;  %v942_v14 = vrot.slane %v872_v12, 7  ;;  %v871_v15 = vsel %vm807_vm5, %v775_v11, %v839_v13  ;;  %4010 = vmatprep.mubr.msk.f32.mxu1 %vm393_vm1, %v388_v29  ;;  %v4136_v36 = vpack.c.bf16 %v2690_v35, %v2689_v31  ;;  %v4483_v38 = vld [vmem:[#allocation2 + $0x38] sm:$0xff]  ;;  %v2693_v45 = vld [vmem:[%s5932_s4 + $0x30] sm:$0xff]  ;;  %v630_v10 = vpop.f32.mrb[15].mxu0 }
 0x105   : > { %v941_v17 = vrot.slane %v871_v15, 7  ;;  %v4140_v43 = vpack.c.bf16 %v2692_v42, %v2691_v41  ;;  %v391_v44 = vld [vmem:[%s4294_s20 + $0xf8] sm:$0xff]  ;;  %v2695_v51 = vld [vmem:[%s5932_s4 + $0x40] sm:$0xff]  ;;  %v738_v55 = vmul.f32 %v4357_v30, %v620_v53  ;;  %vm810_vm6 = vcmp.ge.f32.partialorder %v778_v54, 0.0  ;;  %v4536_v4 = vld [vmem:[#allocation2 + $0x48] sm:$0xff] }
 0x106   : > { %1438 = vrot.lane.b32.xlu0 %v1240_v57, %s4213_s22  ;;  %1564 = vrot.lane.b32.xlu1 %v1271_v58, %s4212_s21  ;;  %v1043_v16 = vsel %vm925_vm8, %v942_v14, 0.0  ;;  %v2694_v46 = vld [vmem:[%s5932_s4 + $0x38] sm:$0xff]  ;;  %v842_v56 = vmul.f32 0.01, %v778_v54  ;;  %v4538_v5 = vld [vmem:[#allocation2 + $0x50] sm:$0xff]  ;;  %v741_v9 = vmul.f32 %v3991_v8, %v4357_v30  ;;  %v740_v12 = vmul.f32 %v4357_v30, %v630_v10 }
 0x107   : > { %1076 = vst.msk [vmem:[#allocation2 + $0xa0] sm:$0x3] %vm1057_vm3, %v1043_v16  ;;  %v943_v20 = vsel %vm925_vm8, %v941_v17, %v942_v14  ;;  %v1027_v21 = vsel %vm925_vm8, 0.0, %v941_v17  ;;  %4137 = vmatprep.subr.bf16.mxu1 %v4136_v36  ;;  %4011 = vmatmul.mubr.msk.f32.gmra.mrb[12].mxu1 %vm393_vm1, %v389_v39  ;;  %v4144_v47 = vpack.c.bf16 %v2694_v46, %v2693_v45  ;;  %v1336_v48 = vld [vmem:[#allocation2 + $0x31] sm:$0xff]  ;;  %v1337_v49 = vld [vmem:[#allocation2 + $0x39] sm:$0xff]  ;;  %v1340_v29 = vld [vmem:[#allocation2 + $0x61] sm:$0xff] }
 0x108   : > { %1074 = vst.msk [vmem:[#allocation2 + $0x90] sm:$0xff] %vm1054_vm2, %v1027_v21  ;;  %1075 = vst.msk [vmem:[#allocation2 + $0x98] sm:$0xff] %vm1054_vm2, %v943_v20  ;;  %4139 = vmatpush3.bf16.msra.mxu1 %v4136_v36  ;;  %4013 = vmatprep.mubr.msk.f32.mxu1 %vm393_vm1, %v390_v40  ;;  %v777_v57 = vadd.f32 %v4362_v32, %v738_v55  ;;  %v1368_v58 = vld [vmem:[#allocation2 + $0x32] sm:$0xff]  ;;  %v874_v59 = vsel %vm810_vm6, %v778_v54, %v842_v56  ;;  %v1369_v3 = vld [vmem:[#allocation2 + $0x3a] sm:$0xff]  ;;  %v4590_v36 = vpop.permute.xlu0 %1434  ;;  %vm2522_vm0 = vcmask 261120   ;;  %vm2555_vm4 = vcmask 326656  }
 0x109   : > { %4141 = vmatprep.subr.bf16.mxu1 %v4140_v43  ;;  %v945_v61 = vrot.slane %v874_v59, 7  ;;  %v780_v11 = vadd.f32 %v4362_v32, %v741_v9  ;;  %v779_v14 = vadd.f32 %v4362_v32, %v740_v12  ;;  %v1370_v15 = vld [vmem:[#allocation2 + $0x4a] sm:$0xff]  ;;  %v1371_v24 = vld [vmem:[#allocation2 + $0x52] sm:$0xff]  ;;  %v4570_v25 = vld [vmem:[#allocation2 + $0x60] sm:$0xff]  ;;  %vm2588_vm6 = vcmask 392192  }
 0x10a   : > { %1946 = vrot.lane.b32.xlu0 %v1272_v6, %s4216_s29  ;;  %2100 = vrot.lane.b32.xlu1 %v1318_v7, %s4217_s30  ;;  %vm809_vm7 = vcmp.ge.f32.partialorder %v777_v57, 0.0  ;;  %v841_v60 = vmul.f32 0.01, %v777_v57  ;;  %v1341_v31 = vld [vmem:[#allocation2 + $0x69] sm:$0xff] }
 0x10b   : > { %4014 = vmatmul.mubr.msk.f32.gmra.mrb[14].mxu1 %vm393_vm1, %v391_v44  ;;  %v1044_v63 = vsel %vm925_vm8, %v945_v61, 0.0  ;;  %vm812_vm9 = vcmp.ge.f32.partialorder %v780_v11, 0.0  ;;  %v844_v13 = vmul.f32 0.01, %v780_v11  ;;  %vm811_vm10 = vcmp.ge.f32.partialorder %v779_v14, 0.0  ;;  %v1372_v41 = vld [vmem:[#allocation2 + $0x62] sm:$0xff] }
 0x10c   : > { %4143 = vmatpush3.bf16.msra.mxu1 %v4140_v43  ;;  %v873_v62 = vsel %vm809_vm7, %v777_v57, %v841_v60  ;;  %1079 = vst.msk [vmem:[#allocation2 + $0xb8] sm:$0x3] %vm1057_vm3, %v1044_v63  ;;  %v843_v17 = vmul.f32 0.01, %v779_v14  ;;  %v3997_v44 = vpop.f32.mrb[2].mxu1  ;;  %v4628_v63 = vld [vmem:[#allocation2 + $0x80] sm:$0xff] }
 0x10d   : > { %4145 = vmatprep.subr.bf16.mxu1 %v4144_v47  ;;  %v944_v0 = vrot.slane %v873_v62, 7  ;;  %v876_v16 = vsel %vm812_vm9, %v780_v11, %v844_v13  ;;  %v4626_v62 = vld [vmem:[#allocation2 + $0x78] sm:$0xff]  ;;  %v1343_v11 = vld [vmem:[#allocation2 + $0x81] sm:$0xff]  ;;  %vm2621_vm7 = vcmask 457728   ;;  %vm2654_vm9 = vcmask 523264  }
 0x10e   : > { %1566 = vrot.lane.b32.xlu0 %v1272_v6, %s4212_s21  ;;  %1720 = vrot.lane.b32.xlu1 %v1318_v7, %s4214_s27  ;;  %v1338_v6 = vld [vmem:[#allocation2 + $0x49] sm:$0xff]  ;;  %v1339_v7 = vld [vmem:[#allocation2 + $0x51] sm:$0xff]  ;;  %v1342_v10 = vld [vmem:[#allocation2 + $0x79] sm:$0xff] }
 0x10f   : > { %v946_v1 = vsel %vm925_vm8, %v944_v0, %v945_v61  ;;  %v1028_v2 = vsel %vm925_vm8, 0.0, %v944_v0 }
 0x110   : > { %4147 = vmatpush3.bf16.msra.mxu1 %v4144_v47  ;;  %1077 = vst.msk [vmem:[#allocation2 + $0xa8] sm:$0xff] %vm1054_vm2, %v1028_v2  ;;  %1078 = vst.msk [vmem:[#allocation2 + $0xb0] sm:$0xff] %vm1054_vm2, %v946_v1  ;;  %v745_v47 = vmul.f32 %v3997_v44, %v4357_v30 }
 0x111   : > { %4032 = vmatprep.subr.mxu1 %v2695_v51 }
 0x112   : > { %2102 = vrot.lane.b32.xlu0 %v1319_v18, %s4217_s30  ;;  %2228 = vrot.lane.b32.xlu1 %v1350_v19, %s4218_s11  ;;  %v784_v50 = vadd.f32 %v4362_v32, %v745_v47 }
 0x114   : > { %4033 = vmatpush3.msra.mxu1 %v2695_v51  ;;  %vm816_vm11 = vcmp.ge.f32.partialorder %v784_v50, 0.0  ;;  %v848_v54 = vmul.f32 0.01, %v784_v50 }
 0x116   : > { %1722 = vrot.lane.b32.xlu0 %v1319_v18, %s4214_s27  ;;  %1848 = vrot.lane.b32.xlu1 %v1350_v19, %s4215_s28  ;;  %v948_v18 = vrot.slane %v876_v16, 7  ;;  %v875_v19 = vsel %vm811_vm10, %v779_v14, %v843_v17  ;;  %v880_v56 = vsel %vm816_vm11, %v784_v50, %v848_v54  ;;  %v1374_v16 = vld [vmem:[#allocation2 + $0x7a] sm:$0xff]  ;;  %vm2696_vm10 = vcmask 588800  }
 0x117   : > { %v947_v21 = vrot.slane %v875_v19, 7 }
 0x118   : > { %v1045_v20 = vsel %vm925_vm8, %v948_v18, 0.0 }
 0x119   : > { %1082 = vst.msk [vmem:[#allocation2 + $0xd0] sm:$0x3] %vm1057_vm3, %v1045_v20  ;;  %v949_v22 = vsel %vm925_vm8, %v947_v21, %v948_v18  ;;  %v1029_v23 = vsel %vm925_vm8, 0.0, %v947_v21  ;;  %v1110_v20 = vld [vmem:[#allocation2] sm:$0xff] }
 0x11a   : > { %2230 = vrot.lane.b32.xlu0 %v1351_v26, %s4218_s11  ;;  %2356 = vrot.lane.b32.xlu1 %v1382_v27, %s4219_s19  ;;  %1080 = vst.msk [vmem:[#allocation2 + $0xc0] sm:$0xff] %vm1054_vm2, %v1029_v23  ;;  %1081 = vst.msk [vmem:[#allocation2 + $0xc8] sm:$0xff] %vm1054_vm2, %v949_v22  ;;  %v4572_v26 = vld [vmem:[#allocation2 + $0x68] sm:$0xff]  ;;  %v4578_v27 = vpop.permute.xlu1 %1560 }
 0x11e   : > { %2072 = vrot.lane.b32.xlu1 %v4481_v37, %s4217_s30  ;;  %2074 = vrot.lane.b32.xlu0 %v4483_v38, %s4217_s30  ;;  %v4588_v35 = vpop.permute.xlu1 %1562 }
 0x122   : > { %1692 = vrot.lane.b32.xlu1 %v4481_v37, %s4214_s27  ;;  %1694 = vrot.lane.b32.xlu0 %v4483_v38, %s4214_s27 }
 0x126   : > { %2200 = vrot.lane.b32.xlu1 %v1336_v48, %s4218_s11  ;;  %2202 = vrot.lane.b32.xlu0 %v1337_v49, %s4218_s11 }
 0x12a   : > { %1820 = vrot.lane.b32.xlu1 %v1336_v48, %s4215_s28  ;;  %1440 = vrot.lane.b32.xlu0 %v1336_v48, %s4213_s22  ;;  %v1373_v48 = vld [vmem:[#allocation2 + $0x6a] sm:$0xff] }
 0x12e   : > { %2328 = vrot.lane.b32.xlu1 %v1368_v58, %s4219_s19  ;;  %1948 = vrot.lane.b32.xlu0 %v1368_v58, %s4216_s29 }
 0x132   : > { %1822 = vrot.lane.b32.xlu1 %v1337_v49, %s4215_s28  ;;  %1442 = vrot.lane.b32.xlu0 %v1337_v49, %s4213_s22  ;;  %v650_v49 = vpop.f32.mrb[3].mxu1 }
 0x133   : > { %v744_v51 = vmul.f32 %v4357_v30, %v650_v49  ;;  %v4000_v19 = vpop.f32.mrb[4].mxu1 }
 0x134   : > { %v747_v23 = vmul.f32 %v4000_v19, %v4357_v30 }
 0x135   : > { %v783_v55 = vadd.f32 %v4362_v32, %v744_v51 }
 0x136   : > { %2330 = vrot.lane.b32.xlu1 %v1369_v3, %s4219_s19  ;;  %1950 = vrot.lane.b32.xlu0 %v1369_v3, %s4216_s29 }
 0x137   : > { %vm815_vm12 = vcmp.ge.f32.partialorder %v783_v55, 0.0  ;;  %v847_v57 = vmul.f32 0.01, %v783_v55 }
 0x139   : > { %v879_v61 = vsel %vm815_vm12, %v783_v55, %v847_v57 }
 0x13a   : > { %1568 = vrot.lane.b32.xlu1 %v1368_v58, %s4212_s21  ;;  %1570 = vrot.lane.b32.xlu0 %v1369_v3, %s4212_s21  ;;  %v954_v58 = vrot.slane %v880_v56, 7  ;;  %v953_v1 = vrot.slane %v879_v61, 7  ;;  %v1111_v61 = vld [vmem:[#allocation2 + $0x8] sm:$0xff] }
 0x13c   : > { %v1047_v0 = vsel %vm925_vm8, %v954_v58, 0.0  ;;  %v955_v2 = vsel %vm925_vm8, %v953_v1, %v954_v58  ;;  %v1031_v3 = vsel %vm925_vm8, 0.0, %v953_v1  ;;  %v4696_v1 = vld [vmem:[#allocation2 + $0x98] sm:$0xff] }
 0x13d   : > { %1088 = vst.msk [vmem:[#allocation2 + $0x100] sm:$0x3] %vm1057_vm3, %v1047_v0  ;;  %v4694_v0 = vld [vmem:[#allocation2 + $0x90] sm:$0xff] }
 0x13e   : > { %2076 = vrot.lane.b32.xlu1 %v4536_v4, %s4217_s30  ;;  %2078 = vrot.lane.b32.xlu0 %v4538_v5, %s4217_s30  ;;  %1086 = vst.msk [vmem:[#allocation2 + $0xf0] sm:$0xff] %vm1054_vm2, %v1031_v3  ;;  %1087 = vst.msk [vmem:[#allocation2 + $0xf8] sm:$0xff] %vm1054_vm2, %v955_v2 }
 0x142   : > { %1696 = vrot.lane.b32.xlu1 %v4536_v4, %s4214_s27  ;;  %1698 = vrot.lane.b32.xlu0 %v4538_v5, %s4214_s27 }
 0x146   : > { %2204 = vrot.lane.b32.xlu1 %v1338_v6, %s4218_s11  ;;  %2206 = vrot.lane.b32.xlu0 %v1339_v7, %s4218_s11 }
 0x14a   : > { %1824 = vrot.lane.b32.xlu1 %v1338_v6, %s4215_s28  ;;  %1444 = vrot.lane.b32.xlu0 %v1338_v6, %s4213_s22 }
 0x14e   : > { %2332 = vrot.lane.b32.xlu1 %v1370_v15, %s4219_s19  ;;  %1952 = vrot.lane.b32.xlu0 %v1370_v15, %s4216_s29 }
 0x152   : > { %1826 = vrot.lane.b32.xlu1 %v1339_v7, %s4215_s28  ;;  %1446 = vrot.lane.b32.xlu0 %v1339_v7, %s4213_s22 }
 0x156   : > { %2334 = vrot.lane.b32.xlu1 %v1371_v24, %s4219_s19  ;;  %1954 = vrot.lane.b32.xlu0 %v1371_v24, %s4216_s29 }
 0x15a   : > { %1572 = vrot.lane.b32.xlu1 %v1370_v15, %s4212_s21  ;;  %1574 = vrot.lane.b32.xlu0 %v1371_v24, %s4212_s21  ;;  %v1375_v24 = vld [vmem:[#allocation2 + $0x82] sm:$0xff] }
 0x15e   : > { %2080 = vrot.lane.b32.xlu1 %v4570_v25, %s4217_s30  ;;  %2082 = vrot.lane.b32.xlu0 %v4572_v26, %s4217_s30 }
 0x162   : > { %1700 = vrot.lane.b32.xlu1 %v4570_v25, %s4214_s27  ;;  %1702 = vrot.lane.b32.xlu0 %v4572_v26, %s4214_s27 }
 0x166   : > { %2208 = vrot.lane.b32.xlu1 %v1340_v29, %s4218_s11  ;;  %2210 = vrot.lane.b32.xlu0 %v1341_v31, %s4218_s11 }
 0x16a   : > { %1828 = vrot.lane.b32.xlu1 %v1340_v29, %s4215_s28  ;;  %1448 = vrot.lane.b32.xlu0 %v1340_v29, %s4213_s22  ;;  %v786_v29 = vadd.f32 %v4362_v32, %v747_v23 }
 0x16c   : > { %v4594_v39 = vpop.permute.xlu0 %1688  ;;  %v4596_v40 = vpop.permute.xlu1 %1690  ;;  %vm818_vm14 = vcmp.ge.f32.partialorder %v786_v29, 0.0  ;;  %v850_v49 = vmul.f32 0.01, %v786_v29 }
 0x16e   : > { %2336 = vrot.lane.b32.xlu1 %v1372_v41, %s4219_s19  ;;  %1956 = vrot.lane.b32.xlu0 %v1372_v41, %s4216_s29  ;;  %v882_v54 = vsel %vm818_vm14, %v786_v29, %v850_v49 }
 0x170   : > { %v4600_v42 = vpop.permute.xlu0 %1816  ;;  %v4602_v43 = vpop.permute.xlu1 %1436 }
 0x172   : > { %1830 = vrot.lane.b32.xlu1 %v1341_v31, %s4215_s28  ;;  %1450 = vrot.lane.b32.xlu0 %v1341_v31, %s4213_s22  ;;  %v660_v31 = vpop.f32.mrb[5].mxu1 }
 0x173   : > { %v746_v44 = vmul.f32 %v4357_v30, %v660_v31 }
 0x174   : > { %v4606_v45 = vpop.permute.xlu0 %1818  ;;  %v4608_v46 = vpop.permute.xlu1 %1944 }
 0x175   : > { %v785_v50 = vadd.f32 %v4362_v32, %v746_v44  ;;  %v1344_v44 = vld [vmem:[#allocation2 + $0x91] sm:$0xff] }
 0x176   : > { %2338 = vrot.lane.b32.xlu1 %v1373_v48, %s4219_s19  ;;  %1958 = vrot.lane.b32.xlu0 %v1373_v48, %s4216_s29 }
 0x177   : > { %vm817_vm5 = vcmp.ge.f32.partialorder %v785_v50, 0.0  ;;  %v849_v55 = vmul.f32 0.01, %v785_v50 }
 0x178   : > { %v4615_v52 = vpop.permute.xlu0 %1438  ;;  %v4617_v53 = vpop.permute.xlu1 %1564 }
 0x179   : > { %v881_v3 = vsel %vm817_vm5, %v785_v50, %v849_v55  ;;  %v4003_v55 = vpop.f32.mrb[6].mxu1 }
 0x17a   : > { %1576 = vrot.lane.b32.xlu1 %v1372_v41, %s4212_s21  ;;  %1578 = vrot.lane.b32.xlu0 %v1373_v48, %s4212_s21  ;;  %v2424_v41 = vsel %vm1054_vm2, %v1110_v20, %v4580_v28  ;;  %v957_v28 = vrot.slane %v882_v54, 7 }
 0x17b   : > { %v2457_v51 = vsel %vm2456_vm13, %v2424_v41, %v4578_v27 }
 0x17c   : > { %v4622_v59 = vpop.permute.xlu0 %1946  ;;  %v4624_v60 = vpop.permute.xlu1 %2100  ;;  %v2490_v56 = vsel %vm2489_vm15, %v2457_v51, %v4594_v39  ;;  %v1048_v2 = vsel %vm925_vm8, %v957_v28, 0.0 }
 0x17d   : > { %v2523_v27 = vsel %vm2522_vm0, %v2490_v56, %v4600_v42  ;;  %1091 = vst.msk [vmem:[#allocation2 + $0x118] sm:$0x3] %vm1057_vm3, %v1048_v2  ;;  %v956_v42 = vrot.slane %v881_v3, 7  ;;  %v1377_v2 = vld [vmem:[#allocation2 + $0x9a] sm:$0xff] }
 0x17e   : > { %2084 = vrot.lane.b32.xlu1 %v4626_v62, %s4217_s30  ;;  %2086 = vrot.lane.b32.xlu0 %v4628_v63, %s4217_s30  ;;  %v2556_v39 = vsel %vm2555_vm4, %v2523_v27, %v4608_v46  ;;  %v749_v27 = vmul.f32 %v4003_v55, %v4357_v30 }
 0x17f   : > { %v958_v20 = vsel %vm925_vm8, %v956_v42, %v957_v28  ;;  %v1032_v23 = vsel %vm925_vm8, 0.0, %v956_v42 }
 0x180   : > { %v4638_v6 = vpop.permute.xlu0 %1566  ;;  %v4640_v7 = vpop.permute.xlu1 %1720  ;;  %1089 = vst.msk [vmem:[#allocation2 + $0x108] sm:$0xff] %vm1054_vm2, %v1032_v23  ;;  %1090 = vst.msk [vmem:[#allocation2 + $0x110] sm:$0xff] %vm1054_vm2, %v958_v20  ;;  %v788_v3 = vadd.f32 %v4362_v32, %v749_v27  ;;  %v2426_v20 = vsel %vm1054_vm2, %v4397_v33, %v4602_v43  ;;  %v4778_v43 = vld [vmem:[#allocation2 + $0xa8] sm:$0xff] }
 0x182   : > { %1704 = vrot.lane.b32.xlu1 %v4626_v62, %s4214_s27  ;;  %1706 = vrot.lane.b32.xlu0 %v4628_v63, %s4214_s27  ;;  %vm820_vm11 = vcmp.ge.f32.partialorder %v788_v3, 0.0 }
 0x184   : > { %v4648_v8 = vpop.permute.xlu0 %2102  ;;  %v4650_v9 = vpop.permute.xlu1 %2228 }
 0x186   : > { %2212 = vrot.lane.b32.xlu1 %v1342_v10, %s4218_s11  ;;  %2214 = vrot.lane.b32.xlu0 %v1343_v11, %s4218_s11 }
 0x188   : > { %v4654_v12 = vpop.permute.xlu0 %1722  ;;  %v4656_v13 = vpop.permute.xlu1 %1848 }
 0x18a   : > { %1832 = vrot.lane.b32.xlu1 %v1342_v10, %s4215_s28  ;;  %1452 = vrot.lane.b32.xlu0 %v1342_v10, %s4213_s22 }
 0x18c   : > { %v4660_v14 = vpop.permute.xlu0 %2230  ;;  %v4662_v15 = vpop.permute.xlu1 %2356 }
 0x18e   : > { %2340 = vrot.lane.b32.xlu1 %v1374_v16, %s4219_s19  ;;  %1960 = vrot.lane.b32.xlu0 %v1374_v16, %s4216_s29 }
 0x190   : > { %v2073_v17 = vpop.permute.xlu1 %2072  ;;  %v4666_v18 = vpop.permute.xlu0 %2074 }
 0x191   : > { %v2589_v10 = vsel %vm2588_vm6, %v2556_v39, %v2073_v17  ;;  %v670_v39 = vpop.f32.mrb[7].mxu1 }
 0x192   : > { %1834 = vrot.lane.b32.xlu1 %v1343_v11, %s4215_s28  ;;  %1454 = vrot.lane.b32.xlu0 %v1343_v11, %s4213_s22  ;;  %v2425_v11 = vsel %vm1054_vm2, %v1111_v61, %v4590_v36  ;;  %v748_v42 = vmul.f32 %v4357_v30, %v670_v39 }
 0x193   : > { %v2458_v36 = vsel %vm2456_vm13, %v2425_v11, %v4588_v35  ;;  %v1345_v35 = vld [vmem:[#allocation2 + $0x99] sm:$0xff] }
 0x194   : > { %v4670_v21 = vpop.permute.xlu1 %1692  ;;  %v4672_v22 = vpop.permute.xlu0 %1694  ;;  %v2491_v17 = vsel %vm2489_vm15, %v2458_v36, %v4596_v40 }
 0x195   : > { %v2524_v41 = vsel %vm2522_vm0, %v2491_v17, %v4606_v45 }
 0x196   : > { %2342 = vrot.lane.b32.xlu1 %v1375_v24, %s4219_s19  ;;  %1962 = vrot.lane.b32.xlu0 %v1375_v24, %s4216_s29 }
 0x198   : > { %v2201_v47 = vpop.permute.xlu1 %2200  ;;  %v2203_v48 = vpop.permute.xlu0 %2202 }
 0x19a   : > { %1580 = vrot.lane.b32.xlu1 %v1374_v16, %s4212_s21  ;;  %1582 = vrot.lane.b32.xlu0 %v1375_v24, %s4212_s21  ;;  %v2622_v16 = vsel %vm2621_vm7, %v2589_v10, %v2201_v47  ;;  %v2557_v47 = vsel %vm2555_vm4, %v2524_v41, %v4622_v59 }
 0x19b   : > { %v2590_v49 = vsel %vm2588_vm6, %v2557_v47, %v4666_v18  ;;  %v1376_v18 = vld [vmem:[#allocation2 + $0x92] sm:$0xff] }
 0x19c   : > { %v4688_v57 = vpop.permute.xlu1 %1820  ;;  %v4690_v58 = vpop.permute.xlu0 %1440  ;;  %v2623_v40 = vsel %vm2621_vm7, %v2590_v49, %v2203_v48 }
 0x19e   : > { %2088 = vrot.lane.b32.xlu1 %v4694_v0, %s4217_s30  ;;  %2090 = vrot.lane.b32.xlu0 %v4696_v1, %s4217_s30 }
 0x1a0   : > { %v2329_v19 = vpop.permute.xlu1 %2328  ;;  %v4710_v46 = vpop.permute.xlu0 %1948 }
 0x1a1   : > { %v2655_v24 = vsel %vm2654_vm9, %v2622_v16, %v2329_v19  ;;  %v852_v16 = vmul.f32 0.01, %v788_v3  ;;  %v787_v19 = vadd.f32 %v4362_v32, %v748_v42 }
 0x1a2   : > { %4034 = vmatprep.mubr.msk.f32.mxu1 %vm2696_vm10, %v2655_v24  ;;  %1708 = vrot.lane.b32.xlu1 %v4694_v0, %s4214_s27  ;;  %v2459_v24 = vsel %vm2456_vm13, %v2426_v20, %v4617_v53 }
 0x1a3   : > { %1710 = vrot.lane.b32.xlu0 %v4696_v1, %s4214_s27  ;;  %v884_v23 = vsel %vm820_vm11, %v788_v3, %v852_v16  ;;  %vm819_vm12 = vcmp.ge.f32.partialorder %v787_v19, 0.0  ;;  %v851_v30 = vmul.f32 0.01, %v787_v19  ;;  %v2492_v17 = vsel %vm2489_vm15, %v2459_v24, %v4670_v21 }
 0x1a4   : > { %v4726_v29 = vpop.permute.xlu1 %1822  ;;  %v4728_v31 = vpop.permute.xlu0 %1442  ;;  %v960_v36 = vrot.slane %v884_v23, 7  ;;  %v2525_v33 = vsel %vm2522_vm0, %v2492_v17, %v4688_v57 }
 0x1a5   : > { %v883_v53 = vsel %vm819_vm12, %v787_v19, %v851_v30  ;;  %v2558_v47 = vsel %vm2555_vm4, %v2525_v33, %v4710_v46  ;;  %v2428_v33 = vsel %vm1054_vm2, %v4481_v37, %v4690_v58 }
 0x1a6   : > { %2216 = vrot.lane.b32.xlu1 %v1344_v44, %s4218_s11  ;;  %v959_v21 = vrot.slane %v883_v53, 7 }
 0x1a7   : > { %2218 = vrot.lane.b32.xlu0 %v1345_v35, %s4218_s11 }
 0x1a8   : > { %v2331_v50 = vpop.permute.xlu1 %2330  ;;  %v4739_v51 = vpop.permute.xlu0 %1950  ;;  %v1033_v46 = vsel %vm925_vm8, 0.0, %v959_v21 }
 0x1a9   : > { %v2656_v54 = vsel %vm2654_vm9, %v2623_v40, %v2331_v50  ;;  %1092 = vst.msk [vmem:[#allocation2 + $0x120] sm:$0xff] %vm1054_vm2, %v1033_v46  ;;  %v4870_v46 = vld [vmem:[%s5931_s3] ss:$0 sm:$0xff] }
 0x1aa   : > { %4035 = vmatmul.mubr.msk.f32.vlgmr.msra.gmra.mrb[16].mxu1 %vm2696_vm10, %v2656_v54  ;;  %1836 = vrot.lane.b32.xlu1 %v1344_v44, %s4215_s28  ;;  %v961_v54 = vsel %vm925_vm8, %v959_v21, %v960_v36 }
 0x1ab   : > { %1456 = vrot.lane.b32.xlu0 %v1344_v44, %s4213_s22  ;;  %v1049_v44 = vsel %vm925_vm8, %v960_v36, 0.0  ;;  %1093 = vst.msk [vmem:[#allocation2 + $0x128] sm:$0xff] %vm1054_vm2, %v961_v54  ;;  %v1379_v36 = vld [vmem:[#allocation2 + $0xb2] sm:$0xff]  ;;  %v4865_v54 = vld [vmem:[#allocation2 + $0xc0] sm:$0xff] }
 0x1ac   : > { %v4745_v45 = vpop.permute.xlu1 %1568  ;;  %v4747_v59 = vpop.permute.xlu0 %1570  ;;  %1094 = vst.msk [vmem:[#allocation2 + $0x130] sm:$0x3] %vm1057_vm3, %v1049_v44 }
 0x1ad   : > { %v2461_v53 = vsel %vm2456_vm13, %v2428_v33, %v4745_v45 }
 0x1ae   : > { %2344 = vrot.lane.b32.xlu1 %v1376_v18, %s4219_s19 }
 0x1af   : > { %1964 = vrot.lane.b32.xlu0 %v1376_v18, %s4216_s29 }
 0x1b0   : > { %v2077_v48 = vpop.permute.xlu1 %2076  ;;  %v2079_v28 = vpop.permute.xlu0 %2078 }
 0x1b1   : > { %v2591_v49 = vsel %vm2588_vm6, %v2558_v47, %v2077_v48  ;;  %v2427_v48 = vsel %vm1054_vm2, %v4399_v34, %v4615_v52  ;;  %v1346_v52 = vld [vmem:[#allocation2 + $0xa9] sm:$0xff]  ;;  %v4853_v47 = vld [vmem:[%s5930_s2] ss:$0 sm:$0xff] }
 0x1b2   : > { %1838 = vrot.lane.b32.xlu1 %v1345_v35, %s4215_s28  ;;  %v2460_v55 = vsel %vm2456_vm13, %v2427_v48, %v4638_v6  ;;  %v1347_v6 = vld [vmem:[#allocation2 + $0xb1] sm:$0xff]  ;;  %v4876_v48 = vld [vmem:[#allocation2 + $0xc8] sm:$0xff] }
 0x1b3   : > { %1458 = vrot.lane.b32.xlu0 %v1345_v35, %s4213_s22  ;;  %v4785_v35 = vld [vmem:[#allocation2 + $0xb0] sm:$0xff]  ;;  %v2493_v27 = vsel %vm2489_vm15, %v2460_v55, %v4672_v22 }
 0x1b4   : > { %v4753_v56 = vpop.permute.xlu1 %1696  ;;  %v4755_v61 = vpop.permute.xlu0 %1698  ;;  %v2526_v34 = vsel %vm2522_vm0, %v2493_v27, %v4726_v29 }
 0x1b5   : > { %v2559_v39 = vsel %vm2555_vm4, %v2526_v34, %v4739_v51 }
 0x1b6   : > { %2346 = vrot.lane.b32.xlu1 %v1377_v2, %s4219_s19  ;;  %v2592_v42 = vsel %vm2588_vm6, %v2559_v39, %v2079_v28  ;;  %v1378_v28 = vld [vmem:[#allocation2 + $0xaa] sm:$0xff] }
 0x1b7   : > { %1966 = vrot.lane.b32.xlu0 %v1377_v2, %s4216_s29 }
 0x1b8   : > { %v2205_v10 = vpop.permute.xlu1 %2204  ;;  %v2207_v11 = vpop.permute.xlu0 %2206 }
 0x1b9   : > { %v2624_v57 = vsel %vm2621_vm7, %v2591_v49, %v2205_v10  ;;  %v2625_v22 = vsel %vm2621_vm7, %v2592_v42, %v2207_v11 }
 0x1ba   : > { %1584 = vrot.lane.b32.xlu1 %v1376_v18, %s4212_s21 }
 0x1bb   : > { %1586 = vrot.lane.b32.xlu0 %v1377_v2, %s4212_s21 }
 0x1bc   : > { %v4772_v41 = vpop.permute.xlu1 %1824  ;;  %v4774_v32 = vpop.permute.xlu0 %1444 }
 0x1be   : > { %2092 = vrot.lane.b32.xlu1 %v4778_v43, %s4217_s30 }
 0x1bf   : > { %2094 = vrot.lane.b32.xlu0 %v4785_v35, %s4217_s30 }
 0x1c0   : > { %v2333_v40 = vpop.permute.xlu1 %2332  ;;  %v1953_v50 = vpop.permute.xlu0 %1952 }
 0x1c1   : > { %v2657_v18 = vsel %vm2654_vm9, %v2624_v57, %v2333_v40  ;;  %v2494_v57 = vsel %vm2489_vm15, %v2461_v53, %v4753_v56 }
 0x1c2   : > { %4037 = vmatprep.mubr.msk.f32.mxu1 %vm2696_vm10, %v2657_v18  ;;  %1712 = vrot.lane.b32.xlu1 %v4778_v43, %s4214_s27  ;;  %v2527_v45 = vsel %vm2522_vm0, %v2494_v57, %v4772_v41 }
 0x1c3   : > { %1714 = vrot.lane.b32.xlu0 %v4785_v35, %s4214_s27  ;;  %v2560_v56 = vsel %vm2555_vm4, %v2527_v45, %v1953_v50 }
 0x1c4   : > { %v4809_v2 = vpop.permute.xlu1 %1826  ;;  %v4811_v3 = vpop.permute.xlu0 %1446 }
 0x1c6   : > { %2220 = vrot.lane.b32.xlu1 %v1346_v52, %s4218_s11  ;;  %v4006_v44 = vpop.f32.mrb[8].mxu1 }
 0x1c7   : > { %2222 = vrot.lane.b32.xlu0 %v1347_v6, %s4218_s11  ;;  %v751_v21 = vmul.f32 %v4853_v47, %v4006_v44  ;;  %v680_v49 = vpop.f32.mrb[9].mxu1  ;;  %v1348_v44 = vld [vmem:[#allocation2 + $0xc1] sm:$0xff] }
 0x1c8   : > { %v2335_v10 = vpop.permute.xlu1 %2334  ;;  %v4821_v16 = vpop.permute.xlu0 %1954  ;;  %v750_v40 = vmul.f32 %v4853_v47, %v680_v49 }
 0x1c9   : > { %v2658_v19 = vsel %vm2654_vm9, %v2625_v22, %v2335_v10  ;;  %v790_v18 = vadd.f32 %v4870_v46, %v751_v21  ;;  %v2429_v22 = vsel %vm1054_vm2, %v4483_v38, %v4728_v31 }
 0x1ca   : > { %4038 = vmatmul.mubr.msk.f32.gmra.mrb[18].mxu1 %vm2696_vm10, %v2658_v19  ;;  %1840 = vrot.lane.b32.xlu1 %v1346_v52, %s4215_s28  ;;  %v789_v55 = vadd.f32 %v4870_v46, %v750_v40 }
 0x1cb   : > { %1460 = vrot.lane.b32.xlu0 %v1346_v52, %s4213_s22  ;;  %vm822_vm14 = vcmp.ge.f32.partialorder %v790_v18, 0.0  ;;  %v854_v27 = vmul.f32 0.01, %v790_v18 }
 0x1cc   : > { %v4827_v29 = vpop.permute.xlu1 %1572  ;;  %v4829_v51 = vpop.permute.xlu0 %1574  ;;  %vm821_vm5 = vcmp.ge.f32.partialorder %v789_v55, 0.0  ;;  %v853_v50 = vmul.f32 0.01, %v789_v55 }
 0x1cd   : > { %v886_v42 = vsel %vm822_vm14, %v790_v18, %v854_v27 }
 0x1ce   : > { %2348 = vrot.lane.b32.xlu1 %v1378_v28, %s4219_s19  ;;  %v963_v10 = vrot.slane %v886_v42, 7  ;;  %v885_v19 = vsel %vm821_vm5, %v789_v55, %v853_v50  ;;  %v2430_v42 = vsel %vm1054_vm2, %v4536_v4, %v4774_v32 }
 0x1cf   : > { %1968 = vrot.lane.b32.xlu0 %v1378_v28, %s4216_s29 }
 0x1d0   : > { %v2081_v11 = vpop.permute.xlu1 %2080  ;;  %v4833_v20 = vpop.permute.xlu0 %2082  ;;  %v1050_v31 = vsel %vm925_vm8, %v963_v10, 0.0 }
 0x1d1   : > { %v2593_v41 = vsel %vm2588_vm6, %v2560_v56, %v2081_v11  ;;  %v962_v11 = vrot.slane %v885_v19, 7  ;;  %1097 = vst.msk [vmem:[#allocation2 + $0x148] sm:$0x3] %vm1057_vm3, %v1050_v31 }
 0x1d2   : > { %1842 = vrot.lane.b32.xlu1 %v1347_v6, %s4215_s28 }
 0x1d3   : > { %1462 = vrot.lane.b32.xlu0 %v1347_v6, %s4213_s22  ;;  %v1034_v53 = vsel %vm925_vm8, 0.0, %v962_v11 }
 0x1d4   : > { %v4837_v23 = vpop.permute.xlu1 %1700  ;;  %v4839_v24 = vpop.permute.xlu0 %1702  ;;  %1095 = vst.msk [vmem:[#allocation2 + $0x138] sm:$0xff] %vm1054_vm2, %v1034_v53 }
 0x1d6   : > { %2350 = vrot.lane.b32.xlu1 %v1379_v36, %s4219_s19  ;;  %v4009_v55 = vpop.f32.mrb[10].mxu1 }
 0x1d7   : > { %1970 = vrot.lane.b32.xlu0 %v1379_v36, %s4216_s29 }
 0x1d8   : > { %v2209_v30 = vpop.permute.xlu1 %2208  ;;  %v2211_v17 = vpop.permute.xlu0 %2210 }
 0x1d9   : > { %v2626_v34 = vsel %vm2621_vm7, %v2593_v41, %v2209_v30 }
 0x1da   : > { %1588 = vrot.lane.b32.xlu1 %v1378_v28, %s4212_s21  ;;  %v2462_v28 = vsel %vm2456_vm13, %v2429_v22, %v4747_v59  ;;  %v964_v59 = vsel %vm925_vm8, %v962_v11, %v963_v10  ;;  %v2463_v10 = vsel %vm2456_vm13, %v2430_v42, %v4827_v29 }
 0x1db   : > { %1590 = vrot.lane.b32.xlu0 %v1379_v36, %s4212_s21  ;;  %v2495_v36 = vsel %vm2489_vm15, %v2462_v28, %v4755_v61  ;;  %v1349_v61 = vld [vmem:[#allocation2 + $0xc9] sm:$0xff]  ;;  %1096 = vst.msk [vmem:[#allocation2 + $0x140] sm:$0xff] %vm1054_vm2, %v964_v59 }
 0x1dc   : > { %v4858_v37 = vpop.permute.xlu1 %1828  ;;  %v4860_v58 = vpop.permute.xlu0 %1448  ;;  %v2528_v33 = vsel %vm2522_vm0, %v2495_v36, %v4809_v2  ;;  %v2496_v36 = vsel %vm2489_vm15, %v2463_v10, %v4837_v23 }
 0x1dd   : > { %v2561_v21 = vsel %vm2555_vm4, %v2528_v33, %v4821_v16  ;;  %v2529_v4 = vsel %vm2522_vm0, %v2496_v36, %v4858_v37 }
 0x1de   : > { %2096 = vrot.lane.b32.xlu1 %v4865_v54, %s4217_s30  ;;  %v2594_v2 = vsel %vm2588_vm6, %v2561_v21, %v4833_v20  ;;  %v1380_v20 = vld [vmem:[#allocation2 + $0xc2] sm:$0xff] }
 0x1df   : > { %2098 = vrot.lane.b32.xlu0 %v4876_v48, %s4217_s30  ;;  %v2627_v49 = vsel %vm2621_vm7, %v2594_v2, %v2211_v17 }
 0x1e0   : > { %v2337_v52 = vpop.permute.xlu1 %2336  ;;  %v4883_v39 = vpop.permute.xlu0 %1956 }
 0x1e1   : > { %v2659_v6 = vsel %vm2654_vm9, %v2626_v34, %v2337_v52  ;;  %v753_v34 = vmul.f32 %v4853_v47, %v4009_v55  ;;  %v1381_v52 = vld [vmem:[#allocation2 + $0xca] sm:$0xff]  ;;  %v2562_v23 = vsel %vm2555_vm4, %v2529_v4, %v4883_v39  ;;  %v1160_v55 = vld [vmem:[#allocation2 + $0xd9] sm:$0xff] }
 0x1e2   : > { %4040 = vmatprep.mubr.msk.f32.mxu1 %vm2696_vm10, %v2659_v6  ;;  %1716 = vrot.lane.b32.xlu1 %v4865_v54, %s4214_s27  ;;  %v690_v6 = vpop.f32.mrb[11].mxu1 }
 0x1e3   : > { %1718 = vrot.lane.b32.xlu0 %v4876_v48, %s4214_s27  ;;  %v792_v50 = vadd.f32 %v4870_v46, %v753_v34  ;;  %v752_v22 = vmul.f32 %v4853_v47, %v690_v6  ;;  %v4012_v33 = vpop.f32.mrb[12].mxu1 }
 0x1e4   : > { %v4898_v30 = vpop.permute.xlu1 %1830  ;;  %v4900_v38 = vpop.permute.xlu0 %1450  ;;  %v755_v59 = vmul.f32 %v4853_v47, %v4012_v33 }
 0x1e5   : > { %vm824_vm11 = vcmp.ge.f32.partialorder %v792_v50, 0.0  ;;  %v856_v11 = vmul.f32 0.01, %v792_v50  ;;  %v791_v31 = vadd.f32 %v4870_v46, %v752_v22  ;;  %v700_v53 = vpop.f32.mrb[13].mxu1 }
 0x1e6   : > { %2224 = vrot.lane.b32.xlu1 %v1348_v44, %s4218_s11  ;;  %v754_v37 = vmul.f32 %v4853_v47, %v700_v53  ;;  %v794_v39 = vadd.f32 %v4870_v46, %v755_v59 }
 0x1e7   : > { %2226 = vrot.lane.b32.xlu0 %v1349_v61, %s4218_s11  ;;  %v888_v32 = vsel %vm824_vm11, %v792_v50, %v856_v11  ;;  %vm823_vm12 = vcmp.ge.f32.partialorder %v791_v31, 0.0 }
 0x1e8   : > { %v2339_v57 = vpop.permute.xlu1 %2338  ;;  %v4917_v40 = vpop.permute.xlu0 %1958  ;;  %v966_v29 = vrot.slane %v888_v32, 7  ;;  %vm826_vm14 = vcmp.ge.f32.partialorder %v794_v39, 0.0  ;;  %v858_v4 = vmul.f32 0.01, %v794_v39 }
 0x1e9   : > { %v2660_v45 = vsel %vm2654_vm9, %v2627_v49, %v2339_v57  ;;  %v1256_v49 = vld [vmem:[#allocation2 + $0xe1] sm:$0xff] }
 0x1ea   : > { %4041 = vmatmul.mubr.msk.f32.gmra.mrb[20].mxu1 %vm2696_vm10, %v2660_v45  ;;  %1844 = vrot.lane.b32.xlu1 %v1348_v44, %s4215_s28  ;;  %v1051_v57 = vsel %vm925_vm8, %v966_v29, 0.0  ;;  %v890_v33 = vsel %vm826_vm14, %v794_v39, %v858_v4 }
 0x1eb   : > { %1464 = vrot.lane.b32.xlu0 %v1348_v44, %s4213_s22  ;;  %v855_v44 = vmul.f32 0.01, %v791_v31  ;;  %1100 = vst.msk [vmem:[#allocation2 + $0x160] sm:$0x3] %vm1057_vm3, %v1051_v57  ;;  %v969_v59 = vrot.slane %v890_v33, 7 }
 0x1ec   : > { %v4923_v16 = vpop.permute.xlu1 %1576  ;;  %v4925_v18 = vpop.permute.xlu0 %1578 }
 0x1ed   : > { %v887_v45 = vsel %vm823_vm12, %v791_v31, %v855_v44 }
 0x1ee   : > { %2352 = vrot.lane.b32.xlu1 %v1380_v20, %s4219_s19  ;;  %v965_v34 = vrot.slane %v887_v45, 7 }
 0x1ef   : > { %1972 = vrot.lane.b32.xlu0 %v1380_v20, %s4216_s29 }
 0x1f0   : > { %v2085_v17 = vpop.permute.xlu1 %2084  ;;  %v4929_v56 = vpop.permute.xlu0 %2086  ;;  %v967_v36 = vsel %vm925_vm8, %v965_v34, %v966_v29  ;;  %v1035_v31 = vsel %vm925_vm8, 0.0, %v965_v34 }
 0x1f1   : > { %v2595_v2 = vsel %vm2588_vm6, %v2562_v23, %v2085_v17  ;;  %v2431_v17 = vsel %vm1054_vm2, %v4538_v5, %v4811_v3  ;;  %v1383_v3 = vld [vmem:[#allocation2 + $0xe2] sm:$0xff]  ;;  %1098 = vst.msk [vmem:[#allocation2 + $0x150] sm:$0xff] %vm1054_vm2, %v1035_v31  ;;  %1099 = vst.msk [vmem:[#allocation2 + $0x158] sm:$0xff] %vm1054_vm2, %v967_v36  ;;  %v5018_v36 = vld [vmem:[#allocation2 + $0xf0] sm:$0xff] }
 0x1f2   : > { %1846 = vrot.lane.b32.xlu1 %v1349_v61, %s4215_s28  ;;  %v2464_v32 = vsel %vm2456_vm13, %v2431_v17, %v4829_v51 }
 0x1f3   : > { %1466 = vrot.lane.b32.xlu0 %v1349_v61, %s4213_s22  ;;  %v2497_v51 = vsel %vm2489_vm15, %v2464_v32, %v4839_v24  ;;  %v3192_v24 = vld [vmem:[%s5935_s7] sm:$0xff] }
 0x1f4   : > { %v4933_v41 = vpop.permute.xlu1 %1704  ;;  %v4935_v27 = vpop.permute.xlu0 %1706  ;;  %v2530_v45 = vsel %vm2522_vm0, %v2497_v51, %v4898_v30  ;;  %4082 = vmatprep.subr.mxu0 %v3192_v24  ;;  %v1384_v51 = vld [vmem:[#allocation2 + $0xf2] sm:$0xff] }
 0x1f5   : > { %4083 = vmatpush3.msra.mxu0 %v3192_v24 }
 0x1f6   : > { %2354 = vrot.lane.b32.xlu1 %v1381_v52, %s4219_s19 }
 0x1f7   : > { %1974 = vrot.lane.b32.xlu0 %v1381_v52, %s4216_s29 }
 0x1f8   : > { %v2213_v19 = vpop.permute.xlu1 %2212  ;;  %v4947_v28 = vpop.permute.xlu0 %2214 }
 0x1f9   : > { %v2628_v42 = vsel %vm2621_vm7, %v2595_v2, %v2213_v19  ;;  %v1287_v19 = vld [vmem:[#allocation2 + $0xda] sm:$0xff] }
 0x1fa   : > { %1592 = vrot.lane.b32.xlu1 %v1380_v20, %s4212_s21  ;;  %v4015_v20 = vpop.f32.mrb[14].mxu1 }
 0x1fb   : > { %1594 = vrot.lane.b32.xlu0 %v1381_v52, %s4212_s21  ;;  %v793_v52 = vadd.f32 %v4870_v46, %v754_v37  ;;  %v757_v50 = vmul.f32 %v4853_v47, %v4015_v20  ;;  %v710_v6 = vpop.f32.mrb[15].mxu1 }
 0x1fc   : > { %v4959_v21 = vpop.permute.xlu1 %1832  ;;  %v4961_v61 = vpop.permute.xlu0 %1452  ;;  %v756_v22 = vmul.f32 %v4853_v47, %v710_v6 }
 0x1fd   : > { %vm825_vm5 = vcmp.ge.f32.partialorder %v793_v52, 0.0  ;;  %v857_v47 = vmul.f32 0.01, %v793_v52  ;;  %v796_v29 = vadd.f32 %v4870_v46, %v757_v50 }
 0x1fe   : > { %1850 = vrot.lane.b32.xlu1 %v1256_v49, %s4215_s28  ;;  %v795_v44 = vadd.f32 %v4870_v46, %v756_v22  ;;  %v1052_v46 = vsel %vm925_vm8, %v969_v59, 0.0 }
 0x1ff   : > { %1468 = vrot.lane.b32.xlu0 %v1160_v55, %s4213_s22  ;;  %v889_v53 = vsel %vm825_vm5, %v793_v52, %v857_v47  ;;  %vm828_vm11 = vcmp.ge.f32.partialorder %v796_v29, 0.0  ;;  %v860_v57 = vmul.f32 0.01, %v796_v29  ;;  %v2563_v55 = vsel %vm2555_vm4, %v2530_v45, %v4917_v40  ;;  %1103 = vst.msk [vmem:[#allocation2 + $0x178] sm:$0x3] %vm1057_vm3, %v1052_v46  ;;  %v1352_v47 = vld [vmem:[#allocation2 + $0xf1] sm:$0xff] }
 0x200   : > { %v2341_v10 = vpop.permute.xlu1 %2340  ;;  %v4977_v11 = vpop.permute.xlu0 %1960  ;;  %v968_v2 = vrot.slane %v889_v53, 7  ;;  %vm827_vm12 = vcmp.ge.f32.partialorder %v795_v44, 0.0  ;;  %v859_v20 = vmul.f32 0.01, %v795_v44  ;;  %v2596_v30 = vsel %vm2588_vm6, %v2563_v55, %v4929_v56  ;;  %v1353_v53 = vld [vmem:[#allocation2 + $0xf9] sm:$0xff] }
 0x201   : > { %v2661_v5 = vsel %vm2654_vm9, %v2628_v42, %v2341_v10  ;;  %v892_v52 = vsel %vm828_vm11, %v796_v29, %v860_v57  ;;  %v2629_v6 = vsel %vm2621_vm7, %v2596_v30, %v4947_v28 }
 0x202   : > { %4043 = vmatprep.mubr.msk.f32.mxu1 %vm2696_vm10, %v2661_v5  ;;  %2358 = vrot.lane.b32.xlu1 %v1383_v3, %s4219_s19  ;;  %v970_v34 = vsel %vm925_vm8, %v968_v2, %v969_v59  ;;  %v1036_v39 = vsel %vm925_vm8, 0.0, %v968_v2  ;;  %v972_v40 = vrot.slane %v892_v52, 7  ;;  %v891_v50 = vsel %vm827_vm12, %v795_v44, %v859_v20 }
 0x203   : > { %1976 = vrot.lane.b32.xlu0 %v1287_v19, %s4216_s29  ;;  %1101 = vst.msk [vmem:[#allocation2 + $0x168] sm:$0xff] %vm1054_vm2, %v1036_v39  ;;  %1102 = vst.msk [vmem:[#allocation2 + $0x170] sm:$0xff] %vm1054_vm2, %v970_v34  ;;  %v971_v22 = vrot.slane %v891_v50, 7  ;;  %v2432_v59 = vsel %vm1054_vm2, %v4570_v25, %v4860_v58  ;;  %v1385_v34 = vld [vmem:[#allocation2 + $0xfa] sm:$0xff] }
 0x204   : > { %v4993_v23 = vpop.permute.xlu1 %1834  ;;  %v4995_v37 = vpop.permute.xlu0 %1454  ;;  %v1053_v56 = vsel %vm925_vm8, %v972_v40, 0.0  ;;  %v2465_v2 = vsel %vm2456_vm13, %v2432_v59, %v4923_v16 }
 0x205   : > { %1106 = vst.msk [vmem:[#allocation2 + $0x190] sm:$0x3] %vm1057_vm3, %v1053_v56  ;;  %v1037_v28 = vsel %vm925_vm8, 0.0, %v971_v22  ;;  %v2498_v57 = vsel %vm2489_vm15, %v2465_v2, %v4933_v41  ;;  %v1354_v56 = vld [vmem:[#allocation2 + $0x109] sm:$0xff] }
 0x206   : > { %1596 = vrot.lane.b32.xlu1 %v1287_v19, %s4212_s21  ;;  %1104 = vst.msk [vmem:[#allocation2 + $0x180] sm:$0xff] %vm1054_vm2, %v1037_v28  ;;  %v5038_v19 = vld [vmem:[#allocation2 + $0xf8] sm:$0xff]  ;;  %v2531_v46 = vsel %vm2522_vm0, %v2498_v57, %v4959_v21  ;;  %v2433_v21 = vsel %vm1054_vm2, %v4572_v26, %v4900_v38 }
 0x207   : > { %1470 = vrot.lane.b32.xlu0 %v1256_v49, %s4213_s22  ;;  %v973_v49 = vsel %vm925_vm8, %v971_v22, %v972_v40  ;;  %v2564_v25 = vsel %vm2555_vm4, %v2531_v46, %v4977_v11  ;;  %v2466_v11 = vsel %vm2456_vm13, %v2433_v21, %v4925_v18 }
 0x208   : > { %v2343_v17 = vpop.permute.xlu1 %2342  ;;  %v1963_v42 = vpop.permute.xlu0 %1962  ;;  %1105 = vst.msk [vmem:[#allocation2 + $0x188] sm:$0xff] %vm1054_vm2, %v973_v49  ;;  %v2499_v39 = vsel %vm2489_vm15, %v2466_v11, %v4935_v27  ;;  %v5103_v49 = vld [vmem:[#allocation2 + $0x110] sm:$0xff] }
 0x209   : > { %v2662_v10 = vsel %vm2654_vm9, %v2629_v6, %v2343_v17  ;;  %v2532_v30 = vsel %vm2522_vm0, %v2499_v39, %v4993_v23  ;;  %v5089_v17 = vld [vmem:[#allocation2 + $0x108] sm:$0xff] }
 0x20a   : > { %4044 = vmatmul.mubr.msk.f32.gmra.mrb[22].mxu1 %vm2696_vm10, %v2662_v10  ;;  %2104 = vrot.lane.b32.xlu1 %v5018_v36, %s4217_s30  ;;  %v2565_v26 = vsel %vm2555_vm4, %v2532_v30, %v1963_v42  ;;  %v5151_v30 = vld [vmem:[#allocation2 + $0x120] sm:$0xff] }
 0x20b   : > { %1978 = vrot.lane.b32.xlu0 %v1383_v3, %s4216_s29 }
 0x20c   : > { %v5030_v31 = vpop.permute.xlu1 %1580  ;;  %v5032_v4 = vpop.permute.xlu0 %1582 }
 0x20e   : > { %1724 = vrot.lane.b32.xlu1 %v5018_v36, %s4214_s27 }
 0x20f   : > { %1598 = vrot.lane.b32.xlu0 %v1383_v3, %s4212_s21 }
 0x210   : > { %v2089_v32 = vpop.permute.xlu1 %2088  ;;  %v2091_v5 = vpop.permute.xlu0 %2090 }
 0x211   : > { %v2597_v58 = vsel %vm2588_vm6, %v2564_v25, %v2089_v32  ;;  %v2598_v38 = vsel %vm2588_vm6, %v2565_v26, %v2091_v5 }
 0x212   : > { %2232 = vrot.lane.b32.xlu1 %v1352_v47, %s4218_s11 }
 0x213   : > { %2106 = vrot.lane.b32.xlu0 %v5038_v19, %s4217_s30 }
 0x214   : > { %v5042_v33 = vpop.permute.xlu1 %1708 }
 0x215   : > { %v5044_v29 = vpop.permute.xlu0 %1710 }
 0x216   : > { %1852 = vrot.lane.b32.xlu1 %v1352_v47, %s4215_s28 }
 0x217   : > { %1726 = vrot.lane.b32.xlu0 %v5038_v19, %s4214_s27 }
 0x218   : > { %v2217_v3 = vpop.permute.xlu1 %2216 }
 0x219   : > { %v2219_v44 = vpop.permute.xlu0 %2218  ;;  %v2630_v16 = vsel %vm2621_vm7, %v2597_v58, %v2217_v3  ;;  %v1386_v3 = vld [vmem:[#allocation2 + $0x10a] sm:$0xff] }
 0x21a   : > { %2360 = vrot.lane.b32.xlu1 %v1384_v51, %s4219_s19  ;;  %v2631_v18 = vsel %vm2621_vm7, %v2598_v38, %v2219_v44  ;;  %v2434_v44 = vsel %vm1054_vm2, %v4626_v62, %v4961_v61 }
 0x21b   : > { %2234 = vrot.lane.b32.xlu0 %v1353_v53, %s4218_s11  ;;  %v2467_v59 = vsel %vm2456_vm13, %v2434_v44, %v5030_v31 }
 0x21c   : > { %v1837_v45 = vpop.permute.xlu1 %1836 }
 0x21d   : > { %v5060_v20 = vpop.permute.xlu0 %1456 }
 0x21e   : > { %1854 = vrot.lane.b32.xlu1 %v1353_v53, %s4215_s28 }
 0x21f   : > { %1472 = vrot.lane.b32.xlu0 %v1352_v47, %s4213_s22 }
 0x220   : > { %v2345_v24 = vpop.permute.xlu1 %2344 }
 0x221   : > { %v2663_v41 = vsel %vm2654_vm9, %v2630_v16, %v2345_v24  ;;  %v1965_v55 = vpop.permute.xlu0 %1964  ;;  %v1387_v24 = vld [vmem:[#allocation2 + $0x112] sm:$0xff] }
 0x222   : > { %4046 = vmatprep.mubr.msk.f32.mxu1 %vm2696_vm10, %v2663_v41  ;;  %2362 = vrot.lane.b32.xlu1 %v1385_v34, %s4219_s19 }
 0x223   : > { %1980 = vrot.lane.b32.xlu0 %v1384_v51, %s4216_s29 }
 0x224   : > { %v1839_v52 = vpop.permute.xlu1 %1838 }
 0x225   : > { %v5081_v40 = vpop.permute.xlu0 %1458 }
 0x226   : > { %1600 = vrot.lane.b32.xlu1 %v1384_v51, %s4212_s21  ;;  %v1355_v51 = vld [vmem:[#allocation2 + $0x111] sm:$0xff] }
 0x227   : > { %1474 = vrot.lane.b32.xlu0 %v1353_v53, %s4213_s22  ;;  %v2500_v53 = vsel %vm2489_vm15, %v2467_v59, %v5042_v33  ;;  %v2435_v33 = vsel %vm1054_vm2, %v4628_v63, %v4995_v37 }
 0x228   : > { %v2347_v50 = vpop.permute.xlu1 %2346  ;;  %v2533_v57 = vsel %vm2522_vm0, %v2500_v53, %v1837_v45  ;;  %v2468_v45 = vsel %vm2456_vm13, %v2435_v33, %v5032_v4 }
 0x229   : > { %v2664_v6 = vsel %vm2654_vm9, %v2631_v18, %v2347_v50  ;;  %v1967_v27 = vpop.permute.xlu0 %1966  ;;  %v2566_v25 = vsel %vm2555_vm4, %v2533_v57, %v1965_v55  ;;  %v2501_v41 = vsel %vm2489_vm15, %v2468_v45, %v5044_v29  ;;  %v1356_v50 = vld [vmem:[#allocation2 + $0x121] sm:$0xff] }
 0x22a   : > { %4047 = vmatmul.mubr.msk.f32.gmra.mrb[24].mxu1 %vm2696_vm10, %v2664_v6  ;;  %2108 = vrot.lane.b32.xlu1 %v5089_v17, %s4217_s30  ;;  %v5163_v6 = vld [vmem:[#allocation2 + $0x128] sm:$0xff] }
 0x22b   : > { %1982 = vrot.lane.b32.xlu0 %v1385_v34, %s4216_s29 }
 0x22c   : > { %v5095_v23 = vpop.permute.xlu1 %1584 }
 0x22d   : > { %v5097_v42 = vpop.permute.xlu0 %1586 }
 0x22e   : > { %1728 = vrot.lane.b32.xlu1 %v5089_v17, %s4214_s27 }
 0x22f   : > { %1602 = vrot.lane.b32.xlu0 %v1385_v34, %s4212_s21  ;;  %v2534_v34 = vsel %vm2522_vm0, %v2501_v41, %v1839_v52 }
 0x230   : > { %v2093_v22 = vpop.permute.xlu1 %2092  ;;  %v2567_v63 = vsel %vm2555_vm4, %v2534_v34, %v1967_v27 }
 0x231   : > { %v2095_v10 = vpop.permute.xlu0 %2094  ;;  %v2599_v62 = vsel %vm2588_vm6, %v2566_v25, %v2093_v22 }
 0x232   : > { %2236 = vrot.lane.b32.xlu1 %v1354_v56, %s4218_s11  ;;  %v2600_v37 = vsel %vm2588_vm6, %v2567_v63, %v2095_v10 }
 0x233   : > { %2110 = vrot.lane.b32.xlu0 %v5103_v49, %s4217_s30 }
 0x234   : > { %v5107_v28 = vpop.permute.xlu1 %1712 }
 0x235   : > { %v5109_v32 = vpop.permute.xlu0 %1714 }
 0x236   : > { %1856 = vrot.lane.b32.xlu1 %v1354_v56, %s4215_s28 }
 0x237   : > { %1730 = vrot.lane.b32.xlu0 %v5103_v49, %s4214_s27 }
 0x238   : > { %v2221_v5 = vpop.permute.xlu1 %2220 }
 0x239   : > { %v2223_v47 = vpop.permute.xlu0 %2222  ;;  %v2632_v61 = vsel %vm2621_vm7, %v2599_v62, %v2221_v5  ;;  %v1388_v5 = vld [vmem:[#allocation2 + $0x122] sm:$0xff] }
 0x23a   : > { %2364 = vrot.lane.b32.xlu1 %v1386_v3, %s4219_s19  ;;  %v2633_v4 = vsel %vm2621_vm7, %v2600_v37, %v2223_v47  ;;  %v2436_v47 = vsel %vm1054_vm2, %v4694_v0, %v5060_v20 }
 0x23b   : > { %2238 = vrot.lane.b32.xlu0 %v1355_v51, %s4218_s11  ;;  %v2469_v44 = vsel %vm2456_vm13, %v2436_v47, %v5095_v23 }
 0x23c   : > { %v1841_v2 = vpop.permute.xlu1 %1840 }
 0x23d   : > { %v1461_v46 = vpop.permute.xlu0 %1460 }
 0x23e   : > { %1858 = vrot.lane.b32.xlu1 %v1355_v51, %s4215_s28  ;;  %v2438_v25 = vsel %vm1054_vm2, %v4778_v43, %v1461_v46  ;;  %v1389_v46 = vld [vmem:[#allocation2 + $0x12a] sm:$0xff] }
 0x23f   : > { %1476 = vrot.lane.b32.xlu0 %v1354_v56, %s4213_s22 }
 0x240   : > { %v2349_v31 = vpop.permute.xlu1 %2348 }
 0x241   : > { %v2665_v58 = vsel %vm2654_vm9, %v2632_v61, %v2349_v31  ;;  %v1969_v16 = vpop.permute.xlu0 %1968 }
 0x242   : > { %4049 = vmatprep.mubr.msk.f32.mxu1 %vm2696_vm10, %v2665_v58  ;;  %2366 = vrot.lane.b32.xlu1 %v1387_v24, %s4219_s19  ;;  %v2437_v58 = vsel %vm1054_vm2, %v4696_v1, %v5081_v40 }
 0x243   : > { %1984 = vrot.lane.b32.xlu0 %v1386_v3, %s4216_s29 }
 0x244   : > { %v5140_v55 = vpop.permute.xlu1 %1842 }
 0x245   : > { %v5143_v21 = vpop.permute.xlu0 %1462 }
 0x246   : > { %1604 = vrot.lane.b32.xlu1 %v1386_v3, %s4212_s21  ;;  %v1357_v3 = vld [vmem:[#allocation2 + $0x129] sm:$0xff] }
 0x247   : > { %1478 = vrot.lane.b32.xlu0 %v1355_v51, %s4213_s22  ;;  %v2502_v51 = vsel %vm2489_vm15, %v2469_v44, %v5107_v28  ;;  %v1359_v44 = vld [vmem:[#allocation2 + $0x141] sm:$0xff] }
 0x248   : > { %v2351_v11 = vpop.permute.xlu1 %2350  ;;  %v2535_v53 = vsel %vm2522_vm0, %v2502_v51, %v1841_v2 }
 0x249   : > { %v2666_v39 = vsel %vm2654_vm9, %v2633_v4, %v2351_v11  ;;  %v1971_v29 = vpop.permute.xlu0 %1970  ;;  %v2568_v0 = vsel %vm2555_vm4, %v2535_v53, %v1969_v16  ;;  %v2439_v11 = vsel %vm1054_vm2, %v4785_v35, %v5143_v21 }
 0x24a   : > { %4050 = vmatmul.mubr.msk.f32.gmra.mrb[26].mxu1 %vm2696_vm10, %v2666_v39  ;;  %2112 = vrot.lane.b32.xlu1 %v5151_v30, %s4217_s30 }
 0x24b   : > { %1986 = vrot.lane.b32.xlu0 %v1387_v24, %s4216_s29 }
 0x24c   : > { %v1589_v52 = vpop.permute.xlu1 %1588 }
 0x24d   : > { %v5157_v26 = vpop.permute.xlu0 %1590  ;;  %v2471_v20 = vsel %vm2456_vm13, %v2438_v25, %v1589_v52  ;;  %v5272_v25 = vld [vmem:[%s5934_s6] ss:$0 sm:$0xff] }
 0x24e   : > { %1732 = vrot.lane.b32.xlu1 %v5151_v30, %s4214_s27  ;;  %v2472_v39 = vsel %vm2456_vm13, %v2439_v11, %v5157_v26 }
 0x24f   : > { %1606 = vrot.lane.b32.xlu0 %v1387_v24, %s4212_s21  ;;  %v2470_v24 = vsel %vm2456_vm13, %v2437_v58, %v5097_v42 }
 0x250   : > { %v2097_v38 = vpop.permute.xlu1 %2096  ;;  %v2503_v33 = vsel %vm2489_vm15, %v2470_v24, %v5109_v32 }
 0x251   : > { %v2099_v18 = vpop.permute.xlu0 %2098  ;;  %v2601_v23 = vsel %vm2588_vm6, %v2568_v0, %v2097_v38  ;;  %v2536_v1 = vsel %vm2522_vm0, %v2503_v33, %v5140_v55  ;;  %v5218_v55 = vld [vmem:[#allocation2 + $0x138] sm:$0xff] }
 0x252   : > { %2240 = vrot.lane.b32.xlu1 %v1356_v50, %s4218_s11  ;;  %v2569_v34 = vsel %vm2555_vm4, %v2536_v1, %v1971_v29 }
 0x253   : > { %2114 = vrot.lane.b32.xlu0 %v5163_v6, %s4217_s30  ;;  %v2602_v42 = vsel %vm2588_vm6, %v2569_v34, %v2099_v18 }
 0x254   : > { %v1717_v27 = vpop.permute.xlu1 %1716 }
 0x255   : > { %v1719_v22 = vpop.permute.xlu0 %1718  ;;  %v2504_v28 = vsel %vm2489_vm15, %v2471_v20, %v1717_v27  ;;  %v5247_v27 = vld [vmem:[#allocation2 + $0x140] sm:$0xff] }
 0x256   : > { %1860 = vrot.lane.b32.xlu1 %v1356_v50, %s4215_s28  ;;  %v2505_v29 = vsel %vm2489_vm15, %v2472_v39, %v1719_v22 }
 0x257   : > { %1734 = vrot.lane.b32.xlu0 %v5163_v6, %s4214_s27 }
 0x258   : > { %v2225_v10 = vpop.permute.xlu1 %2224 }
 0x259   : > { %v2227_v56 = vpop.permute.xlu0 %2226  ;;  %v2634_v62 = vsel %vm2621_vm7, %v2601_v23, %v2225_v10 }
 0x25a   : > { %2368 = vrot.lane.b32.xlu1 %v1388_v5, %s4219_s19  ;;  %v2635_v63 = vsel %vm2621_vm7, %v2602_v42, %v2227_v56  ;;  %v5302_v42 = vld [vmem:[#allocation2 + $0x150] sm:$0xff] }
 0x25b   : > { %2242 = vrot.lane.b32.xlu0 %v1357_v3, %s4218_s11 }
 0x25c   : > { %v1845_v59 = vpop.permute.xlu1 %1844 }
 0x25d   : > { %v5180_v57 = vpop.permute.xlu0 %1464  ;;  %v2537_v61 = vsel %vm2522_vm0, %v2504_v28, %v1845_v59 }
 0x25e   : > { %1862 = vrot.lane.b32.xlu1 %v1357_v3, %s4215_s28 }
 0x25f   : > { %1480 = vrot.lane.b32.xlu0 %v1356_v50, %s4213_s22  ;;  %v1358_v50 = vld [vmem:[#allocation2 + $0x139] sm:$0xff] }
 0x260   : > { %v2353_v2 = vpop.permute.xlu1 %2352 }
 0x261   : > { %v2667_v31 = vsel %vm2654_vm9, %v2634_v62, %v2353_v2  ;;  %v1973_v43 = vpop.permute.xlu0 %1972 }
 0x262   : > { %v2570_v16 = vsel %vm2555_vm4, %v2537_v61, %v1973_v43  ;;  %4052 = vmatprep.mubr.msk.f32.mxu1 %vm2696_vm10, %v2667_v31  ;;  %2370 = vrot.lane.b32.xlu1 %v1389_v46, %s4219_s19  ;;  %v1391_v31 = vld [vmem:[#allocation2 + $0x142] sm:$0xff]  ;;  %v2440_v43 = vsel %vm1054_vm2, %v4865_v54, %v5180_v57 }
 0x263   : > { %1988 = vrot.lane.b32.xlu0 %v1388_v5, %s4216_s29  ;;  %v2603_v45 = vsel %vm2588_vm6, %v2570_v16, %v4624_v60 }
 0x264   : > { %v1847_v41 = vpop.permute.xlu1 %1846  ;;  %v2636_v32 = vsel %vm2621_vm7, %v2603_v45, %v4650_v9 }
 0x265   : > { %v5208_v40 = vpop.permute.xlu0 %1466  ;;  %v2669_v9 = vsel %vm2654_vm9, %v2636_v32, %v4662_v15  ;;  %v2538_v35 = vsel %vm2522_vm0, %v2505_v29, %v1847_v41  ;;  %v1360_v29 = vld [vmem:[#allocation2 + $0x151] sm:$0xff] }
 0x266   : > { %1608 = vrot.lane.b32.xlu1 %v1388_v5, %s4212_s21 }
 0x267   : > { %1482 = vrot.lane.b32.xlu0 %v1357_v3, %s4213_s22  ;;  %v1390_v3 = vld [vmem:[#allocation2 + $0x13a] sm:$0xff] }
 0x268   : > { %v2355_v60 = vpop.permute.xlu1 %2354 }
 0x269   : > { %v2668_v37 = vsel %vm2654_vm9, %v2635_v63, %v2355_v60  ;;  %v1975_v4 = vpop.permute.xlu0 %1974  ;;  %v2441_v63 = vsel %vm1054_vm2, %v4876_v48, %v5208_v40 }
 0x26a   : > { %4053 = vmatmul.mubr.msk.f32.gmra.mrb[28].mxu1 %vm2696_vm10, %v2668_v37  ;;  %2116 = vrot.lane.b32.xlu1 %v5218_v55, %s4217_s30  ;;  %v2571_v38 = vsel %vm2555_vm4, %v2538_v35, %v1975_v4  ;;  %v5330_v35 = vld [vmem:[#allocation2 + $0x158] sm:$0xff] }
 0x26b   : > { %1990 = vrot.lane.b32.xlu0 %v1389_v46, %s4216_s29  ;;  %4055 = vmatprep.mubr.msk.f32.mxu1 %vm2696_vm10, %v2669_v9  ;;  %v2604_v26 = vsel %vm2588_vm6, %v2571_v38, %v4648_v8 }
 0x26c   : > { %v1593_v52 = vpop.permute.xlu1 %1592  ;;  %v2637_v10 = vsel %vm2621_vm7, %v2604_v26, %v4660_v14  ;;  %v5267_v14 = vld [vmem:[%s5933_s5] ss:$0 sm:$0xff] }
 0x26d   : > { %v5234_v21 = vpop.permute.xlu0 %1594  ;;  %v2473_v58 = vsel %vm2456_vm13, %v2440_v43, %v1593_v52 }
 0x26e   : > { %1736 = vrot.lane.b32.xlu1 %v5218_v55, %s4214_s27  ;;  %v2506_v41 = vsel %vm2489_vm15, %v2473_v58, %v4640_v7  ;;  %v2474_v37 = vsel %vm2456_vm13, %v2441_v63, %v5234_v21  ;;  %v1128_v58 = vld [vmem:[#allocation2 + $0xd8] sm:$0xff] }
 0x26f   : > { %1610 = vrot.lane.b32.xlu0 %v1389_v46, %s4212_s21  ;;  %v2539_v57 = vsel %vm2522_vm0, %v2506_v41, %v4656_v13  ;;  %v2507_v9 = vsel %vm2489_vm15, %v2474_v37, %v4654_v12 }
 0x270   : > { %v5240_v15 = vpop.permute.xlu1 %1850 }
 0x271   : > { %v5244_v18 = vpop.permute.xlu0 %1468  ;;  %v2540_v40 = vsel %vm2522_vm0, %v2507_v9, %v5240_v15 }
 0x272   : > { %2244 = vrot.lane.b32.xlu1 %v1358_v50, %s4218_s11 }
 0x273   : > { %2118 = vrot.lane.b32.xlu0 %v5247_v27, %s4217_s30 }
 0x274   : > { %v2359_v22 = vpop.permute.xlu1 %2358 }
 0x275   : > { %v2670_v56 = vsel %vm2654_vm9, %v2637_v10, %v2359_v22  ;;  %v1977_v5 = vpop.permute.xlu0 %1976  ;;  %v1392_v10 = vld [vmem:[#allocation2 + $0x152] sm:$0xff] }
 0x276   : > { %1864 = vrot.lane.b32.xlu1 %v1358_v50, %s4215_s28  ;;  %4056 = vmatmul.mubr.msk.f32.gmra.mrb[30].mxu1 %vm2696_vm10, %v2670_v56  ;;  %v2572_v7 = vsel %vm2555_vm4, %v2539_v57, %v1977_v5  ;;  %v1361_v56 = vld [vmem:[#allocation2 + $0x159] sm:$0xff] }
 0x277   : > { %1738 = vrot.lane.b32.xlu0 %v5247_v27, %s4214_s27 }
 0x278   : > { %v5258_v8 = vpop.permute.xlu1 %1596 }
 0x279   : > { %v5260_v47 = vpop.permute.xlu0 %1470 }
 0x27a   : > { %2372 = vrot.lane.b32.xlu1 %v1390_v3, %s4219_s19 }
 0x27b   : > { %2246 = vrot.lane.b32.xlu0 %v1359_v44, %s4218_s11 }
 0x27c   : > { %v2105_v51 = vpop.permute.xlu1 %2104 }
 0x27d   : > { %v1979_v59 = vpop.permute.xlu0 %1978  ;;  %v4036_v53 = vpop.f32.mrb[16].mxu1  ;;  %v2605_v32 = vsel %vm2588_vm6, %v2572_v7, %v2105_v51 }
 0x27e   : > { %v3026_v0 = vmul.f32 %v4036_v53, %v5267_v14  ;;  %v2859_v20 = vpop.f32.mrb[17].mxu1  ;;  %1866 = vrot.lane.b32.xlu1 %v1359_v44, %s4215_s28  ;;  %v2573_v52 = vsel %vm2555_vm4, %v2540_v40, %v1979_v59 }
 0x27f   : > { %v3025_v23 = vmul.f32 %v5267_v14, %v2859_v20  ;;  %1484 = vrot.lane.b32.xlu0 %v1358_v50, %s4213_s22 }
 0x280   : > { %v3065_v28 = vadd.f32 %v5272_v25, %v3026_v0  ;;  %v5279_v62 = vpop.permute.xlu1 %1724 }
 0x281   : > { %v3064_v2 = vadd.f32 %v5272_v25, %v3025_v23  ;;  %v5282_v61 = vpop.permute.xlu0 %1598 }
 0x282   : > { %v3129_v46 = vmul.f32 0.01, %v3065_v28  ;;  %2374 = vrot.lane.b32.xlu1 %v1391_v31, %s4219_s19  ;;  %vm3097_vm3 = vcmp.ge.f32.partialorder %v3065_v28, 0.0 }
 0x283   : > { %v3128_v16 = vmul.f32 0.01, %v3064_v2  ;;  %1992 = vrot.lane.b32.xlu0 %v1390_v3, %s4216_s29  ;;  %vm3096_vm8 = vcmp.ge.f32.partialorder %v3064_v2, 0.0 }
 0x284   : > { %v2233_v24 = vpop.permute.xlu1 %2232  ;;  %v3161_v1 = vsel %vm3097_vm3, %v3065_v28, %v3129_v46 }
 0x285   : > { %v2107_v33 = vpop.permute.xlu0 %2106  ;;  %v3160_v45 = vsel %vm3096_vm8, %v3064_v2, %v3128_v16  ;;  %v2638_v60 = vsel %vm2621_vm7, %v2605_v32, %v2233_v24  ;;  %v1393_v2 = vld [vmem:[#allocation2 + $0x15a] sm:$0xff]  ;;  %v5375_v32 = vld [vmem:[#allocation2 + $0x168] sm:$0xff] }
 0x286   : > { %4084 = vmatprep.mubr.msk.f32.mxu0 %vm1054_vm2, %v3160_v45  ;;  %1612 = vrot.lane.b32.xlu1 %v1390_v3, %s4212_s21  ;;  %v2606_v21 = vsel %vm2588_vm6, %v2573_v52, %v2107_v33  ;;  %v2442_v33 = vsel %vm1054_vm2, %v1128_v58, %v5244_v18 }
 0x287   : > { %1486 = vrot.lane.b32.xlu0 %v1359_v44, %s4213_s22  ;;  %4085 = vmatmul.mubr.msk.f32.vlgmr.msra.gmra.mrb[16].mxu0 %vm1054_vm2, %v3161_v1  ;;  %v2475_v41 = vsel %vm2456_vm13, %v2442_v33, %v5258_v8 }
 0x288   : > { %v5296_v54 = vpop.permute.xlu1 %1852  ;;  %v2508_v1 = vsel %vm2489_vm15, %v2475_v41, %v5279_v62 }
 0x289   : > { %v5300_v34 = vpop.permute.xlu0 %1726  ;;  %v2541_v18 = vsel %vm2522_vm0, %v2508_v1, %v5296_v54 }
 0x28a   : > { %2120 = vrot.lane.b32.xlu1 %v5302_v42, %s4217_s30 }
 0x28b   : > { %1994 = vrot.lane.b32.xlu0 %v1391_v31, %s4216_s29 }
 0x28c   : > { %v2361_v13 = vpop.permute.xlu1 %2360 }
 0x28d   : > { %v2671_v4 = vsel %vm2654_vm9, %v2638_v60, %v2361_v13  ;;  %v2235_v11 = vpop.permute.xlu0 %2234  ;;  %v1129_v13 = vld [vmem:[#allocation2 + $0xe0] sm:$0xff] }
 0x28e   : > { %1740 = vrot.lane.b32.xlu1 %v5302_v42, %s4214_s27  ;;  %4058 = vmatprep.mubr.msk.f32.mxu1 %vm2696_vm10, %v2671_v4  ;;  %v2639_v12 = vsel %vm2621_vm7, %v2606_v21, %v2235_v11  ;;  %v2443_v4 = vsel %vm1054_vm2, %v1129_v13, %v5260_v47  ;;  %v1362_v47 = vld [vmem:[#allocation2 + $0x169] sm:$0xff] }
 0x28f   : > { %1614 = vrot.lane.b32.xlu0 %v1391_v31, %s4212_s21  ;;  %v2476_v11 = vsel %vm2456_vm13, %v2443_v4, %v5282_v61 }
 0x290   : > { %v5322_v48 = vpop.permute.xlu1 %1854  ;;  %v2509_v9 = vsel %vm2489_vm15, %v2476_v11, %v5300_v34 }
 0x291   : > { %v5326_v39 = vpop.permute.xlu0 %1472 }
 0x292   : > { %2248 = vrot.lane.b32.xlu1 %v1360_v29, %s4218_s11  ;;  %v2444_v41 = vsel %vm1054_vm2, %v5018_v36, %v5326_v39 }
 0x293   : > { %2122 = vrot.lane.b32.xlu0 %v5330_v35, %s4217_s30 }
 0x294   : > { %v2363_v38 = vpop.permute.xlu1 %2362 }
 0x295   : > { %v2672_v26 = vsel %vm2654_vm9, %v2639_v12, %v2363_v38  ;;  %v1981_v15 = vpop.permute.xlu0 %1980  ;;  %v5402_v12 = vld [vmem:[#allocation2 + $0x170] sm:$0xff] }
 0x296   : > { %1868 = vrot.lane.b32.xlu1 %v1360_v29, %s4215_s28  ;;  %4059 = vmatmul.mubr.msk.f32.gmra.mrb[32].mxu1 %vm2696_vm10, %v2672_v26  ;;  %v2574_v63 = vsel %vm2555_vm4, %v2541_v18, %v1981_v15 }
 0x297   : > { %1742 = vrot.lane.b32.xlu0 %v5330_v35, %s4214_s27 }
 0x298   : > { %v5341_v50 = vpop.permute.xlu1 %1600 }
 0x299   : > { %v5343_v22 = vpop.permute.xlu0 %1474  ;;  %v2477_v18 = vsel %vm2456_vm13, %v2444_v41, %v5341_v50  ;;  %v1334_v41 = vld [vmem:[#allocation2 + $0x198] sm:$0xff] }
 0x29a   : > { %2376 = vrot.lane.b32.xlu1 %v1392_v10, %s4219_s19 }
 0x29b   : > { %2250 = vrot.lane.b32.xlu0 %v1361_v56, %s4218_s11 }
 0x29c   : > { %v2109_v5 = vpop.permute.xlu1 %2108 }
 0x29d   : > { %v1983_v3 = vpop.permute.xlu0 %1982  ;;  %v4039_v44 = vpop.f32.mrb[18].mxu1  ;;  %v2607_v8 = vsel %vm2588_vm6, %v2574_v63, %v2109_v5  ;;  %v1363_v5 = vld [vmem:[#allocation2 + $0x171] sm:$0xff] }
 0x29e   : > { %v3028_v51 = vmul.f32 %v4039_v44, %v5267_v14  ;;  %v2869_v59 = vpop.f32.mrb[19].mxu1  ;;  %1870 = vrot.lane.b32.xlu1 %v1361_v56, %s4215_s28 }
 0x29f   : > { %v3027_v53 = vmul.f32 %v5267_v14, %v2869_v59  ;;  %1488 = vrot.lane.b32.xlu0 %v1360_v29, %s4213_s22  ;;  %v2542_v29 = vsel %vm2522_vm0, %v2509_v9, %v5322_v48 }
 0x2a0   : > { %v3067_v0 = vadd.f32 %v5272_v25, %v3028_v51  ;;  %v5352_v20 = vpop.permute.xlu1 %1728  ;;  %v2575_v21 = vsel %vm2555_vm4, %v2542_v29, %v1983_v3 }
 0x2a1   : > { %v3066_v23 = vadd.f32 %v5272_v25, %v3027_v53  ;;  %v5355_v28 = vpop.permute.xlu0 %1602  ;;  %v2510_v63 = vsel %vm2489_vm15, %v2477_v18, %v5352_v20 }
 0x2a2   : > { %v3131_v31 = vmul.f32 0.01, %v3067_v0  ;;  %2378 = vrot.lane.b32.xlu1 %v1393_v2, %s4219_s19  ;;  %vm3099_vm5 = vcmp.ge.f32.partialorder %v3067_v0, 0.0 }
 0x2a3   : > { %v3130_v43 = vmul.f32 0.01, %v3066_v23  ;;  %1996 = vrot.lane.b32.xlu0 %v1392_v10, %s4216_s29  ;;  %vm3098_vm14 = vcmp.ge.f32.partialorder %v3066_v23, 0.0 }
 0x2a4   : > { %v2237_v46 = vpop.permute.xlu1 %2236  ;;  %v3163_v45 = vsel %vm3099_vm5, %v3067_v0, %v3131_v31 }
 0x2a5   : > { %v2111_v16 = vpop.permute.xlu0 %2110  ;;  %v3162_v24 = vsel %vm3098_vm14, %v3066_v23, %v3130_v43  ;;  %v2640_v62 = vsel %vm2621_vm7, %v2607_v8, %v2237_v46  ;;  %v1395_v46 = vld [vmem:[#allocation2 + $0x172] sm:$0xff] }
 0x2a6   : > { %4087 = vmatprep.mubr.msk.f32.mxu0 %vm1054_vm2, %v3162_v24  ;;  %1616 = vrot.lane.b32.xlu1 %v1392_v10, %s4212_s21  ;;  %v2608_v61 = vsel %vm2588_vm6, %v2575_v21, %v2111_v16  ;;  %v1333_v21 = vld [vmem:[#allocation2 + $0x188] sm:$0xff] }
 0x2a7   : > { %1490 = vrot.lane.b32.xlu0 %v1361_v56, %s4213_s22  ;;  %4088 = vmatmul.mubr.msk.f32.gmra.mrb[18].mxu0 %vm1054_vm2, %v3163_v45  ;;  %v1394_v56 = vld [vmem:[#allocation2 + $0x16a] sm:$0xff] }
 0x2a8   : > { %v5369_v57 = vpop.permute.xlu1 %1856 }
 0x2a9   : > { %v5373_v7 = vpop.permute.xlu0 %1730  ;;  %v2543_v36 = vsel %vm2522_vm0, %v2510_v63, %v5369_v57  ;;  %v2445_v57 = vsel %vm1054_vm2, %v5038_v19, %v5343_v22  ;;  %v1364_v19 = vld [vmem:[#allocation2 + $0x181] sm:$0xff] }
 0x2aa   : > { %2124 = vrot.lane.b32.xlu1 %v5375_v32, %s4217_s30  ;;  %v2478_v4 = vsel %vm2456_vm13, %v2445_v57, %v5355_v28 }
 0x2ab   : > { %1998 = vrot.lane.b32.xlu0 %v1393_v2, %s4216_s29  ;;  %v2511_v11 = vsel %vm2489_vm15, %v2478_v4, %v5373_v7 }
 0x2ac   : > { %v2365_v60 = vpop.permute.xlu1 %2364 }
 0x2ad   : > { %v2673_v37 = vsel %vm2654_vm9, %v2640_v62, %v2365_v60  ;;  %v2239_v54 = vpop.permute.xlu0 %2238  ;;  %v1332_v62 = vld [vmem:[#allocation2 + $0x180] sm:$0xff] }
 0x2ae   : > { %1744 = vrot.lane.b32.xlu1 %v5375_v32, %s4214_s27  ;;  %4061 = vmatprep.mubr.msk.f32.mxu1 %vm2696_vm10, %v2673_v37  ;;  %v2641_v34 = vsel %vm2621_vm7, %v2608_v61, %v2239_v54 }
 0x2af   : > { %1618 = vrot.lane.b32.xlu0 %v1393_v2, %s4212_s21 }
 0x2b0   : > { %v5394_v40 = vpop.permute.xlu1 %1858 }
 0x2b1   : > { %v5398_v52 = vpop.permute.xlu0 %1476  ;;  %v2544_v29 = vsel %vm2522_vm0, %v2511_v11, %v5394_v40 }
 0x2b2   : > { %2252 = vrot.lane.b32.xlu1 %v1362_v47, %s4218_s11  ;;  %v2446_v63 = vsel %vm1054_vm2, %v5089_v17, %v5398_v52 }
 0x2b3   : > { %2126 = vrot.lane.b32.xlu0 %v5402_v12, %s4217_s30 }
 0x2b4   : > { %v2367_v38 = vpop.permute.xlu1 %2366 }
 0x2b5   : > { %v2674_v26 = vsel %vm2654_vm9, %v2641_v34, %v2367_v38  ;;  %v1985_v48 = vpop.permute.xlu0 %1984 }
 0x2b6   : > { %1872 = vrot.lane.b32.xlu1 %v1362_v47, %s4215_s28  ;;  %4062 = vmatmul.mubr.msk.f32.gmra.mrb[34].mxu1 %vm2696_vm10, %v2674_v26  ;;  %v2576_v60 = vsel %vm2555_vm4, %v2543_v36, %v1985_v48  ;;  %v1396_v48 = vld [vmem:[#allocation2 + $0x182] sm:$0xff] }
 0x2b7   : > { %1746 = vrot.lane.b32.xlu0 %v5402_v12, %s4214_s27 }
 0x2b8   : > { %v5413_v15 = vpop.permute.xlu1 %1604 }
 0x2b9   : > { %v5415_v10 = vpop.permute.xlu0 %1478 }
 0x2ba   : > { %2380 = vrot.lane.b32.xlu1 %v1394_v56, %s4219_s19 }
 0x2bb   : > { %2254 = vrot.lane.b32.xlu0 %v1363_v5, %s4218_s11 }
 0x2bc   : > { %v2113_v3 = vpop.permute.xlu1 %2112 }
 0x2bd   : > { %v1987_v44 = vpop.permute.xlu0 %1986  ;;  %v4042_v51 = vpop.f32.mrb[20].mxu1  ;;  %v2609_v50 = vsel %vm2588_vm6, %v2576_v60, %v2113_v3  ;;  %v1367_v60 = vld [vmem:[#allocation2 + $0x1a1] sm:$0xff] }
 0x2be   : > { %v3030_v59 = vmul.f32 %v4042_v51, %v5267_v14  ;;  %v2879_v53 = vpop.f32.mrb[21].mxu1  ;;  %1874 = vrot.lane.b32.xlu1 %v1363_v5, %s4215_s28  ;;  %v2577_v22 = vsel %vm2555_vm4, %v2544_v29, %v1987_v44 }
 0x2bf   : > { %v3029_v0 = vmul.f32 %v5267_v14, %v2879_v53  ;;  %1492 = vrot.lane.b32.xlu0 %v1362_v47, %s4213_s22 }
 0x2c0   : > { %v3069_v23 = vadd.f32 %v5272_v25, %v3030_v59  ;;  %v5424_v2 = vpop.permute.xlu1 %1732 }
 0x2c1   : > { %v3068_v31 = vadd.f32 %v5272_v25, %v3029_v0  ;;  %v5427_v43 = vpop.permute.xlu0 %1606 }
 0x2c2   : > { %v3133_v58 = vmul.f32 0.01, %v3069_v23  ;;  %2382 = vrot.lane.b32.xlu1 %v1395_v46, %s4219_s19  ;;  %vm3101_vm12 = vcmp.ge.f32.partialorder %v3069_v23, 0.0 }
 0x2c3   : > { %v3132_v16 = vmul.f32 0.01, %v3068_v31  ;;  %2000 = vrot.lane.b32.xlu0 %v1394_v56, %s4216_s29  ;;  %vm3100_vm11 = vcmp.ge.f32.partialorder %v3068_v31, 0.0 }
 0x2c4   : > { %v2241_v24 = vpop.permute.xlu1 %2240  ;;  %v3165_v1 = vsel %vm3101_vm12, %v3069_v23, %v3133_v58  ;;  %v1302_v58 = vld [vmem:[#allocation2 + $0x18a] sm:$0xff] }
 0x2c5   : > { %v2115_v33 = vpop.permute.xlu0 %2114  ;;  %v3164_v45 = vsel %vm3100_vm11, %v3068_v31, %v3132_v16  ;;  %v2642_v13 = vsel %vm2621_vm7, %v2609_v50, %v2241_v24 }
 0x2c6   : > { %4090 = vmatprep.mubr.msk.f32.mxu0 %vm1054_vm2, %v3164_v45  ;;  %1620 = vrot.lane.b32.xlu1 %v1394_v56, %s4212_s21  ;;  %v2610_v28 = vsel %vm2588_vm6, %v2577_v22, %v2115_v33  ;;  %v1365_v56 = vld [vmem:[#allocation2 + $0x189] sm:$0xff]  ;;  %v1335_v33 = vld [vmem:[#allocation2 + $0x1a0] sm:$0xff] }
 0x2c7   : > { %1494 = vrot.lane.b32.xlu0 %v1363_v5, %s4213_s22  ;;  %4091 = vmatmul.mubr.msk.f32.gmra.mrb[20].mxu0 %vm1054_vm2, %v3165_v1 }
 0x2c8   : > { %v5442_v8 = vpop.permute.xlu1 %1860 }
 0x2c9   : > { %v5446_v39 = vpop.permute.xlu0 %1734 }
 0x2ca   : > { %2128 = vrot.lane.b32.xlu1 %v1332_v62, %s4217_s30 }
 0x2cb   : > { %2002 = vrot.lane.b32.xlu0 %v1395_v46, %s4216_s29 }
 0x2cc   : > { %v2369_v37 = vpop.permute.xlu1 %2368 }
 0x2cd   : > { %v2675_v20 = vsel %vm2654_vm9, %v2642_v13, %v2369_v37  ;;  %v2243_v54 = vpop.permute.xlu0 %2242  ;;  %v1366_v37 = vld [vmem:[#allocation2 + $0x199] sm:$0xff] }
 0x2ce   : > { %1748 = vrot.lane.b32.xlu1 %v1332_v62, %s4214_s27  ;;  %4064 = vmatprep.mubr.msk.f32.mxu1 %vm2696_vm10, %v2675_v20  ;;  %v2643_v61 = vsel %vm2621_vm7, %v2610_v28, %v2243_v54  ;;  %v2479_v62 = vsel %vm2456_vm13, %v2446_v63, %v5413_v15  ;;  %v1399_v54 = vld [vmem:[#allocation2 + $0x1a2] sm:$0xff] }
 0x2cf   : > { %1622 = vrot.lane.b32.xlu0 %v1395_v46, %s4212_s21  ;;  %v2512_v50 = vsel %vm2489_vm15, %v2479_v62, %v5424_v2  ;;  %v1398_v2 = vld [vmem:[#allocation2 + $0x19a] sm:$0xff] }
 0x2d0   : > { %v5464_v9 = vpop.permute.xlu1 %1862  ;;  %v2545_v17 = vsel %vm2522_vm0, %v2512_v50, %v5442_v8  ;;  %v2447_v8 = vsel %vm1054_vm2, %v5103_v49, %v5415_v10 }
 0x2d1   : > { %v5468_v47 = vpop.permute.xlu0 %1480 }
 0x2d2   : > { %2256 = vrot.lane.b32.xlu1 %v1364_v19, %s4218_s11 }
 0x2d3   : > { %2130 = vrot.lane.b32.xlu0 %v1333_v21, %s4217_s30 }
 0x2d4   : > { %v2371_v7 = vpop.permute.xlu1 %2370 }
 0x2d5   : > { %v2676_v34 = vsel %vm2654_vm9, %v2643_v61, %v2371_v7  ;;  %v1989_v38 = vpop.permute.xlu0 %1988 }
 0x2d6   : > { %1876 = vrot.lane.b32.xlu1 %v1364_v19, %s4215_s28  ;;  %4065 = vmatmul.mubr.msk.f32.gmra.mrb[36].mxu1 %vm2696_vm10, %v2676_v34  ;;  %v2578_v20 = vsel %vm2555_vm4, %v2545_v17, %v1989_v38  ;;  %v2480_v19 = vsel %vm2456_vm13, %v2447_v8, %v5427_v43 }
 0x2d7   : > { %1750 = vrot.lane.b32.xlu0 %v1333_v21, %s4214_s27  ;;  %v2513_v22 = vsel %vm2489_vm15, %v2480_v19, %v5446_v39 }
 0x2d8   : > { %v5479_v40 = vpop.permute.xlu1 %1608  ;;  %v2546_v28 = vsel %vm2522_vm0, %v2513_v22, %v5464_v9 }
 0x2d9   : > { %v5481_v26 = vpop.permute.xlu0 %1482 }
 0x2da   : > { %2384 = vrot.lane.b32.xlu1 %v1396_v48, %s4219_s19 }
 0x2db   : > { %2258 = vrot.lane.b32.xlu0 %v1365_v56, %s4218_s11 }
 0x2dc   : > { %v2117_v5 = vpop.permute.xlu1 %2116 }
 0x2dd   : > { %v1991_v3 = vpop.permute.xlu0 %1990  ;;  %v4045_v44 = vpop.f32.mrb[22].mxu1  ;;  %v2611_v15 = vsel %vm2588_vm6, %v2578_v20, %v2117_v5 }
 0x2de   : > { %v3032_v51 = vmul.f32 %v4045_v44, %v5267_v14  ;;  %v2889_v59 = vpop.f32.mrb[23].mxu1  ;;  %2004 = vrot.lane.b32.xlu1 %v1396_v48, %s4216_s29  ;;  %v2579_v49 = vsel %vm2555_vm4, %v2546_v28, %v1991_v3 }
 0x2df   : > { %v3031_v53 = vmul.f32 %v5267_v14, %v2889_v59  ;;  %1878 = vrot.lane.b32.xlu0 %v1365_v56, %s4215_s28 }
 0x2e0   : > { %v3071_v0 = vadd.f32 %v5272_v25, %v3032_v51  ;;  %v5490_v23 = vpop.permute.xlu1 %1736 }
 0x2e1   : > { %v3070_v31 = vadd.f32 %v5272_v25, %v3031_v53  ;;  %v5493_v46 = vpop.permute.xlu0 %1610 }
 0x2e2   : > { %v3135_v16 = vmul.f32 0.01, %v3071_v0  ;;  %2006 = vrot.lane.b32.xlu1 %v1302_v58, %s4216_s29  ;;  %vm3103_vm8 = vcmp.ge.f32.partialorder %v3071_v0, 0.0 }
 0x2e3   : > { %v3134_v24 = vmul.f32 0.01, %v3070_v31  ;;  %2386 = vrot.lane.b32.xlu0 %v1302_v58, %s4219_s19  ;;  %vm3102_vm3 = vcmp.ge.f32.partialorder %v3070_v31, 0.0 }
 0x2e4   : > { %v2245_v45 = vpop.permute.xlu1 %2244  ;;  %v3167_v36 = vsel %vm3103_vm8, %v3071_v0, %v3135_v16 }
 0x2e5   : > { %v2119_v1 = vpop.permute.xlu0 %2118  ;;  %v3166_v18 = vsel %vm3102_vm3, %v3070_v31, %v3134_v24  ;;  %v2644_v57 = vsel %vm2621_vm7, %v2611_v15, %v2245_v45 }
 0x2e6   : > { %4093 = vmatprep.mubr.msk.f32.mxu0 %vm1054_vm2, %v3166_v18  ;;  %2134 = vrot.lane.b32.xlu1 %v1335_v33, %s4217_s30  ;;  %v2612_v10 = vsel %vm2588_vm6, %v2579_v49, %v2119_v1 }
 0x2e7   : > { %2132 = vrot.lane.b32.xlu0 %v1334_v41, %s4217_s30  ;;  %4094 = vmatmul.mubr.msk.f32.gmra.mrb[22].mxu0 %vm1054_vm2, %v3167_v36  ;;  %v2448_v41 = vsel %vm1054_vm2, %v5151_v30, %v5468_v47 }
 0x2e8   : > { %v1865_v13 = vpop.permute.xlu1 %1864  ;;  %v2481_v18 = vsel %vm2456_vm13, %v2448_v41, %v5479_v40  ;;  %v2449_v40 = vsel %vm1054_vm2, %v5163_v6, %v5481_v26 }
 0x2e9   : > { %v5510_v52 = vpop.permute.xlu0 %1738  ;;  %v2514_v63 = vsel %vm2489_vm15, %v2481_v18, %v5490_v23  ;;  %v2482_v23 = vsel %vm2456_vm13, %v2449_v40, %v5493_v46 }
 0x2ea   : > { %2262 = vrot.lane.b32.xlu1 %v1367_v60, %s4218_s11  ;;  %v2547_v62 = vsel %vm2522_vm0, %v2514_v63, %v1865_v13  ;;  %v2515_v13 = vsel %vm2489_vm15, %v2482_v23, %v5510_v52 }
 0x2eb   : > { %2260 = vrot.lane.b32.xlu0 %v1366_v37, %s4218_s11  ;;  %s5703_s11 = scalar_lea.vmem %s5938_s10, %s3857_s17 }
 0x2ec   : > { %v2373_v4 = vpop.permute.xlu1 %2372 }
 0x2ed   : > { %v2677_v11 = vsel %vm2654_vm9, %v2644_v57, %v2373_v4  ;;  %v2247_v29 = vpop.permute.xlu0 %2246 }
 0x2ee   : > { %2390 = vrot.lane.b32.xlu1 %v1399_v54, %s4219_s19  ;;  %4067 = vmatprep.mubr.msk.f32.mxu1 %vm2696_vm10, %v2677_v11  ;;  %v2645_v7 = vsel %vm2621_vm7, %v2612_v10, %v2247_v29 }
 0x2ef   : > { %2388 = vrot.lane.b32.xlu0 %v1398_v2, %s4219_s19 }
 0x2f0   : > { %v1867_v21 = vpop.permute.xlu1 %1866 }
 0x2f1   : > { %v5530_v61 = vpop.permute.xlu0 %1484  ;;  %v2548_v54 = vsel %vm2522_vm0, %v2515_v13, %v1867_v21 }
 0x2f4   : > { %v2375_v34 = vpop.permute.xlu1 %2374 }
 0x2f5   : > { %v2678_v43 = vsel %vm2654_vm9, %v2645_v7, %v2375_v34  ;;  %v1993_v38 = vpop.permute.xlu0 %1992 }
 0x2f6   : > { %4068 = vmatmul.mubr.msk.f32.gmra.mrb[38].mxu1 %vm2696_vm10, %v2678_v43  ;;  %v2580_v50 = vsel %vm2555_vm4, %v2547_v62, %v1993_v38 }
 0x2f8   : > { %v5537_v48 = vpop.permute.xlu1 %1612 }
 0x2f9   : > { %v5539_v39 = vpop.permute.xlu0 %1486 }
 0x2fc   : > { %v2121_v56 = vpop.permute.xlu1 %2120 }
 0x2fd   : > { %v1995_v9 = vpop.permute.xlu0 %1994  ;;  %v4048_v5 = vpop.f32.mrb[24].mxu1  ;;  %v2613_v37 = vsel %vm2588_vm6, %v2580_v50, %v2121_v56 }
 0x2fe   : > { %v3034_v44 = vmul.f32 %v4048_v5, %v5267_v14  ;;  %v2899_v3 = vpop.f32.mrb[25].mxu1  ;;  %v2581_v4 = vsel %vm2555_vm4, %v2548_v54, %v1995_v9 }
 0x2ff   : > { %v3033_v51 = vmul.f32 %v5267_v14, %v2899_v3  ;;  %v2450_v3 = vsel %vm1054_vm2, %v5218_v55, %v5530_v61 }
 0x300   : > { %v3073_v59 = vadd.f32 %v5272_v25, %v3034_v44  ;;  %v5544_v53 = vpop.permute.xlu1 %1740 }
 0x301   : > { %v3072_v0 = vadd.f32 %v5272_v25, %v3033_v51  ;;  %v5547_v31 = vpop.permute.xlu0 %1614 }
 0x302   : > { %v3137_v58 = vmul.f32 0.01, %v3073_v59  ;;  %vm3105_vm5 = vcmp.ge.f32.partialorder %v3073_v59, 0.0 }
 0x303   : > { %v3136_v16 = vmul.f32 0.01, %v3072_v0  ;;  %vm3104_vm14 = vcmp.ge.f32.partialorder %v3072_v0, 0.0 }
 0x304   : > { %v2249_v24 = vpop.permute.xlu1 %2248  ;;  %v3169_v1 = vsel %vm3105_vm5, %v3073_v59, %v3137_v58  ;;  %v2483_v59 = vsel %vm2456_vm13, %v2450_v3, %v5537_v48 }
 0x305   : > { %v2123_v33 = vpop.permute.xlu0 %2122  ;;  %v3168_v45 = vsel %vm3104_vm14, %v3072_v0, %v3136_v16  ;;  %v2646_v30 = vsel %vm2621_vm7, %v2613_v37, %v2249_v24  ;;  %v2516_v0 = vsel %vm2489_vm15, %v2483_v59, %v5544_v53 }
 0x306   : > { %4096 = vmatprep.mubr.msk.f32.mxu0 %vm1054_vm2, %v3168_v45  ;;  %v2614_v2 = vsel %vm2588_vm6, %v2581_v4, %v2123_v33 }
 0x307   : > { %4097 = vmatmul.mubr.msk.f32.gmra.mrb[24].mxu0 %vm1054_vm2, %v3169_v1  ;;  %v2451_v1 = vsel %vm1054_vm2, %v5247_v27, %v5539_v39 }
 0x308   : > { %v1869_v36 = vpop.permute.xlu1 %1868  ;;  %v2484_v53 = vsel %vm2456_vm13, %v2451_v1, %v5547_v31 }
 0x309   : > { %v1743_v60 = vpop.permute.xlu0 %1742  ;;  %v2549_v16 = vsel %vm2522_vm0, %v2516_v0, %v1869_v36 }
 0x30a   : > { %v2517_v18 = vsel %vm2489_vm15, %v2484_v53, %v1743_v60 }
 0x30c   : > { %v2377_v47 = vpop.permute.xlu1 %2376 }
 0x30d   : > { %v2679_v17 = vsel %vm2654_vm9, %v2646_v30, %v2377_v47  ;;  %v2251_v20 = vpop.permute.xlu0 %2250 }
 0x30e   : > { %4070 = vmatprep.mubr.msk.f32.mxu1 %vm2696_vm10, %v2679_v17  ;;  %v2647_v11 = vsel %vm2621_vm7, %v2614_v2, %v2251_v20 }
 0x310   : > { %v1871_v15 = vpop.permute.xlu1 %1870 }
 0x311   : > { %v5572_v57 = vpop.permute.xlu0 %1488  ;;  %v2550_v36 = vsel %vm2522_vm0, %v2517_v18, %v1871_v15 }
 0x314   : > { %v2379_v6 = vpop.permute.xlu1 %2378 }
 0x315   : > { %v2680_v26 = vsel %vm2654_vm9, %v2647_v11, %v2379_v6  ;;  %v1997_v29 = vpop.permute.xlu0 %1996 }
 0x316   : > { %4071 = vmatmul.mubr.msk.f32.gmra.mrb[40].mxu1 %vm2696_vm10, %v2680_v26  ;;  %v2582_v33 = vsel %vm2555_vm4, %v2549_v16, %v1997_v29 }
 0x318   : > { %v5579_v46 = vpop.permute.xlu1 %1616 }
 0x319   : > { %v5581_v52 = vpop.permute.xlu0 %1490 }
 0x31a   : > { %v2453_v16 = vsel %vm1054_vm2, %v5330_v35, %v5581_v52 }
 0x31c   : > { %v2125_v8 = vpop.permute.xlu1 %2124 }
 0x31d   : > { %v1999_v19 = vpop.permute.xlu0 %1998  ;;  %v4051_v22 = vpop.f32.mrb[26].mxu1  ;;  %v2615_v55 = vsel %vm2588_vm6, %v2582_v33, %v2125_v8 }
 0x31e   : > { %v3036_v21 = vmul.f32 %v4051_v22, %v5267_v14  ;;  %v2909_v28 = vpop.f32.mrb[27].mxu1  ;;  %v2583_v50 = vsel %vm2555_vm4, %v2550_v36, %v1999_v19  ;;  %v2452_v22 = vsel %vm1054_vm2, %v5302_v42, %v5572_v57 }
 0x31f   : > { %v3035_v49 = vmul.f32 %v5267_v14, %v2909_v28  ;;  %v2485_v28 = vsel %vm2456_vm13, %v2452_v22, %v5579_v46 }
 0x320   : > { %v3075_v10 = vadd.f32 %v5272_v25, %v3036_v21  ;;  %v5586_v7 = vpop.permute.xlu1 %1744 }
 0x321   : > { %v3074_v34 = vadd.f32 %v5272_v25, %v3035_v49  ;;  %v5589_v43 = vpop.permute.xlu0 %1618  ;;  %v2518_v49 = vsel %vm2489_vm15, %v2485_v28, %v5586_v7 }
 0x322   : > { %v3139_v38 = vmul.f32 0.01, %v3075_v10  ;;  %vm3107_vm12 = vcmp.ge.f32.partialorder %v3075_v10, 0.0 }
 0x323   : > { %v3138_v56 = vmul.f32 0.01, %v3074_v34  ;;  %vm3106_vm11 = vcmp.ge.f32.partialorder %v3074_v34, 0.0 }
 0x324   : > { %v2253_v9 = vpop.permute.xlu1 %2252  ;;  %v3171_v51 = vsel %vm3107_vm12, %v3075_v10, %v3139_v38 }
 0x325   : > { %v2127_v5 = vpop.permute.xlu0 %2126  ;;  %v3170_v44 = vsel %vm3106_vm11, %v3074_v34, %v3138_v56  ;;  %v2648_v61 = vsel %vm2621_vm7, %v2615_v55, %v2253_v9  ;;  %v2486_v55 = vsel %vm2456_vm13, %v2453_v16, %v5589_v43 }
 0x326   : > { %4099 = vmatprep.mubr.msk.f32.mxu0 %vm1054_vm2, %v3170_v44  ;;  %v2616_v37 = vsel %vm2588_vm6, %v2583_v50, %v2127_v5 }
 0x327   : > { %4100 = vmatmul.mubr.msk.f32.gmra.mrb[26].mxu0 %vm1054_vm2, %v3171_v51 }
 0x328   : > { %v1873_v58 = vpop.permute.xlu1 %1872 }
 0x329   : > { %v5601_v24 = vpop.permute.xlu0 %1746  ;;  %v2551_v34 = vsel %vm2522_vm0, %v2518_v49, %v1873_v58 }
 0x32c   : > { %v2381_v45 = vpop.permute.xlu1 %2380 }
 0x32d   : > { %v2681_v41 = vsel %vm2654_vm9, %v2648_v61, %v2381_v45  ;;  %v2255_v48 = vpop.permute.xlu0 %2254  ;;  %v2519_v45 = vsel %vm2489_vm15, %v2486_v55, %v5601_v24 }
 0x32e   : > { %4073 = vmatprep.mubr.msk.f32.mxu1 %vm2696_vm10, %v2681_v41  ;;  %v2649_v30 = vsel %vm2621_vm7, %v2616_v37, %v2255_v48 }
 0x330   : > { %v1875_v63 = vpop.permute.xlu1 %1874 }
 0x331   : > { %v5615_v62 = vpop.permute.xlu0 %1492  ;;  %v2552_v1 = vsel %vm2522_vm0, %v2519_v45, %v1875_v63  ;;  %v5669_v63 = vld [vmem:[%s5936_s8] ss:$0 sm:$0xff] }
 0x334   : > { %v2383_v47 = vpop.permute.xlu1 %2382 }
 0x335   : > { %v2682_v27 = vsel %vm2654_vm9, %v2649_v30, %v2383_v47  ;;  %v2001_v39 = vpop.permute.xlu0 %2000 }
 0x336   : > { %4074 = vmatmul.mubr.msk.f32.gmra.mrb[42].mxu1 %vm2696_vm10, %v2682_v27  ;;  %v2584_v9 = vsel %vm2555_vm4, %v2551_v34, %v2001_v39  ;;  %v5677_v27 = vld [vmem:[%s5937_s9] ss:$0 sm:$0xff]  ;;  %v2454_v39 = vsel %vm1054_vm2, %v5375_v32, %v5615_v62 }
 0x338   : > { %v5622_v31 = vpop.permute.xlu1 %1620 }
 0x339   : > { %v5624_v60 = vpop.permute.xlu0 %1494 }
 0x33a   : > { %v2455_v30 = vsel %vm1054_vm2, %v5402_v12, %v5624_v60  ;;  %v2487_v12 = vsel %vm2456_vm13, %v2454_v39, %v5622_v31 }
 0x33c   : > { %v2129_v17 = vpop.permute.xlu1 %2128 }
 0x33d   : > { %v2003_v20 = vpop.permute.xlu0 %2002  ;;  %v4054_v40 = vpop.f32.mrb[28].mxu1  ;;  %v2617_v5 = vsel %vm2588_vm6, %v2584_v9, %v2129_v17 }
 0x33e   : > { %v3038_v23 = vmul.f32 %v4054_v40, %v5267_v14  ;;  %v2919_v13 = vpop.f32.mrb[29].mxu1  ;;  %v2585_v18 = vsel %vm2555_vm4, %v2552_v1, %v2003_v20  ;;  %v4172_v1 = vld [vmem:[%s4294_s20 + $0x10] sm:$0xff] }
 0x33f   : > { %v3037_v15 = vmul.f32 %v5267_v14, %v2919_v13 }
 0x340   : > { %v3077_v54 = vadd.f32 %v5272_v25, %v3038_v23  ;;  %v5629_v4 = vpop.permute.xlu1 %1748 }
 0x341   : > { %v3076_v2 = vadd.f32 %v5272_v25, %v3037_v15  ;;  %v1623_v11 = vpop.permute.xlu0 %1622  ;;  %v2520_v15 = vsel %vm2489_vm15, %v2487_v12, %v5629_v4 }
 0x342   : > { %v3141_v6 = vmul.f32 0.01, %v3077_v54  ;;  %vm3109_vm8 = vcmp.ge.f32.partialorder %v3077_v54, 0.0  ;;  %v2488_v17 = vsel %vm2456_vm13, %v2455_v30, %v1623_v11 }
 0x343   : > { %v3140_v26 = vmul.f32 0.01, %v3076_v2  ;;  %vm3108_vm3 = vcmp.ge.f32.partialorder %v3076_v2, 0.0 }
 0x344   : > { %v2257_v29 = vpop.permute.xlu1 %2256  ;;  %v3173_v21 = vsel %vm3109_vm8, %v3077_v54, %v3141_v6 }
 0x345   : > { %v2131_v8 = vpop.permute.xlu0 %2130  ;;  %v3172_v19 = vsel %vm3108_vm3, %v3076_v2, %v3140_v26  ;;  %v2650_v46 = vsel %vm2621_vm7, %v2617_v5, %v2257_v29  ;;  %v4169_v29 = vld [vmem:[%s4294_s20 + $0x8] sm:$0xff] }
 0x346   : > { %4102 = vmatprep.mubr.msk.f32.mxu0 %vm1054_vm2, %v3172_v19  ;;  %v2618_v35 = vsel %vm2588_vm6, %v2585_v18, %v2131_v8  ;;  %v4170_v19 = vld [vmem:[%s4294_s20] sm:$0xff] }
 0x347   : > { %4103 = vmatmul.mubr.msk.f32.gmra.mrb[28].mxu0 %vm1054_vm2, %v3173_v21 }
 0x348   : > { %v1877_v10 = vpop.permute.xlu1 %1876 }
 0x349   : > { %v1751_v38 = vpop.permute.xlu0 %1750  ;;  %v4057_v56 = vpop.f32.mrb[30].mxu1  ;;  %v2553_v2 = vsel %vm2522_vm0, %v2520_v15, %v1877_v10  ;;  %v4174_v15 = vld [vmem:[%s4294_s20 + $0x20] sm:$0xff] }
 0x34a   : > { %v3040_v42 = vmul.f32 %v4057_v56, %v5267_v14  ;;  %v2929_v57 = vpop.f32.mrb[31].mxu1  ;;  %v2521_v60 = vsel %vm2489_vm15, %v2488_v17, %v1751_v38 }
 0x34b   : > { %v3039_v44 = vmul.f32 %v5267_v14, %v2929_v57 }
 0x34c   : > { %v3079_v3 = vadd.f32 %v5272_v25, %v3040_v42  ;;  %v2385_v51 = vpop.permute.xlu1 %2384 }
 0x34d   : > { %v3078_v7 = vadd.f32 %v5272_v25, %v3039_v44  ;;  %v2683_v59 = vsel %vm2654_vm9, %v2650_v46, %v2385_v51  ;;  %v2259_v0 = vpop.permute.xlu0 %2258 }
 0x34e   : > { %v3143_v58 = vmul.f32 0.01, %v3079_v3  ;;  %4076 = vmatprep.mubr.msk.f32.mxu1 %vm2696_vm10, %v2683_v59  ;;  %vm3111_vm5 = vcmp.ge.f32.partialorder %v3079_v3, 0.0  ;;  %v2651_v43 = vsel %vm2621_vm7, %v2618_v35, %v2259_v0 }
 0x34f   : > { %v3142_v33 = vmul.f32 0.01, %v3078_v7  ;;  %vm3110_vm14 = vcmp.ge.f32.partialorder %v3078_v7, 0.0 }
 0x350   : > { %v2005_v61 = vpop.permute.xlu1 %2004  ;;  %v3175_v53 = vsel %vm3111_vm5, %v3079_v3, %v3143_v58 }
 0x351   : > { %v1879_v41 = vpop.permute.xlu0 %1878  ;;  %v3174_v48 = vsel %vm3110_vm14, %v3078_v7, %v3142_v33  ;;  %v2586_v6 = vsel %vm2555_vm4, %v2553_v2, %v2005_v61 }
 0x352   : > { %4105 = vmatprep.mubr.msk.f32.mxu0 %vm1054_vm2, %v3174_v48  ;;  %v2554_v32 = vsel %vm2522_vm0, %v2521_v60, %v1879_v41  ;;  %v4171_v41 = vld [vmem:[%s4294_s20 + $0x18] sm:$0xff] }
 0x353   : > { %4106 = vmatmul.mubr.msk.f32.gmra.mrb[30].mxu0 %vm1054_vm2, %v3175_v53 }
 0x354   : > { %v2007_v52 = vpop.permute.xlu1 %2006 }
 0x355   : > { %v2387_v36 = vpop.permute.xlu0 %2386  ;;  %v2587_v11 = vsel %vm2555_vm4, %v2554_v32, %v2007_v52 }
 0x356   : > { %v2684_v50 = vsel %vm2654_vm9, %v2651_v43, %v2387_v36 }
 0x357   : > { %4077 = vmatmul.mubr.msk.f32.gmra.mrb[44].mxu1 %vm2696_vm10, %v2684_v50 }
 0x358   : > { %v2135_v24 = vpop.permute.xlu1 %2134 }
 0x359   : > { %v2133_v37 = vpop.permute.xlu0 %2132  ;;  %v2620_v26 = vsel %vm2588_vm6, %v2587_v11, %v2135_v24  ;;  %v5752_v11 = vld [vmem:[%s5933_s5] ss:$0 sm:$0xff] }
 0x35a   : > { %v4086_v47 = vpop.f32.mrb[16].mxu0  ;;  %v2619_v4 = vsel %vm2588_vm6, %v2586_v6, %v2133_v37 }
 0x35b   : > { %v3522_v20 = vmul.f32 %v4086_v47, %v5669_v63  ;;  %v3355_v40 = vpop.f32.mrb[17].mxu0 }
 0x35c   : > { %v3521_v23 = vmul.f32 %v5669_v63, %v3355_v40  ;;  %v2263_v13 = vpop.permute.xlu1 %2262 }
 0x35d   : > { %v3561_v62 = vadd.f32 %v5677_v27, %v3522_v20  ;;  %v2261_v54 = vpop.permute.xlu0 %2260  ;;  %v2653_v21 = vsel %vm2621_vm7, %v2620_v26, %v2263_v13 }
 0x35e   : > { %v3560_v31 = vadd.f32 %v5677_v27, %v3521_v23  ;;  %v2652_v10 = vsel %vm2621_vm7, %v2619_v4, %v2261_v54  ;;  %v4173_v23 = vld [vmem:[%s4294_s20 + $0x28] sm:$0xff] }
 0x35f   : > { %v3593_v8 = vadd.f32 %v4169_v29, %v3561_v62  ;;  %v5759_v29 = vld [vmem:[%s5934_s6] ss:$0 sm:$0xff] }
 0x360   : > { %v3592_v22 = vadd.f32 %v4170_v19, %v3560_v31  ;;  %v2391_v28 = vpop.permute.xlu1 %2390 }
 0x361   : > { %v3625_v49 = vmax.f32 %v3593_v8, 0.0  ;;  %v2686_v34 = vsel %vm2654_vm9, %v2653_v21, %v2391_v28  ;;  %v2389_v38 = vpop.permute.xlu0 %2388 }
 0x362   : > { %v3624_v56 = vmax.f32 %v3592_v22, 0.0  ;;  %v2685_v9 = vsel %vm2654_vm9, %v2652_v10, %v2389_v38 }
 0x363   : > { %3657 = vst.msk [vmem:[%s5703_s11 + $0x8] sm:$0xff] %vm393_vm1, %v3625_v49  ;;  %4079 = vmatprep.mubr.msk.f32.mxu1 %vm2696_vm10, %v2685_v9 }
 0x364   : > { %3656 = vst.msk [vmem:[%s5703_s11] sm:$0xff] %vm393_vm1, %v3624_v56  ;;  %4080 = vmatmul.mubr.msk.f32.gmra.mrb[46].mxu1 %vm2696_vm10, %v2686_v34 }
 0x369   : > { %v4060_v42 = vpop.f32.mrb[32].mxu1 }
 0x36a   : > { %v3042_v57 = vmul.f32 %v4060_v42, %v5267_v14  ;;  %v2939_v5 = vpop.f32.mrb[33].mxu1  ;;  %v4177_v42 = vld [vmem:[%s4294_s20 + $0x38] sm:$0xff] }
 0x36b   : > { %v3041_v44 = vmul.f32 %v5267_v14, %v2939_v5  ;;  %v4178_v5 = vld [vmem:[%s4294_s20 + $0x30] sm:$0xff] }
 0x36c   : > { %v3081_v46 = vadd.f32 %v5272_v25, %v3042_v57 }
 0x36d   : > { %v3080_v3 = vadd.f32 %v5272_v25, %v3041_v44 }
 0x36e   : > { %v3145_v51 = vmul.f32 0.01, %v3081_v46  ;;  %vm3113_vm15 = vcmp.ge.f32.partialorder %v3081_v46, 0.0 }
 0x36f   : > { %v3144_v7 = vmul.f32 0.01, %v3080_v3  ;;  %vm3112_vm13 = vcmp.ge.f32.partialorder %v3080_v3, 0.0 }
 0x370   : > { %v3177_v0 = vsel %vm3113_vm15, %v3081_v46, %v3145_v51 }
 0x371   : > { %v3176_v59 = vsel %vm3112_vm13, %v3080_v3, %v3144_v7 }
 0x372   : > { %4108 = vmatprep.mubr.msk.f32.mxu0 %vm1054_vm2, %v3176_v59 }
 0x373   : > { %4109 = vmatmul.mubr.msk.f32.gmra.mrb[32].mxu0 %vm1054_vm2, %v3177_v0 }
 0x37a   : > { %v4089_v58 = vpop.f32.mrb[18].mxu0 }
 0x37b   : > { %v3524_v16 = vmul.f32 %v4089_v58, %v5669_v63  ;;  %v3365_v33 = vpop.f32.mrb[19].mxu0 }
 0x37c   : > { %v3523_v55 = vmul.f32 %v5669_v63, %v3365_v33 }
 0x37d   : > { %v3563_v61 = vadd.f32 %v5677_v27, %v3524_v16 }
 0x37e   : > { %v3562_v45 = vadd.f32 %v5677_v27, %v3523_v55 }
 0x37f   : > { %v3595_v48 = vadd.f32 %v4171_v41, %v3563_v61 }
 0x380   : > { %v3594_v53 = vadd.f32 %v4172_v1, %v3562_v45 }
 0x381   : > { %v3627_v18 = vmax.f32 %v3595_v48, 0.0 }
 0x382   : > { %v3626_v35 = vmax.f32 %v3594_v53, 0.0 }
 0x383   : > { %3659 = vst.msk [vmem:[%s5703_s11 + $0x18] sm:$0xff] %vm393_vm1, %v3627_v18 }
 0x384   : > { %3658 = vst.msk [vmem:[%s5703_s11 + $0x10] sm:$0xff] %vm393_vm1, %v3626_v35 }
 0x389   : > { %v4063_v52 = vpop.f32.mrb[34].mxu1 }
 0x38a   : > { %v3044_v43 = vmul.f32 %v4063_v52, %v5267_v14  ;;  %v2949_v36 = vpop.f32.mrb[35].mxu1  ;;  %v4179_v52 = vld [vmem:[%s4294_s20 + $0x48] sm:$0xff] }
 0x38b   : > { %v3043_v50 = vmul.f32 %v5267_v14, %v2949_v36  ;;  %v4180_v36 = vld [vmem:[%s4294_s20 + $0x40] sm:$0xff] }
 0x38c   : > { %v3083_v24 = vadd.f32 %v5272_v25, %v3044_v43 }
 0x38d   : > { %v3082_v37 = vadd.f32 %v5272_v25, %v3043_v50 }
 0x38e   : > { %v3147_v30 = vmul.f32 0.01, %v3083_v24  ;;  %vm3115_vm4 = vcmp.ge.f32.partialorder %v3083_v24, 0.0 }
 0x38f   : > { %v3146_v47 = vmul.f32 0.01, %v3082_v37  ;;  %vm3114_vm0 = vcmp.ge.f32.partialorder %v3082_v37, 0.0 }
 0x390   : > { %v3179_v17 = vsel %vm3115_vm4, %v3083_v24, %v3147_v30 }
 0x391   : > { %v3178_v39 = vsel %vm3114_vm0, %v3082_v37, %v3146_v47 }
 0x392   : > { %4111 = vmatprep.mubr.msk.f32.mxu0 %vm1054_vm2, %v3178_v39 }
 0x393   : > { %4112 = vmatmul.mubr.msk.f32.gmra.mrb[34].mxu0 %vm1054_vm2, %v3179_v17 }
 0x39a   : > { %v4092_v20 = vpop.f32.mrb[20].mxu0 }
 0x39b   : > { %v3526_v14 = vmul.f32 %v4092_v20, %v5669_v63  ;;  %v3375_v40 = vpop.f32.mrb[21].mxu0 }
 0x39c   : > { %v3525_v12 = vmul.f32 %v5669_v63, %v3375_v40 }
 0x39d   : > { %v3565_v25 = vadd.f32 %v5677_v27, %v3526_v14 }
 0x39e   : > { %v3564_v60 = vadd.f32 %v5677_v27, %v3525_v12 }
 0x39f   : > { %v3597_v13 = vadd.f32 %v4173_v23, %v3565_v25 }
 0x3a0   : > { %v3596_v32 = vadd.f32 %v4174_v15, %v3564_v60 }
 0x3a1   : > { %v3629_v62 = vmax.f32 %v3597_v13, 0.0 }
 0x3a2   : > { %v3628_v54 = vmax.f32 %v3596_v32, 0.0 }
 0x3a3   : > { %3661 = vst.msk [vmem:[%s5703_s11 + $0x28] sm:$0xff] %vm393_vm1, %v3629_v62 }
 0x3a4   : > { %3660 = vst.msk [vmem:[%s5703_s11 + $0x20] sm:$0xff] %vm393_vm1, %v3628_v54 }
 0x3a9   : > { %v4066_v2 = vpop.f32.mrb[36].mxu1 }
 0x3aa   : > { %v3046_v31 = vmul.f32 %v5752_v11, %v4066_v2  ;;  %v2959_v6 = vpop.f32.mrb[37].mxu1  ;;  %v4181_v2 = vld [vmem:[%s4294_s20 + $0x58] sm:$0xff] }
 0x3ab   : > { %v3045_v26 = vmul.f32 %v5752_v11, %v2959_v6  ;;  %v4182_v6 = vld [vmem:[%s4294_s20 + $0x50] sm:$0xff] }
 0x3ac   : > { %v3085_v8 = vadd.f32 %v5759_v29, %v3046_v31 }
 0x3ad   : > { %v3084_v4 = vadd.f32 %v5759_v29, %v3045_v26 }
 0x3ae   : > { %v3149_v19 = vmul.f32 0.01, %v3085_v8  ;;  %vm3117_vm7 = vcmp.ge.f32.partialorder %v3085_v8, 0.0 }
 0x3af   : > { %v3148_v22 = vmul.f32 0.01, %v3084_v4  ;;  %vm3116_vm6 = vcmp.ge.f32.partialorder %v3084_v4, 0.0 }
 0x3b0   : > { %v3181_v28 = vsel %vm3117_vm7, %v3085_v8, %v3149_v19 }
 0x3b1   : > { %v3180_v21 = vsel %vm3116_vm6, %v3084_v4, %v3148_v22 }
 0x3b2   : > { %4114 = vmatprep.mubr.msk.f32.mxu0 %vm1054_vm2, %v3180_v21 }
 0x3b3   : > { %4115 = vmatmul.mubr.msk.f32.gmra.mrb[36].mxu0 %vm1054_vm2, %v3181_v28 }
 0x3ba   : > { %v4095_v49 = vpop.f32.mrb[22].mxu0 }
 0x3bb   : > { %v3528_v10 = vmul.f32 %v4095_v49, %v5669_v63  ;;  %v3385_v34 = vpop.f32.mrb[23].mxu0 }
 0x3bc   : > { %v3527_v38 = vmul.f32 %v5669_v63, %v3385_v34 }
 0x3bd   : > { %v3567_v56 = vadd.f32 %v5677_v27, %v3528_v10 }
 0x3be   : > { %v3566_v9 = vadd.f32 %v5677_v27, %v3527_v38 }
 0x3bf   : > { %v3599_v57 = vadd.f32 %v4177_v42, %v3567_v56 }
 0x3c0   : > { %v3598_v44 = vadd.f32 %v4178_v5, %v3566_v9 }
 0x3c1   : > { %v3631_v46 = vmax.f32 %v3599_v57, 0.0 }
 0x3c2   : > { %v3630_v3 = vmax.f32 %v3598_v44, 0.0 }
 0x3c3   : > { %3663 = vst.msk [vmem:[%s5703_s11 + $0x38] sm:$0xff] %vm393_vm1, %v3631_v46 }
 0x3c4   : > { %3662 = vst.msk [vmem:[%s5703_s11 + $0x30] sm:$0xff] %vm393_vm1, %v3630_v3 }
 0x3c9   : > { %v4069_v51 = vpop.f32.mrb[38].mxu1 }
 0x3ca   : > { %v3048_v7 = vmul.f32 %v5752_v11, %v4069_v51  ;;  %v2969_v59 = vpop.f32.mrb[39].mxu1  ;;  %v4183_v51 = vld [vmem:[%s4294_s20 + $0x68] sm:$0xff] }
 0x3cb   : > { %v3047_v0 = vmul.f32 %v5752_v11, %v2969_v59  ;;  %v4184_v59 = vld [vmem:[%s4294_s20 + $0x60] sm:$0xff] }
 0x3cc   : > { %v3087_v58 = vadd.f32 %v5759_v29, %v3048_v7 }
 0x3cd   : > { %v3086_v16 = vadd.f32 %v5759_v29, %v3047_v0 }
 0x3ce   : > { %v3151_v33 = vmul.f32 0.01, %v3087_v58  ;;  %vm3119_vm10 = vcmp.ge.f32.partialorder %v3087_v58, 0.0 }
 0x3cf   : > { %v3150_v55 = vmul.f32 0.01, %v3086_v16  ;;  %vm3118_vm9 = vcmp.ge.f32.partialorder %v3086_v16, 0.0 }
 0x3d0   : > { %v3183_v45 = vsel %vm3119_vm10, %v3087_v58, %v3151_v33 }
 0x3d1   : > { %v3182_v61 = vsel %vm3118_vm9, %v3086_v16, %v3150_v55 }
 0x3d2   : > { %4117 = vmatprep.mubr.msk.f32.mxu0 %vm1054_vm2, %v3182_v61 }
 0x3d3   : > { %4118 = vmatmul.mubr.msk.f32.gmra.mrb[38].mxu0 %vm1054_vm2, %v3183_v45 }
 0x3da   : > { %v4098_v41 = vpop.f32.mrb[24].mxu0 }
 0x3db   : > { %v3530_v48 = vmul.f32 %v4098_v41, %v5669_v63  ;;  %v3395_v1 = vpop.f32.mrb[25].mxu0 }
 0x3dc   : > { %v3529_v53 = vmul.f32 %v5669_v63, %v3395_v1 }
 0x3dd   : > { %v3569_v18 = vadd.f32 %v5677_v27, %v3530_v48 }
 0x3de   : > { %v3568_v35 = vadd.f32 %v5677_v27, %v3529_v53  ;;  %v4185_v53 = vld [vmem:[%s4294_s20 + $0x78] sm:$0xff] }
 0x3df   : > { %v3601_v43 = vadd.f32 %v4179_v52, %v3569_v18 }
 0x3e0   : > { %v3600_v50 = vadd.f32 %v4180_v36, %v3568_v35 }
 0x3e1   : > { %v3633_v24 = vmax.f32 %v3601_v43, 0.0  ;;  %v4186_v43 = vld [vmem:[%s4294_s20 + $0x70] sm:$0xff] }
 0x3e2   : > { %v3632_v37 = vmax.f32 %v3600_v50, 0.0 }
 0x3e3   : > { %3665 = vst.msk [vmem:[%s5703_s11 + $0x48] sm:$0xff] %vm393_vm1, %v3633_v24 }
 0x3e4   : > { %3664 = vst.msk [vmem:[%s5703_s11 + $0x40] sm:$0xff] %vm393_vm1, %v3632_v37 }
 0x3e9   : > { %v4072_v30 = vpop.f32.mrb[40].mxu1 }
 0x3ea   : > { %v3050_v47 = vmul.f32 %v5752_v11, %v4072_v30  ;;  %v2979_v39 = vpop.f32.mrb[41].mxu1 }
 0x3eb   : > { %v3049_v17 = vmul.f32 %v5752_v11, %v2979_v39 }
 0x3ec   : > { %v3089_v20 = vadd.f32 %v5759_v29, %v3050_v47 }
 0x3ed   : > { %v3088_v14 = vadd.f32 %v5759_v29, %v3049_v17 }
 0x3ee   : > { %v3153_v40 = vmul.f32 0.01, %v3089_v20  ;;  %vm3121_vm12 = vcmp.ge.f32.partialorder %v3089_v20, 0.0 }
 0x3ef   : > { %v3152_v12 = vmul.f32 0.01, %v3088_v14  ;;  %vm3120_vm11 = vcmp.ge.f32.partialorder %v3088_v14, 0.0 }
 0x3f0   : > { %v3185_v60 = vsel %vm3121_vm12, %v3089_v20, %v3153_v40 }
 0x3f1   : > { %v3184_v25 = vsel %vm3120_vm11, %v3088_v14, %v3152_v12 }
 0x3f2   : > { %4120 = vmatprep.mubr.msk.f32.mxu0 %vm1054_vm2, %v3184_v25 }
 0x3f3   : > { %4121 = vmatmul.mubr.msk.f32.gmra.mrb[40].mxu0 %vm1054_vm2, %v3185_v60 }
 0x3fa   : > { %v4101_v23 = vpop.f32.mrb[26].mxu0 }
 0x3fb   : > { %v3532_v13 = vmul.f32 %v4101_v23, %v5669_v63  ;;  %v3405_v15 = vpop.f32.mrb[27].mxu0 }
 0x3fc   : > { %v3531_v32 = vmul.f32 %v5669_v63, %v3405_v15 }
 0x3fd   : > { %v3571_v62 = vadd.f32 %v5677_v27, %v3532_v13 }
 0x3fe   : > { %v3570_v54 = vadd.f32 %v5677_v27, %v3531_v32 }
 0x3ff   : > { %v3603_v31 = vadd.f32 %v4181_v2, %v3571_v62 }
 0x400   : > { %v3602_v26 = vadd.f32 %v4182_v6, %v3570_v54 }
 0x401   : > { %v3635_v8 = vmax.f32 %v3603_v31, 0.0 }
 0x402   : > { %v3634_v4 = vmax.f32 %v3602_v26, 0.0 }
 0x403   : > { %3667 = vst.msk [vmem:[%s5703_s11 + $0x58] sm:$0xff] %vm393_vm1, %v3635_v8  ;;  %v4187_v8 = vld [vmem:[%s4294_s20 + $0x88] sm:$0xff] }
 0x404   : > { %3666 = vst.msk [vmem:[%s5703_s11 + $0x50] sm:$0xff] %vm393_vm1, %v3634_v4 }
 0x409   : > { %v4075_v19 = vpop.f32.mrb[42].mxu1 }
 0x40a   : > { %v3052_v22 = vmul.f32 %v5752_v11, %v4075_v19  ;;  %v2989_v21 = vpop.f32.mrb[43].mxu1  ;;  %v4188_v19 = vld [vmem:[%s4294_s20 + $0x80] sm:$0xff] }
 0x40b   : > { %v3051_v28 = vmul.f32 %v5752_v11, %v2989_v21 }
 0x40c   : > { %v3091_v49 = vadd.f32 %v5759_v29, %v3052_v22 }
 0x40d   : > { %v3090_v10 = vadd.f32 %v5759_v29, %v3051_v28 }
 0x40e   : > { %v3155_v34 = vmul.f32 0.01, %v3091_v49  ;;  %vm3123_vm8 = vcmp.ge.f32.partialorder %v3091_v49, 0.0 }
 0x40f   : > { %v3154_v38 = vmul.f32 0.01, %v3090_v10  ;;  %vm3122_vm3 = vcmp.ge.f32.partialorder %v3090_v10, 0.0 }
 0x410   : > { %v3187_v9 = vsel %vm3123_vm8, %v3091_v49, %v3155_v34 }
 0x411   : > { %v3186_v56 = vsel %vm3122_vm3, %v3090_v10, %v3154_v38 }
 0x412   : > { %4123 = vmatprep.mubr.msk.f32.mxu0 %vm1054_vm2, %v3186_v56 }
 0x413   : > { %4124 = vmatmul.mubr.msk.f32.gmra.mrb[42].mxu0 %vm1054_vm2, %v3187_v9 }
 0x41a   : > { %v4104_v42 = vpop.f32.mrb[28].mxu0 }
 0x41b   : > { %v3534_v57 = vmul.f32 %v4104_v42, %v5669_v63  ;;  %v3415_v5 = vpop.f32.mrb[29].mxu0  ;;  %v4189_v42 = vld [vmem:[%s4294_s20 + $0x98] sm:$0xff] }
 0x41c   : > { %v3533_v44 = vmul.f32 %v5669_v63, %v3415_v5  ;;  %v4190_v5 = vld [vmem:[%s4294_s20 + $0x90] sm:$0xff] }
 0x41d   : > { %v3573_v46 = vadd.f32 %v5677_v27, %v3534_v57 }
 0x41e   : > { %v3572_v3 = vadd.f32 %v5677_v27, %v3533_v44 }
 0x41f   : > { %v3605_v7 = vadd.f32 %v4183_v51, %v3573_v46 }
 0x420   : > { %v3604_v0 = vadd.f32 %v4184_v59, %v3572_v3 }
 0x421   : > { %v3637_v58 = vmax.f32 %v3605_v7, 0.0 }
 0x422   : > { %v3636_v16 = vmax.f32 %v3604_v0, 0.0 }
 0x423   : > { %3669 = vst.msk [vmem:[%s5703_s11 + $0x68] sm:$0xff] %vm393_vm1, %v3637_v58 }
 0x424   : > { %3668 = vst.msk [vmem:[%s5703_s11 + $0x60] sm:$0xff] %vm393_vm1, %v3636_v16 }
 0x426   : > { %v4107_v33 = vpop.f32.mrb[30].mxu0 }
 0x427   : > { %v3536_v55 = vmul.f32 %v4107_v33, %v5669_v63  ;;  %v3425_v61 = vpop.f32.mrb[31].mxu0  ;;  %v4191_v33 = vld [vmem:[%s4294_s20 + $0xa8] sm:$0xff] }
 0x428   : > { %v3535_v45 = vmul.f32 %v5669_v63, %v3425_v61  ;;  %v4192_v61 = vld [vmem:[%s4294_s20 + $0xa0] sm:$0xff] }
 0x429   : > { %v3575_v41 = vadd.f32 %v5677_v27, %v3536_v55 }
 0x42a   : > { %v3574_v48 = vadd.f32 %v5677_v27, %v3535_v45  ;;  %v4078_v1 = vpop.f32.mrb[44].mxu1 }
 0x42b   : > { %v3607_v18 = vadd.f32 %v4185_v53, %v3575_v41  ;;  %v3054_v35 = vmul.f32 %v5752_v11, %v4078_v1  ;;  %v2999_v52 = vpop.f32.mrb[45].mxu1 }
 0x42c   : > { %v3606_v36 = vadd.f32 %v4186_v43, %v3574_v48  ;;  %v3053_v50 = vmul.f32 %v5752_v11, %v2999_v52 }
 0x42d   : > { %v3639_v24 = vmax.f32 %v3607_v18, 0.0  ;;  %v3093_v37 = vadd.f32 %v5759_v29, %v3054_v35 }
 0x42e   : > { %v3638_v30 = vmax.f32 %v3606_v36, 0.0  ;;  %v3092_v47 = vadd.f32 %v5759_v29, %v3053_v50  ;;  %v4193_v36 = vld [vmem:[%s4294_s20 + $0xb8] sm:$0xff] }
 0x42f   : > { %3671 = vst.msk [vmem:[%s5703_s11 + $0x78] sm:$0xff] %vm393_vm1, %v3639_v24  ;;  %v3157_v39 = vmul.f32 0.01, %v3093_v37  ;;  %vm3125_vm5 = vcmp.ge.f32.partialorder %v3093_v37, 0.0  ;;  %v4194_v24 = vld [vmem:[%s4294_s20 + $0xb0] sm:$0xff] }
 0x430   : > { %3670 = vst.msk [vmem:[%s5703_s11 + $0x70] sm:$0xff] %vm393_vm1, %v3638_v30  ;;  %v3156_v17 = vmul.f32 0.01, %v3092_v47  ;;  %vm3124_vm14 = vcmp.ge.f32.partialorder %v3092_v47, 0.0 }
 0x431   : > { %v3189_v14 = vsel %vm3125_vm5, %v3093_v37, %v3157_v39 }
 0x432   : > { %v3188_v20 = vsel %vm3124_vm14, %v3092_v47, %v3156_v17 }
 0x433   : > { %4126 = vmatprep.mubr.msk.f32.mxu0 %vm1054_vm2, %v3188_v20 }
 0x434   : > { %4127 = vmatmul.mubr.msk.f32.gmra.mrb[44].mxu0 %vm1054_vm2, %v3189_v14 }
 0x437   : > { %v4081_v40 = vpop.f32.mrb[46].mxu1 }
 0x438   : > { %v3056_v12 = vmul.f32 %v5752_v11, %v4081_v40  ;;  %v3009_v25 = vpop.f32.mrb[47].mxu1 }
 0x439   : > { %v3055_v60 = vmul.f32 %v5752_v11, %v3009_v25  ;;  %v4195_v25 = vld [vmem:[%s4294_s20 + $0xc8] sm:$0xff] }
 0x43a   : > { %v3095_v23 = vadd.f32 %v5759_v29, %v3056_v12 }
 0x43b   : > { %v3094_v13 = vadd.f32 %v5759_v29, %v3055_v60 }
 0x43c   : > { %v3159_v15 = vmul.f32 0.01, %v3095_v23  ;;  %vm3127_vm15 = vcmp.ge.f32.partialorder %v3095_v23, 0.0 }
 0x43d   : > { %v3158_v32 = vmul.f32 0.01, %v3094_v13  ;;  %vm3126_vm13 = vcmp.ge.f32.partialorder %v3094_v13, 0.0 }
 0x43e   : > { %v3191_v54 = vsel %vm3127_vm15, %v3095_v23, %v3159_v15  ;;  %v4196_v23 = vld [vmem:[%s4294_s20 + $0xc0] sm:$0xff] }
 0x43f   : > { %v3190_v62 = vsel %vm3126_vm13, %v3094_v13, %v3158_v32 }
 0x440   : > { %4129 = vmatprep.mubr.msk.f32.mxu0 %vm1054_vm2, %v3190_v62 }
 0x441   : > { %4130 = vmatmul.mubr.msk.f32.gmra.mrb[46].mxu0 %vm1054_vm2, %v3191_v54 }
 0x446   : > { %v4110_v2 = vpop.f32.mrb[32].mxu0 }
 0x447   : > { %v3538_v11 = vmul.f32 %v4110_v2, %v5669_v63  ;;  %v3435_v31 = vpop.f32.mrb[33].mxu0 }
 0x448   : > { %v3537_v6 = vmul.f32 %v5669_v63, %v3435_v31 }
 0x449   : > { %v3577_v29 = vadd.f32 %v5677_v27, %v3538_v11 }
 0x44a   : > { %v3576_v26 = vadd.f32 %v5677_v27, %v3537_v6 }
 0x44b   : > { %v3609_v4 = vadd.f32 %v4187_v8, %v3577_v29  ;;  %v4197_v29 = vld [vmem:[%s4294_s20 + $0xd8] sm:$0xff]  ;;  %v4198_v8 = vld [vmem:[%s4294_s20 + $0xd0] sm:$0xff] }
 0x44c   : > { %v3608_v22 = vadd.f32 %v4188_v19, %v3576_v26 }
 0x44d   : > { %v3641_v21 = vmax.f32 %v3609_v4, 0.0 }
 0x44e   : > { %v3640_v28 = vmax.f32 %v3608_v22, 0.0 }
 0x44f   : > { %3673 = vst.msk [vmem:[%s5703_s11 + $0x88] sm:$0xff] %vm393_vm1, %v3641_v21 }
 0x450   : > { %3672 = vst.msk [vmem:[%s5703_s11 + $0x80] sm:$0xff] %vm393_vm1, %v3640_v28 }
 0x466   : > { %v4113_v49 = vpop.f32.mrb[34].mxu0 }
 0x467   : > { %v3540_v10 = vmul.f32 %v4113_v49, %v5669_v63  ;;  %v3445_v34 = vpop.f32.mrb[35].mxu0 }
 0x468   : > { %v3539_v38 = vmul.f32 %v5669_v63, %v3445_v34 }
 0x469   : > { %v3579_v56 = vadd.f32 %v5677_v27, %v3540_v10 }
 0x46a   : > { %v3578_v9 = vadd.f32 %v5677_v27, %v3539_v38 }
 0x46b   : > { %v3611_v57 = vadd.f32 %v4189_v42, %v3579_v56  ;;  %v4199_v56 = vld [vmem:[%s4294_s20 + $0xe8] sm:$0xff]  ;;  %v4200_v42 = vld [vmem:[%s4294_s20 + $0xe0] sm:$0xff] }
 0x46c   : > { %v3610_v44 = vadd.f32 %v4190_v5, %v3578_v9 }
 0x46d   : > { %v3643_v46 = vmax.f32 %v3611_v57, 0.0 }
 0x46e   : > { %v3642_v3 = vmax.f32 %v3610_v44, 0.0 }
 0x46f   : > { %3675 = vst.msk [vmem:[%s5703_s11 + $0x98] sm:$0xff] %vm393_vm1, %v3643_v46 }
 0x470   : > { %3674 = vst.msk [vmem:[%s5703_s11 + $0x90] sm:$0xff] %vm393_vm1, %v3642_v3 }
 0x486   : > { %v4116_v51 = vpop.f32.mrb[36].mxu0 }
 0x487   : > { %v3542_v7 = vmul.f32 %v4116_v51, %v5669_v63  ;;  %v3455_v59 = vpop.f32.mrb[37].mxu0 }
 0x488   : > { %v3541_v0 = vmul.f32 %v5669_v63, %v3455_v59 }
 0x489   : > { %v3581_v58 = vadd.f32 %v5677_v27, %v3542_v7 }
 0x48a   : > { %v3580_v16 = vadd.f32 %v5677_v27, %v3541_v0 }
 0x48b   : > { %v3613_v55 = vadd.f32 %v4191_v33, %v3581_v58  ;;  %v4201_v58 = vld [vmem:[%s4294_s20 + $0xf8] sm:$0xff]  ;;  %v4202_v33 = vld [vmem:[%s4294_s20 + $0xf0] sm:$0xff] }
 0x48c   : > { %v3612_v45 = vadd.f32 %v4192_v61, %v3580_v16 }
 0x48d   : > { %v3645_v41 = vmax.f32 %v3613_v55, 0.0 }
 0x48e   : > { %v3644_v48 = vmax.f32 %v3612_v45, 0.0 }
 0x48f   : > { %3677 = vst.msk [vmem:[%s5703_s11 + $0xa8] sm:$0xff] %vm393_vm1, %v3645_v41 }
 0x490   : > { %3676 = vst.msk [vmem:[%s5703_s11 + $0xa0] sm:$0xff] %vm393_vm1, %v3644_v48 }
 0x4a6   : > { %v4119_v1 = vpop.f32.mrb[38].mxu0 }
 0x4a7   : > { %v3544_v53 = vmul.f32 %v4119_v1, %v5669_v63  ;;  %v3465_v18 = vpop.f32.mrb[39].mxu0 }
 0x4a8   : > { %v3543_v35 = vmul.f32 %v5669_v63, %v3465_v18 }
 0x4a9   : > { %v3583_v52 = vadd.f32 %v5677_v27, %v3544_v53 }
 0x4aa   : > { %v3582_v43 = vadd.f32 %v5677_v27, %v3543_v35 }
 0x4ab   : > { %v3615_v50 = vadd.f32 %v4193_v36, %v3583_v52 }
 0x4ac   : > { %v3614_v37 = vadd.f32 %v4194_v24, %v3582_v43 }
 0x4ad   : > { %v3647_v30 = vmax.f32 %v3615_v50, 0.0 }
 0x4ae   : > { %v3646_v47 = vmax.f32 %v3614_v37, 0.0 }
 0x4af   : > { %3679 = vst.msk [vmem:[%s5703_s11 + $0xb8] sm:$0xff] %vm393_vm1, %v3647_v30 }
 0x4b0   : > { %3678 = vst.msk [vmem:[%s5703_s11 + $0xb0] sm:$0xff] %vm393_vm1, %v3646_v47 }
 0x4c6   : > { %v4122_v39 = vpop.f32.mrb[40].mxu0 }
 0x4c7   : > { %v3546_v17 = vmul.f32 %v4122_v39, %v5669_v63  ;;  %v3475_v20 = vpop.f32.mrb[41].mxu0 }
 0x4c8   : > { %v3545_v14 = vmul.f32 %v5669_v63, %v3475_v20 }
 0x4c9   : > { %v3585_v40 = vadd.f32 %v5677_v27, %v3546_v17 }
 0x4ca   : > { %v3584_v12 = vadd.f32 %v5677_v27, %v3545_v14 }
 0x4cb   : > { %v3617_v60 = vadd.f32 %v4195_v25, %v3585_v40 }
 0x4cc   : > { %v3616_v13 = vadd.f32 %v4196_v23, %v3584_v12 }
 0x4cd   : > { %v3649_v15 = vmax.f32 %v3617_v60, 0.0 }
 0x4ce   : > { %v3648_v32 = vmax.f32 %v3616_v13, 0.0 }
 0x4cf   : > { %3681 = vst.msk [vmem:[%s5703_s11 + $0xc8] sm:$0xff] %vm393_vm1, %v3649_v15 }
 0x4d0   : > { %3680 = vst.msk [vmem:[%s5703_s11 + $0xc0] sm:$0xff] %vm393_vm1, %v3648_v32 }
 0x4e6   : > { %v4125_v62 = vpop.f32.mrb[42].mxu0 }
 0x4e7   : > { %v3548_v54 = vmul.f32 %v4125_v62, %v5669_v63  ;;  %v3485_v2 = vpop.f32.mrb[43].mxu0 }
 0x4e8   : > { %v3547_v11 = vmul.f32 %v5669_v63, %v3485_v2 }
 0x4e9   : > { %v3587_v31 = vadd.f32 %v5677_v27, %v3548_v54 }
 0x4ea   : > { %v3586_v6 = vadd.f32 %v5677_v27, %v3547_v11 }
 0x4eb   : > { %v3619_v26 = vadd.f32 %v4197_v29, %v3587_v31 }
 0x4ec   : > { %v3618_v4 = vadd.f32 %v4198_v8, %v3586_v6 }
 0x4ed   : > { %v3651_v19 = vmax.f32 %v3619_v26, 0.0 }
 0x4ee   : > { %v3650_v22 = vmax.f32 %v3618_v4, 0.0 }
 0x4ef   : > { %3683 = vst.msk [vmem:[%s5703_s11 + $0xd8] sm:$0xff] %vm393_vm1, %v3651_v19 }
 0x4f0   : > { %3682 = vst.msk [vmem:[%s5703_s11 + $0xd0] sm:$0xff] %vm393_vm1, %v3650_v22 }
 0x507   : > { %v4128_v21 = vpop.f32.mrb[44].mxu0 }
 0x508   : > { %v3550_v28 = vmul.f32 %v4128_v21, %v5669_v63  ;;  %v3495_v49 = vpop.f32.mrb[45].mxu0 }
 0x509   : > { %v3549_v10 = vmul.f32 %v5669_v63, %v3495_v49 }
 0x50a   : > { %v3589_v34 = vadd.f32 %v5677_v27, %v3550_v28 }
 0x50b   : > { %v3588_v38 = vadd.f32 %v5677_v27, %v3549_v10 }
 0x50c   : > { %v3621_v9 = vadd.f32 %v4199_v56, %v3589_v34 }
 0x50d   : > { %v3620_v57 = vadd.f32 %v4200_v42, %v3588_v38 }
 0x50e   : > { %v3653_v5 = vmax.f32 %v3621_v9, 0.0 }
 0x50f   : > { %v3652_v44 = vmax.f32 %v3620_v57, 0.0 }
 0x510   : > { %3685 = vst.msk [vmem:[%s5703_s11 + $0xe8] sm:$0xff] %vm393_vm1, %v3653_v5 }
 0x511   : > { %3684 = vst.msk [vmem:[%s5703_s11 + $0xe0] sm:$0xff] %vm393_vm1, %v3652_v44 }
 0x514   : > { %v4131_v46 = vpop.f32.mrb[46].mxu0 }
 0x515   : > { %v3552_v3 = vmul.f32 %v4131_v46, %v5669_v63  ;;  %v3505_v51 = vpop.f32.mrb[47].mxu0 }
 0x516   : > { %v3551_v7 = vmul.f32 %v5669_v63, %v3505_v51 }
 0x517   : > { %v3591_v59 = vadd.f32 %v5677_v27, %v3552_v3 }
 0x518   : > { %v3590_v0 = vadd.f32 %v5677_v27, %v3551_v7 }
 0x519   : > { %v3623_v16 = vadd.f32 %v4201_v58, %v3591_v59 }
 0x51a   : > { %v3622_v55 = vadd.f32 %v4202_v33, %v3590_v0 }
 0x51b   : > { %v3655_v61 = vmax.f32 %v3623_v16, 0.0 }
 0x51c   : > { %v3654_v45 = vmax.f32 %v3622_v55, 0.0 }
 0x51d   : > { %3687 = vst.msk [vmem:[%s5703_s11 + $0xf8] sm:$0xff] %vm393_vm1, %v3655_v61 }
 0x51e   : > { %3686 = vst.msk [vmem:[%s5703_s11 + $0xf0] sm:$0xff] %vm393_vm1, %v3654_v45 }
 0x51f PF: > { %s20_s13 = sadd.s32 1, %s4209_s13  }
 0x520   : > { %p17_p4 = scmp.ge.s32.totalorder %s20_s13, 4  }
 0x522   :  { %19 = sbr.rel (!%p17_p4) target bundleno = 1 (0x1), region = 92 }

</bundles_post_ra>
